<compile_context>
chip_gen: v6e
topology: v6e:2x2x1
jax: 0.10.0
libtpu: 0.0.40
codegen_flags: <defaults>
</compile_context>

<pallas_src>
import functools
import math

import jax
import jax.numpy as jnp
from jax.experimental import pallas as pl
from jax.experimental.pallas import tpu as pltpu


def _attention_kernel(q_ref, k_ref, v_ref,
                      wq_ref, bq_ref, wk_ref, bk_ref,
                      wv_ref, bv_ref, wo_ref, bo_ref,
                      o_ref, *, num_heads):
    B, Lq, Dq = q_ref.shape
    _, Lkv, Dk = k_ref.shape
    _, _, Dv = v_ref.shape
    P = wq_ref.shape[1]        # qk_proj_dim
    Pv = wv_ref.shape[1]       # v_proj_dim
    out_dim = wo_ref.shape[1]
    H = num_heads
    Cqk = P // H
    Cv = Pv // H

    # ---- Projections on batch-packed slabs (M = B*L rows fills the MXU) ----
    # (B, L, D) -> (B*L, D) is layout-compatible when L % 8 == 0 (free).
    q2 = q_ref[...].reshape(B * Lq, Dq)
    k2 = k_ref[...].reshape(B * Lkv, Dk)
    v2 = v_ref[...].reshape(B * Lkv, Dv)

    # wq/bq arrive pre-scaled by 1/sqrt(Cqk) from the wrapper.
    qp = jnp.dot(q2, wq_ref[...], preferred_element_type=jnp.float32) + bq_ref[...]
    kp = jnp.dot(k2, wk_ref[...], preferred_element_type=jnp.float32) + bk_ref[...]
    vp = jnp.dot(v2, wv_ref[...], preferred_element_type=jnp.float32) + bv_ref[...]

    qp = qp.reshape(B, Lq, P)
    kp = kp.reshape(B, Lkv, P)
    vp = vp.reshape(B, Lkv, Pv)

    wo = wo_ref[...]

    # ---- Per-head attention with an accumulated output projection ----------
    acc = jnp.zeros((B * Lq, out_dim), jnp.float32)
    for h in range(H):                                  # H is small: unroll
        qh = qp[:, :, h * Cqk:(h + 1) * Cqk]            # (B, Lq, Cqk)
        kh = kp[:, :, h * Cqk:(h + 1) * Cqk]            # (B, Lkv, Cqk)
        vh = vp[:, :, h * Cv:(h + 1) * Cv]              # (B, Lkv, Cv)

        # Batched q @ k^T without materializing a transpose.
        s = jnp.einsum('bqc,bkc->bqk', qh, kh,
                       preferred_element_type=jnp.float32)  # (B, Lq, Lkv)

        # Softmax over the key axis (== torch softmax(dim=-2) on 'nqkh').
        s = s - jnp.max(s, axis=-1, keepdims=True)
        p = jnp.exp(s)
        p = p * pl.reciprocal(jnp.sum(p, axis=-1, keepdims=True), approx=True)

        mix = jnp.einsum('bqk,bkc->bqc', p, vh,
                         preferred_element_type=jnp.float32)  # (B, Lq, Cv)

        # Accumulated output projection replaces the lane-axis concat.
        acc = acc + jnp.dot(mix.reshape(B * Lq, Cv),
                            wo[h * Cv:(h + 1) * Cv, :],
                            preferred_element_type=jnp.float32)

    out = acc + bo_ref[...]
    o_ref[...] = out.reshape(B, Lq, out_dim).astype(o_ref.dtype)


def _pick_batch_tile(n, seq_len, target_rows=128):
    """Largest divisor of n such that tile*seq_len <= max(target_rows, seq_len)."""
    best = 1
    limit = max(target_rows, seq_len)
    for b in range(1, n + 1):
        if n % b == 0 and b * seq_len <= limit:
            best = b
    return best


def attention_pallas(q, k, v, params, num_heads, batch_tile=None):
    """q: (N, Lq, q_in), k: (N, Lkv, k_in), v: (N, Lkv, v_in)."""
    N, Lq, Dq = q.shape
    Nk, Lkv, Dk = k.shape
    Nv, Lkv2, Dv = v.shape
    assert Nk == N and Nv == N and Lkv2 == Lkv

    wq, bq = params["wq"], params["bq"]   # (Dq, qk_proj), (1, qk_proj)
    wk, bk = params["wk"], params["bk"]
    wv, bv = params["wv"], params["bv"]
    wo, bo = params["wo"], params["bo"]   # (v_proj, out_dim), (1, out_dim)
    qk_proj, v_proj, out_dim = wq.shape[1], wv.shape[1], wo.shape[1]
    assert qk_proj % num_heads == 0 and v_proj % num_heads == 0

    # Fold 1/sqrt(Cqk) into the q projection (static; removes per-head scale).
    Cqk = qk_proj // num_heads
    scale = 1.0 / math.sqrt(Cqk)
    wq_s = (wq * scale).astype(wq.dtype)
    bq_s = (bq * scale).astype(bq.dtype)

    if batch_tile is None:
        batch_tile = _pick_batch_tile(N, Lq)
    assert N % batch_tile == 0
    grid = (N // batch_tile,)

    # NOTE: for v6e/v5e production use, store q/k/v and weights in bfloat16
    # (halves HBM traffic, MXU is bf16-native); accumulation/softmax stay f32.
    # Kept f32 here for the exact correctness check against the reference.

    full = lambda a: pl.BlockSpec(a.shape, lambda n: (0,) * a.ndim)
    kernel = functools.partial(_attention_kernel, num_heads=num_heads)

    return pl.pallas_call(
        kernel,
        out_shape=jax.ShapeDtypeStruct((N, Lq, out_dim), q.dtype),
        grid_spec=pltpu.PrefetchScalarGridSpec(
            num_scalar_prefetch=0,
            grid=grid,
            in_specs=[
                pl.BlockSpec((batch_tile, Lq, Dq), lambda n: (n, 0, 0)),
                pl.BlockSpec((batch_tile, Lkv, Dk), lambda n: (n, 0, 0)),
                pl.BlockSpec((batch_tile, Lkv, Dv), lambda n: (n, 0, 0)),
                full(wq_s), full(bq_s),
                full(wk), full(bk),
                full(wv), full(bv),
                full(wo), full(bo),
            ],
            out_specs=pl.BlockSpec((batch_tile, Lq, out_dim),
                                   lambda n: (n, 0, 0)),
        ),
        compiler_params=pltpu.CompilerParams(
            dimension_semantics=("parallel",)),
    )(q, k, v, wq_s, bq_s, wk, bk, wv, bv, wo, bo)


def _xavier_uniform(key, fan_in, fan_out, dtype=jnp.float32):
    # Weight already transposed to (in, out) for the kernel.
    bound = math.sqrt(6.0 / (fan_in + fan_out))
    return jax.random.uniform(key, (fan_in, fan_out), dtype,
                              minval=-bound, maxval=bound)


def make_params(key, q_in, k_in, v_in, qk_proj, v_proj, out_dim):
    ks = jax.random.split(key, 4)
    return {
        "wq": _xavier_uniform(ks[0], q_in, qk_proj),
        "bq": jnp.zeros((1, qk_proj), jnp.float32),
        "wk": _xavier_uniform(ks[1], k_in, qk_proj),
        "bk": jnp.zeros((1, qk_proj), jnp.float32),
        "wv": _xavier_uniform(ks[2], v_in, v_proj),
        "bv": jnp.zeros((1, v_proj), jnp.float32),
        "wo": _xavier_uniform(ks[3], v_proj, out_dim),
        "bo": jnp.zeros((1, out_dim), jnp.float32),
    }


def attention_reference(q, k, v, params, num_heads):
    """Pure-JAX reference mirroring the torch forward."""
    qp = q @ params["wq"] + params["bq"]
    kp = k @ params["wk"] + params["bk"]
    vp = v @ params["wv"] + params["bv"]
    N, Lq, _ = qp.shape
    _, Lkv, _ = kp.shape
    H = num_heads
    Cqk = qp.shape[-1] // H
    Cv = vp.shape[-1] // H
    qh = qp.reshape(N, Lq, H, Cqk)
    kh = kp.reshape(N, Lkv, H, Cqk)
    vh = vp.reshape(N, Lkv, H, Cv)
    aff = jnp.einsum("nqhc,nkhc->nqkh", qh / math.sqrt(Cqk), kh)
    aff = jax.nn.softmax(aff, axis=-2)
    mix = jnp.einsum("nqlh,nlhc->nqhc", aff, vh)
    return mix.reshape(N, Lq, H * Cv) @ params["wo"] + params["bo"]


if __name__ == "__main__":
    # Small shapes consistent with the module's forward.  N=32 with Lq=8 packs
    # 16 batches per grid step (M=128 MXU rows) and gives an even grid of 2.
    N, Lq, Lkv = 32, 8, 8
    q_in, k_in, v_in = 16, 16, 16
    qk_proj, v_proj, out_dim = 32, 32, 16
    num_heads = 4

    key = jax.random.PRNGKey(0)
    kq, kk, kv, kp = jax.random.split(key, 4)
    q = jax.random.normal(kq, (N, Lq, q_in), jnp.float32)
    k = jax.random.normal(kk, (N, Lkv, k_in), jnp.float32)
    v = jax.random.normal(kv, (N, Lkv, v_in), jnp.float32)
    params = make_params(kp, q_in, k_in, v_in, qk_proj, v_proj, out_dim)

    out = attention_pallas(q, k, v, params, num_heads)
    out = jax.block_until_ready(out)

    ref = attention_reference(q, k, v, params, num_heads)
    assert out.shape == (N, Lq, out_dim)
    # Tolerance accounts for the EUP approximate-reciprocal softmax divide.
    assert jnp.allclose(out, ref, atol=1e-2, rtol=1e-2)

    print("KERNEL_OK")
</pallas_src>

<mosaic_0001>
module attributes {stable_mosaic.version = 11 : i64} {
  func.func @_attention_kernel(%arg0: i32, %arg1: memref<16x8x16xf32, #tpu.memory_space<vmem>>, %arg2: memref<16x8x16xf32, #tpu.memory_space<vmem>>, %arg3: memref<16x8x16xf32, #tpu.memory_space<vmem>>, %arg4: memref<16x32xf32, #tpu.memory_space<vmem>>, %arg5: memref<1x32xf32, #tpu.memory_space<vmem>>, %arg6: memref<16x32xf32, #tpu.memory_space<vmem>>, %arg7: memref<1x32xf32, #tpu.memory_space<vmem>>, %arg8: memref<16x32xf32, #tpu.memory_space<vmem>>, %arg9: memref<1x32xf32, #tpu.memory_space<vmem>>, %arg10: memref<32x16xf32, #tpu.memory_space<vmem>>, %arg11: memref<1x16xf32, #tpu.memory_space<vmem>>, %arg12: memref<16x8x16xf32, #tpu.memory_space<vmem>>) attributes {dimension_semantics = [#tpu.dimension_semantics<parallel>], iteration_bounds = array<i64: 2>, scalar_prefetch = 0 : i64, scratch_operands = 0 : i64, tpu.core_type = #tpu.core_type<tc>, window_params = [{transform_indices = @transform_0, window_bounds = array<i64: 16, 8, 16>}, {transform_indices = @transform_1, window_bounds = array<i64: 16, 8, 16>}, {transform_indices = @transform_2, window_bounds = array<i64: 16, 8, 16>}, {pipeline_mode = #tpu.pipeline_mode<synchronous>, transform_indices = @transform_3, window_bounds = array<i64: 16, 32>}, {pipeline_mode = #tpu.pipeline_mode<synchronous>, transform_indices = @transform_4, window_bounds = array<i64: 1, 32>}, {pipeline_mode = #tpu.pipeline_mode<synchronous>, transform_indices = @transform_5, window_bounds = array<i64: 16, 32>}, {pipeline_mode = #tpu.pipeline_mode<synchronous>, transform_indices = @transform_6, window_bounds = array<i64: 1, 32>}, {pipeline_mode = #tpu.pipeline_mode<synchronous>, transform_indices = @transform_7, window_bounds = array<i64: 16, 32>}, {pipeline_mode = #tpu.pipeline_mode<synchronous>, transform_indices = @transform_8, window_bounds = array<i64: 1, 32>}, {pipeline_mode = #tpu.pipeline_mode<synchronous>, transform_indices = @transform_9, window_bounds = array<i64: 32, 16>}, {pipeline_mode = #tpu.pipeline_mode<synchronous>, transform_indices = @transform_10, window_bounds = array<i64: 1, 16>}, {transform_indices = @transform_11, window_bounds = array<i64: 16, 8, 16>}]} {
    %c0 = arith.constant 0 : index
    %c0_0 = arith.constant 0 : index
    %c0_1 = arith.constant 0 : index
    %0 = vector.load %arg1[%c0, %c0_0, %c0_1] : memref<16x8x16xf32, #tpu.memory_space<vmem>>, vector<16x8x16xf32>
    %1 = vector.shape_cast %0 : vector<16x8x16xf32> to vector<128x16xf32>
    %c0_2 = arith.constant 0 : index
    %c0_3 = arith.constant 0 : index
    %c0_4 = arith.constant 0 : index
    %2 = vector.load %arg2[%c0_2, %c0_3, %c0_4] : memref<16x8x16xf32, #tpu.memory_space<vmem>>, vector<16x8x16xf32>
    %3 = vector.shape_cast %2 : vector<16x8x16xf32> to vector<128x16xf32>
    %c0_5 = arith.constant 0 : index
    %c0_6 = arith.constant 0 : index
    %c0_7 = arith.constant 0 : index
    %4 = vector.load %arg3[%c0_5, %c0_6, %c0_7] : memref<16x8x16xf32, #tpu.memory_space<vmem>>, vector<16x8x16xf32>
    %5 = vector.shape_cast %4 : vector<16x8x16xf32> to vector<128x16xf32>
    %c0_8 = arith.constant 0 : index
    %c0_9 = arith.constant 0 : index
    %6 = vector.load %arg4[%c0_8, %c0_9] : memref<16x32xf32, #tpu.memory_space<vmem>>, vector<16x32xf32>
    %cst = arith.constant dense<0.000000e+00> : vector<128x32xf32>
    %7 = tpu.matmul %1, %6, %cst {dimension_numbers = #tpu.dot_dimension_numbers<[1], [0], [0], [1], [0, 0, 1, 1], [], []>} : vector<128x16xf32>, vector<16x32xf32>, vector<128x32xf32> -> vector<128x32xf32>
    %c0_10 = arith.constant 0 : index
    %c0_11 = arith.constant 0 : index
    %8 = vector.load %arg5[%c0_10, %c0_11] : memref<1x32xf32, #tpu.memory_space<vmem>>, vector<1x32xf32>
    %9 = vector.broadcast %8 : vector<1x32xf32> to vector<128x32xf32>
    %10 = arith.addf %7, %9 : vector<128x32xf32>
    %c0_12 = arith.constant 0 : index
    %c0_13 = arith.constant 0 : index
    %11 = vector.load %arg6[%c0_12, %c0_13] : memref<16x32xf32, #tpu.memory_space<vmem>>, vector<16x32xf32>
    %cst_14 = arith.constant dense<0.000000e+00> : vector<128x32xf32>
    %12 = tpu.matmul %3, %11, %cst_14 {dimension_numbers = #tpu.dot_dimension_numbers<[1], [0], [0], [1], [0, 0, 1, 1], [], []>} : vector<128x16xf32>, vector<16x32xf32>, vector<128x32xf32> -> vector<128x32xf32>
    %c0_15 = arith.constant 0 : index
    %c0_16 = arith.constant 0 : index
    %13 = vector.load %arg7[%c0_15, %c0_16] : memref<1x32xf32, #tpu.memory_space<vmem>>, vector<1x32xf32>
    %14 = vector.broadcast %13 : vector<1x32xf32> to vector<128x32xf32>
    %15 = arith.addf %12, %14 : vector<128x32xf32>
    %c0_17 = arith.constant 0 : index
    %c0_18 = arith.constant 0 : index
    %16 = vector.load %arg8[%c0_17, %c0_18] : memref<16x32xf32, #tpu.memory_space<vmem>>, vector<16x32xf32>
    %cst_19 = arith.constant dense<0.000000e+00> : vector<128x32xf32>
    %17 = tpu.matmul %5, %16, %cst_19 {dimension_numbers = #tpu.dot_dimension_numbers<[1], [0], [0], [1], [0, 0, 1, 1], [], []>} : vector<128x16xf32>, vector<16x32xf32>, vector<128x32xf32> -> vector<128x32xf32>
    %c0_20 = arith.constant 0 : index
    %c0_21 = arith.constant 0 : index
    %18 = vector.load %arg9[%c0_20, %c0_21] : memref<1x32xf32, #tpu.memory_space<vmem>>, vector<1x32xf32>
    %19 = vector.broadcast %18 : vector<1x32xf32> to vector<128x32xf32>
    %20 = arith.addf %17, %19 : vector<128x32xf32>
    %21 = vector.shape_cast %10 : vector<128x32xf32> to vector<16x8x32xf32>
    %22 = vector.shape_cast %15 : vector<128x32xf32> to vector<16x8x32xf32>
    %23 = vector.shape_cast %20 : vector<128x32xf32> to vector<16x8x32xf32>
    %c0_22 = arith.constant 0 : index
    %c0_23 = arith.constant 0 : index
    %24 = vector.load %arg10[%c0_22, %c0_23] : memref<32x16xf32, #tpu.memory_space<vmem>>, vector<32x16xf32>
    %cst_24 = arith.constant 0.000000e+00 : f32
    %25 = vector.broadcast %cst_24 : f32 to vector<128x16xf32>
    %26 = vector.extract_strided_slice %21 {offsets = [0, 0, 0], sizes = [16, 8, 8], strides = [1, 1, 1]} : vector<16x8x32xf32> to vector<16x8x8xf32>
    %27 = vector.extract_strided_slice %22 {offsets = [0, 0, 0], sizes = [16, 8, 8], strides = [1, 1, 1]} : vector<16x8x32xf32> to vector<16x8x8xf32>
    %28 = vector.extract_strided_slice %23 {offsets = [0, 0, 0], sizes = [16, 8, 8], strides = [1, 1, 1]} : vector<16x8x32xf32> to vector<16x8x8xf32>
    "tpu.trace_start"() <{level = 10 : i32, message = "bqc,bkc->bqk"}> : () -> ()
    %cst_25 = arith.constant dense<0.000000e+00> : vector<16x8x8xf32>
    %29 = tpu.matmul %26, %27, %cst_25 {dimension_numbers = #tpu.dot_dimension_numbers<[2], [2], [1], [1], [0, 0, 0, 1, 1, 1], [0], [0]>} : vector<16x8x8xf32>, vector<16x8x8xf32>, vector<16x8x8xf32> -> vector<16x8x8xf32>
    "tpu.trace_stop"() : () -> ()
    %cst_26 = arith.constant dense<0xFF800000> : vector<16x8xf32>
    %30 = vector.multi_reduction <maximumf>, %29, %cst_26 [2] : vector<16x8x8xf32> to vector<16x8xf32>
    %31 = vector.shape_cast %30 : vector<16x8xf32> to vector<16x8x1xf32>
    %32 = vector.broadcast %31 : vector<16x8x1xf32> to vector<16x8x8xf32>
    %33 = arith.subf %29, %32 : vector<16x8x8xf32>
    %34 = math.exp %33 : vector<16x8x8xf32>
    %cst_27 = arith.constant dense<0.000000e+00> : vector<16x8xf32>
    %35 = vector.multi_reduction <add>, %34, %cst_27 [2] : vector<16x8x8xf32> to vector<16x8xf32>
    %36 = vector.shape_cast %35 : vector<16x8xf32> to vector<16x8x1xf32>
    %37 = tpu.reciprocal %36 {approx = true} : vector<16x8x1xf32> -> vector<16x8x1xf32>
    %38 = vector.broadcast %37 : vector<16x8x1xf32> to vector<16x8x8xf32>
    %39 = arith.mulf %34, %38 : vector<16x8x8xf32>
    "tpu.trace_start"() <{level = 10 : i32, message = "bqk,bkc->bqc"}> : () -> ()
    %cst_28 = arith.constant dense<0.000000e+00> : vector<16x8x8xf32>
    %40 = tpu.matmul %39, %28, %cst_28 {dimension_numbers = #tpu.dot_dimension_numbers<[2], [1], [1], [2], [0, 0, 0, 1, 1, 2], [0], [0]>} : vector<16x8x8xf32>, vector<16x8x8xf32>, vector<16x8x8xf32> -> vector<16x8x8xf32>
    "tpu.trace_stop"() : () -> ()
    %41 = vector.shape_cast %40 : vector<16x8x8xf32> to vector<128x8xf32>
    %42 = vector.extract_strided_slice %24 {offsets = [0, 0], sizes = [8, 16], strides = [1, 1]} : vector<32x16xf32> to vector<8x16xf32>
    %cst_29 = arith.constant dense<0.000000e+00> : vector<128x16xf32>
    %43 = tpu.matmul %41, %42, %cst_29 {dimension_numbers = #tpu.dot_dimension_numbers<[1], [0], [0], [1], [0, 0, 1, 1], [], []>} : vector<128x8xf32>, vector<8x16xf32>, vector<128x16xf32> -> vector<128x16xf32>
    %44 = arith.addf %25, %43 : vector<128x16xf32>
    %45 = vector.extract_strided_slice %21 {offsets = [0, 0, 8], sizes = [16, 8, 8], strides = [1, 1, 1]} : vector<16x8x32xf32> to vector<16x8x8xf32>
    %46 = vector.extract_strided_slice %22 {offsets = [0, 0, 8], sizes = [16, 8, 8], strides = [1, 1, 1]} : vector<16x8x32xf32> to vector<16x8x8xf32>
    %47 = vector.extract_strided_slice %23 {offsets = [0, 0, 8], sizes = [16, 8, 8], strides = [1, 1, 1]} : vector<16x8x32xf32> to vector<16x8x8xf32>
    "tpu.trace_start"() <{level = 10 : i32, message = "bqc,bkc->bqk"}> : () -> ()
    %cst_30 = arith.constant dense<0.000000e+00> : vector<16x8x8xf32>
    %48 = tpu.matmul %45, %46, %cst_30 {dimension_numbers = #tpu.dot_dimension_numbers<[2], [2], [1], [1], [0, 0, 0, 1, 1, 1], [0], [0]>} : vector<16x8x8xf32>, vector<16x8x8xf32>, vector<16x8x8xf32> -> vector<16x8x8xf32>
    "tpu.trace_stop"() : () -> ()
    %cst_31 = arith.constant dense<0xFF800000> : vector<16x8xf32>
    %49 = vector.multi_reduction <maximumf>, %48, %cst_31 [2] : vector<16x8x8xf32> to vector<16x8xf32>
    %50 = vector.shape_cast %49 : vector<16x8xf32> to vector<16x8x1xf32>
    %51 = vector.broadcast %50 : vector<16x8x1xf32> to vector<16x8x8xf32>
    %52 = arith.subf %48, %51 : vector<16x8x8xf32>
    %53 = math.exp %52 : vector<16x8x8xf32>
    %cst_32 = arith.constant dense<0.000000e+00> : vector<16x8xf32>
    %54 = vector.multi_reduction <add>, %53, %cst_32 [2] : vector<16x8x8xf32> to vector<16x8xf32>
    %55 = vector.shape_cast %54 : vector<16x8xf32> to vector<16x8x1xf32>
    %56 = tpu.reciprocal %55 {approx = true} : vector<16x8x1xf32> -> vector<16x8x1xf32>
    %57 = vector.broadcast %56 : vector<16x8x1xf32> to vector<16x8x8xf32>
    %58 = arith.mulf %53, %57 : vector<16x8x8xf32>
    "tpu.trace_start"() <{level = 10 : i32, message = "bqk,bkc->bqc"}> : () -> ()
    %cst_33 = arith.constant dense<0.000000e+00> : vector<16x8x8xf32>
    %59 = tpu.matmul %58, %47, %cst_33 {dimension_numbers = #tpu.dot_dimension_numbers<[2], [1], [1], [2], [0, 0, 0, 1, 1, 2], [0], [0]>} : vector<16x8x8xf32>, vector<16x8x8xf32>, vector<16x8x8xf32> -> vector<16x8x8xf32>
    "tpu.trace_stop"() : () -> ()
    %60 = vector.shape_cast %59 : vector<16x8x8xf32> to vector<128x8xf32>
    %61 = vector.extract_strided_slice %24 {offsets = [8, 0], sizes = [8, 16], strides = [1, 1]} : vector<32x16xf32> to vector<8x16xf32>
    %cst_34 = arith.constant dense<0.000000e+00> : vector<128x16xf32>
    %62 = tpu.matmul %60, %61, %cst_34 {dimension_numbers = #tpu.dot_dimension_numbers<[1], [0], [0], [1], [0, 0, 1, 1], [], []>} : vector<128x8xf32>, vector<8x16xf32>, vector<128x16xf32> -> vector<128x16xf32>
    %63 = arith.addf %44, %62 : vector<128x16xf32>
    %64 = vector.extract_strided_slice %21 {offsets = [0, 0, 16], sizes = [16, 8, 8], strides = [1, 1, 1]} : vector<16x8x32xf32> to vector<16x8x8xf32>
    %65 = vector.extract_strided_slice %22 {offsets = [0, 0, 16], sizes = [16, 8, 8], strides = [1, 1, 1]} : vector<16x8x32xf32> to vector<16x8x8xf32>
    %66 = vector.extract_strided_slice %23 {offsets = [0, 0, 16], sizes = [16, 8, 8], strides = [1, 1, 1]} : vector<16x8x32xf32> to vector<16x8x8xf32>
    "tpu.trace_start"() <{level = 10 : i32, message = "bqc,bkc->bqk"}> : () -> ()
    %cst_35 = arith.constant dense<0.000000e+00> : vector<16x8x8xf32>
    %67 = tpu.matmul %64, %65, %cst_35 {dimension_numbers = #tpu.dot_dimension_numbers<[2], [2], [1], [1], [0, 0, 0, 1, 1, 1], [0], [0]>} : vector<16x8x8xf32>, vector<16x8x8xf32>, vector<16x8x8xf32> -> vector<16x8x8xf32>
    "tpu.trace_stop"() : () -> ()
    %cst_36 = arith.constant dense<0xFF800000> : vector<16x8xf32>
    %68 = vector.multi_reduction <maximumf>, %67, %cst_36 [2] : vector<16x8x8xf32> to vector<16x8xf32>
    %69 = vector.shape_cast %68 : vector<16x8xf32> to vector<16x8x1xf32>
    %70 = vector.broadcast %69 : vector<16x8x1xf32> to vector<16x8x8xf32>
    %71 = arith.subf %67, %70 : vector<16x8x8xf32>
    %72 = math.exp %71 : vector<16x8x8xf32>
    %cst_37 = arith.constant dense<0.000000e+00> : vector<16x8xf32>
    %73 = vector.multi_reduction <add>, %72, %cst_37 [2] : vector<16x8x8xf32> to vector<16x8xf32>
    %74 = vector.shape_cast %73 : vector<16x8xf32> to vector<16x8x1xf32>
    %75 = tpu.reciprocal %74 {approx = true} : vector<16x8x1xf32> -> vector<16x8x1xf32>
    %76 = vector.broadcast %75 : vector<16x8x1xf32> to vector<16x8x8xf32>
    %77 = arith.mulf %72, %76 : vector<16x8x8xf32>
    "tpu.trace_start"() <{level = 10 : i32, message = "bqk,bkc->bqc"}> : () -> ()
    %cst_38 = arith.constant dense<0.000000e+00> : vector<16x8x8xf32>
    %78 = tpu.matmul %77, %66, %cst_38 {dimension_numbers = #tpu.dot_dimension_numbers<[2], [1], [1], [2], [0, 0, 0, 1, 1, 2], [0], [0]>} : vector<16x8x8xf32>, vector<16x8x8xf32>, vector<16x8x8xf32> -> vector<16x8x8xf32>
    "tpu.trace_stop"() : () -> ()
    %79 = vector.shape_cast %78 : vector<16x8x8xf32> to vector<128x8xf32>
    %80 = vector.extract_strided_slice %24 {offsets = [16, 0], sizes = [8, 16], strides = [1, 1]} : vector<32x16xf32> to vector<8x16xf32>
    %cst_39 = arith.constant dense<0.000000e+00> : vector<128x16xf32>
    %81 = tpu.matmul %79, %80, %cst_39 {dimension_numbers = #tpu.dot_dimension_numbers<[1], [0], [0], [1], [0, 0, 1, 1], [], []>} : vector<128x8xf32>, vector<8x16xf32>, vector<128x16xf32> -> vector<128x16xf32>
    %82 = arith.addf %63, %81 : vector<128x16xf32>
    %83 = vector.extract_strided_slice %21 {offsets = [0, 0, 24], sizes = [16, 8, 8], strides = [1, 1, 1]} : vector<16x8x32xf32> to vector<16x8x8xf32>
    %84 = vector.extract_strided_slice %22 {offsets = [0, 0, 24], sizes = [16, 8, 8], strides = [1, 1, 1]} : vector<16x8x32xf32> to vector<16x8x8xf32>
    %85 = vector.extract_strided_slice %23 {offsets = [0, 0, 24], sizes = [16, 8, 8], strides = [1, 1, 1]} : vector<16x8x32xf32> to vector<16x8x8xf32>
    "tpu.trace_start"() <{level = 10 : i32, message = "bqc,bkc->bqk"}> : () -> ()
    %cst_40 = arith.constant dense<0.000000e+00> : vector<16x8x8xf32>
    %86 = tpu.matmul %83, %84, %cst_40 {dimension_numbers = #tpu.dot_dimension_numbers<[2], [2], [1], [1], [0, 0, 0, 1, 1, 1], [0], [0]>} : vector<16x8x8xf32>, vector<16x8x8xf32>, vector<16x8x8xf32> -> vector<16x8x8xf32>
    "tpu.trace_stop"() : () -> ()
    %cst_41 = arith.constant dense<0xFF800000> : vector<16x8xf32>
    %87 = vector.multi_reduction <maximumf>, %86, %cst_41 [2] : vector<16x8x8xf32> to vector<16x8xf32>
    %88 = vector.shape_cast %87 : vector<16x8xf32> to vector<16x8x1xf32>
    %89 = vector.broadcast %88 : vector<16x8x1xf32> to vector<16x8x8xf32>
    %90 = arith.subf %86, %89 : vector<16x8x8xf32>
    %91 = math.exp %90 : vector<16x8x8xf32>
    %cst_42 = arith.constant dense<0.000000e+00> : vector<16x8xf32>
    %92 = vector.multi_reduction <add>, %91, %cst_42 [2] : vector<16x8x8xf32> to vector<16x8xf32>
    %93 = vector.shape_cast %92 : vector<16x8xf32> to vector<16x8x1xf32>
    %94 = tpu.reciprocal %93 {approx = true} : vector<16x8x1xf32> -> vector<16x8x1xf32>
    %95 = vector.broadcast %94 : vector<16x8x1xf32> to vector<16x8x8xf32>
    %96 = arith.mulf %91, %95 : vector<16x8x8xf32>
    "tpu.trace_start"() <{level = 10 : i32, message = "bqk,bkc->bqc"}> : () -> ()
    %cst_43 = arith.constant dense<0.000000e+00> : vector<16x8x8xf32>
    %97 = tpu.matmul %96, %85, %cst_43 {dimension_numbers = #tpu.dot_dimension_numbers<[2], [1], [1], [2], [0, 0, 0, 1, 1, 2], [0], [0]>} : vector<16x8x8xf32>, vector<16x8x8xf32>, vector<16x8x8xf32> -> vector<16x8x8xf32>
    "tpu.trace_stop"() : () -> ()
    %98 = vector.shape_cast %97 : vector<16x8x8xf32> to vector<128x8xf32>
    %99 = vector.extract_strided_slice %24 {offsets = [24, 0], sizes = [8, 16], strides = [1, 1]} : vector<32x16xf32> to vector<8x16xf32>
    %cst_44 = arith.constant dense<0.000000e+00> : vector<128x16xf32>
    %100 = tpu.matmul %98, %99, %cst_44 {dimension_numbers = #tpu.dot_dimension_numbers<[1], [0], [0], [1], [0, 0, 1, 1], [], []>} : vector<128x8xf32>, vector<8x16xf32>, vector<128x16xf32> -> vector<128x16xf32>
    %101 = arith.addf %82, %100 : vector<128x16xf32>
    %c0_45 = arith.constant 0 : index
    %c0_46 = arith.constant 0 : index
    %102 = vector.load %arg11[%c0_45, %c0_46] : memref<1x16xf32, #tpu.memory_space<vmem>>, vector<1x16xf32>
    %103 = vector.broadcast %102 : vector<1x16xf32> to vector<128x16xf32>
    %104 = arith.addf %101, %103 : vector<128x16xf32>
    %105 = vector.shape_cast %104 : vector<128x16xf32> to vector<16x8x16xf32>
    %c0_47 = arith.constant 0 : index
    %c0_48 = arith.constant 0 : index
    %c0_49 = arith.constant 0 : index
    %106 = vector.load %arg12[%c0_47, %c0_48, %c0_49] : memref<16x8x16xf32, #tpu.memory_space<vmem>>, vector<16x8x16xf32>
    tpu.vector_store %arg12[%c0_47, %c0_48, %c0_49], %105 {strides = array<i32>} : memref<16x8x16xf32, #tpu.memory_space<vmem>>, vector<16x8x16xf32>,
    return
  }
  func.func @transform_0(%arg0: i32) -> (i32, i32, i32) {
    %c0_i32 = arith.constant 0 : i32
    %c0_i32_0 = arith.constant 0 : i32
    %c0_i32_1 = arith.constant 0 : i32
    return %arg0, %c0_i32, %c0_i32_0 : i32, i32, i32
  }
  func.func @transform_1(%arg0: i32) -> (i32, i32, i32) {
    %c0_i32 = arith.constant 0 : i32
    %c0_i32_0 = arith.constant 0 : i32
    %c0_i32_1 = arith.constant 0 : i32
    return %arg0, %c0_i32, %c0_i32_0 : i32, i32, i32
  }
  func.func @transform_2(%arg0: i32) -> (i32, i32, i32) {
    %c0_i32 = arith.constant 0 : i32
    %c0_i32_0 = arith.constant 0 : i32
    %c0_i32_1 = arith.constant 0 : i32
    return %arg0, %c0_i32, %c0_i32_0 : i32, i32, i32
  }
  func.func @transform_3(%arg0: i32) -> (i32, i32) {
    %c0_i32 = arith.constant 0 : i32
    %c0_i32_0 = arith.constant 0 : i32
    %c0_i32_1 = arith.constant 0 : i32
    return %c0_i32, %c0_i32_0 : i32, i32
  }
  func.func @transform_4(%arg0: i32) -> (i32, i32) {
    %c0_i32 = arith.constant 0 : i32
    %c0_i32_0 = arith.constant 0 : i32
    %c0_i32_1 = arith.constant 0 : i32
    return %c0_i32, %c0_i32_0 : i32, i32
  }
  func.func @transform_5(%arg0: i32) -> (i32, i32) {
    %c0_i32 = arith.constant 0 : i32
    %c0_i32_0 = arith.constant 0 : i32
    %c0_i32_1 = arith.constant 0 : i32
    return %c0_i32, %c0_i32_0 : i32, i32
  }
  func.func @transform_6(%arg0: i32) -> (i32, i32) {
    %c0_i32 = arith.constant 0 : i32
    %c0_i32_0 = arith.constant 0 : i32
    %c0_i32_1 = arith.constant 0 : i32
    return %c0_i32, %c0_i32_0 : i32, i32
  }
  func.func @transform_7(%arg0: i32) -> (i32, i32) {
    %c0_i32 = arith.constant 0 : i32
    %c0_i32_0 = arith.constant 0 : i32
    %c0_i32_1 = arith.constant 0 : i32
    return %c0_i32, %c0_i32_0 : i32, i32
  }
  func.func @transform_8(%arg0: i32) -> (i32, i32) {
    %c0_i32 = arith.constant 0 : i32
    %c0_i32_0 = arith.constant 0 : i32
    %c0_i32_1 = arith.constant 0 : i32
    return %c0_i32, %c0_i32_0 : i32, i32
  }
  func.func @transform_9(%arg0: i32) -> (i32, i32) {
    %c0_i32 = arith.constant 0 : i32
    %c0_i32_0 = arith.constant 0 : i32
    %c0_i32_1 = arith.constant 0 : i32
    return %c0_i32, %c0_i32_0 : i32, i32
  }
  func.func @transform_10(%arg0: i32) -> (i32, i32) {
    %c0_i32 = arith.constant 0 : i32
    %c0_i32_0 = arith.constant 0 : i32
    %c0_i32_1 = arith.constant 0 : i32
    return %c0_i32, %c0_i32_0 : i32, i32
  }
  func.func @transform_11(%arg0: i32) -> (i32, i32, i32) {
    %c0_i32 = arith.constant 0 : i32
    %c0_i32_0 = arith.constant 0 : i32
    %c0_i32_1 = arith.constant 0 : i32
    return %arg0, %c0_i32, %c0_i32_0 : i32, i32, i32
  }
}

</mosaic_0001>

<bundles_post_ra>
// kernel: tpu_custom_call.1
= control target key start
LH: loop header
LB: loop body
LE: loop exit
PB: predicated region body
PF: predicated region fallthrough
CT: control target
= control target key end

     0   :  { %s14388_s17 = smov 0   ;;  %s16717_s0 = inlined_call_operand.vmem [shape: f32[32,8,16], index: 0, kind: input, shape index: {}]   ;;  %s16718_s1 = inlined_call_operand.vmem [shape: f32[32,8,16], index: 1, kind: input, shape index: {}]   ;;  %s16719_s2 = inlined_call_operand.vmem [shape: f32[32,8,16], index: 2, kind: input, shape index: {}]   ;;  %s16720_s3 = inlined_call_operand.vmem [shape: f32[16,32], index: 3, kind: input, shape index: {}]   ;;  %s16721_s4 = inlined_call_operand.vmem [shape: f32[1,32], index: 4, kind: input, shape index: {}]   ;;  %s16722_s5 = inlined_call_operand.vmem [shape: f32[16,32], index: 5, kind: input, shape index: {}]   ;;  %s16723_s6 = inlined_call_operand.vmem [shape: f32[1,32], index: 6, kind: input, shape index: {}]   ;;  %s16724_s7 = inlined_call_operand.vmem [shape: f32[16,32], index: 7, kind: input, shape index: {}]   ;;  %s16725_s8 = inlined_call_operand.vmem [shape: f32[1,32], index: 8, kind: input, shape index: {}]   ;;  %s16726_s9 = inlined_call_operand.vmem [shape: f32[32,16], index: 9, kind: input, shape index: {}]   ;;  %s16727_s10 = inlined_call_operand.vmem [shape: f32[1,16], index: 10, kind: input, shape index: {}]   ;;  %s16728_s11 = inlined_call_operand.vmem [shape: f32[32,8,16], index: 11, kind: output, shape index: {}]  }
   0x1 LB: > { %s12513_s18 = sadd.s32 4294967295, %s14321_s17   ;;  %p12517_p0 = scmp.ge.s32.totalorder %s14321_s17, 1  ;;  %s14321_s17 = sphi %s14388_s17, %s21_s17  }
   0x2   : > { %p360_p1 = scmp.lt.s32.totalorder %s14321_s17, 3 }
   0x4   : > { %p361_p2 = pnand %p12517_p0, %p360_p1 }
   0x6   : > { %364 = sbr.rel (%p361_p2) target bundleno = 3268 (0xcc4), region = 64 }
   0xb   : > { %v483_v0 = vld [vmem:[%s16720_s3 + $0x8] sm:$0xff]  ;;  %v482_v1 = vld [vmem:[%s16720_s3] sm:$0xff]  ;;  %s12518_s23 = sshll.u32 %s12513_s18, 4  ;;  %vm491_vm0 = vcmask 130048   ;;  %v16729_v46 = vmov 0.0   ;;  %vm14324_vm1 = vmmov 0  }
   0xc   : > { %14042 = vmatprep.subr.mxu1 %v483_v0  ;;  %p411_p3 = scmp.lt.s32.totalorder %s12518_s23, 31  ;;  %13214 = vmatprep.subr.mxu0 %v483_v0  ;;  %v686_v2 = vld [vmem:[%s16722_s5 + $0x8] sm:$0xff]  ;;  %v685_v9 = vld [vmem:[%s16722_s5] sm:$0xff]  ;;  %s14325_s27 = smov 120   ;;  %vm1093_vm2 = vcmask 64512  }
   0xd   : > { %14044 = vmatpush3.msra.mxu1 %v483_v0  ;;  %13215 = vmatpush3.msra.mxu0 %v483_v0  ;;  %v888_v36 = vld [vmem:[%s16724_s7 + $0x8] sm:$0xff]  ;;  %v887_v37 = vld [vmem:[%s16724_s7] sm:$0xff]  ;;  %s14326_s13 = smov 112   ;;  %s14327_s19 = smov 104  }
   0xe   : > { %14043 = vmatprep.subr.mxu1 %v482_v1  ;;  %s16954_s23 = smov (!%p411_p3, %s12518_s23), 31  ;;  %13216 = vmatprep.subr.mxu0 %v482_v1  ;;  %v14539_v55 = vld [vmem:[%s16721_s4] ss:$0 sm:$0xff] }
   0xf   : > { %14045 = vmatpush3.msra.mxu1 %v482_v1  ;;  %13217 = vmatpush3.msra.mxu0 %v482_v1  ;;  %s14405_s26 = sshll.u32 %s16954_s23, 3 }
  0x10   : > { %13242 = vmatprep.subr.mxu1 %v686_v2  ;;  %s14411_s29 = scalar_lea.vmem %s16717_s0, %s14405_s26  ;;  %s14443_s15 = scalar_lea.vmem %s16718_s1, %s14405_s26  ;;  %13270 = vmatprep.subr.mxu0 %v888_v36 }
  0x11   : > { %v442_v3 = vld [vmem:[%s14411_s29 + $0x40] sm:$0xff]  ;;  %v443_v4 = vld [vmem:[%s14411_s29 + $0x48] sm:$0xff]  ;;  %v444_v6 = vld [vmem:[%s14411_s29 + $0x50] sm:$0xff]  ;;  %s14496_s23 = scalar_lea.vmem %s16719_s2, %s14405_s26 }
  0x12   : > { %v434_v5 = vld [vmem:[%s14411_s29] sm:$0xff]  ;;  %13230 = vmatprep.mubr.msk.f32.mxu1 %vm491_vm0, %v442_v3  ;;  %v435_v7 = vld [vmem:[%s14411_s29 + $0x8] sm:$0xff]  ;;  %v436_v8 = vld [vmem:[%s14411_s29 + $0x10] sm:$0xff] }
  0x13   : > { %13218 = vmatprep.mubr.msk.f32.mxu0 %vm491_vm0, %v434_v5  ;;  %13231 = vmatmul.mubr.msk.f32.vlgmr.msra.gmra.mxu1 %vm491_vm0, %v443_v4  ;;  %v445_v10 = vld [vmem:[%s14411_s29 + $0x58] sm:$0xff]  ;;  %v446_v12 = vld [vmem:[%s14411_s29 + $0x60] sm:$0xff]  ;;  %v447_v13 = vld [vmem:[%s14411_s29 + $0x68] sm:$0xff] }
  0x14   : > { %13219 = vmatmul.mubr.msk.f32.vlgmr.msra.gmra.mxu0 %vm491_vm0, %v435_v7  ;;  %13233 = vmatprep.mubr.msk.f32.mxu1 %vm491_vm0, %v444_v6  ;;  %v437_v11 = vld [vmem:[%s14411_s29 + $0x18] sm:$0xff]  ;;  %v438_v14 = vld [vmem:[%s14411_s29 + $0x20] sm:$0xff]  ;;  %v439_v15 = vld [vmem:[%s14411_s29 + $0x28] sm:$0xff] }
  0x15   : > { %13221 = vmatprep.mubr.msk.f32.mxu0 %vm491_vm0, %v436_v8  ;;  %13243 = vmatpush3.msra.mxu1 %v686_v2  ;;  %v448_v16 = vld [vmem:[%s14411_s29 + $0x70] sm:$0xff]  ;;  %v449_v18 = vld [vmem:[%s14411_s29 + $0x78] sm:$0xff]  ;;  %v450_v20 = vld [vmem:[%s14443_s15] sm:$0xff] }
  0x16   : > { %13244 = vmatprep.subr.mxu1 %v685_v9  ;;  %v440_v17 = vld [vmem:[%s14411_s29 + $0x30] sm:$0xff]  ;;  %v441_v19 = vld [vmem:[%s14411_s29 + $0x38] sm:$0xff]  ;;  %v451_v21 = vld [vmem:[%s14443_s15 + $0x8] sm:$0xff]  ;;  %13271 = vmatpush3.msra.mxu0 %v888_v36  ;;  %s16649_s29 = scalar_lea.vmem %s16728_s11, %s14405_s26 }
  0x17   : > { %13234 = vmatmul.mubr.msk.f32.gmra.mxu1 %vm491_vm0, %v445_v10  ;;  %v452_v22 = vld [vmem:[%s14443_s15 + $0x10] sm:$0xff]  ;;  %v453_v23 = vld [vmem:[%s14443_s15 + $0x18] sm:$0xff]  ;;  %v454_v24 = vld [vmem:[%s14443_s15 + $0x20] sm:$0xff]  ;;  %13272 = vmatprep.subr.mxu0 %v887_v37 }
  0x18   : > { %13222 = vmatmul.mubr.msk.f32.gmra.mxu0 %vm491_vm0, %v437_v11  ;;  %13236 = vmatprep.mubr.msk.f32.mxu1 %vm491_vm0, %v446_v12  ;;  %v455_v25 = vld [vmem:[%s14443_s15 + $0x28] sm:$0xff]  ;;  %v456_v26 = vld [vmem:[%s14443_s15 + $0x30] sm:$0xff]  ;;  %v457_v27 = vld [vmem:[%s14443_s15 + $0x38] sm:$0xff] }
  0x19   : > { %13245 = vmatpush3.msra.mxu1 %v685_v9  ;;  %13224 = vmatprep.mubr.msk.f32.mxu0 %vm491_vm0, %v438_v14  ;;  %v458_v28 = vld [vmem:[%s14443_s15 + $0x40] sm:$0xff]  ;;  %v459_v29 = vld [vmem:[%s14443_s15 + $0x48] sm:$0xff]  ;;  %v460_v30 = vld [vmem:[%s14443_s15 + $0x50] sm:$0xff] }
  0x1a   : > { %v461_v31 = vld [vmem:[%s14443_s15 + $0x58] sm:$0xff]  ;;  %v462_v32 = vld [vmem:[%s14443_s15 + $0x60] sm:$0xff]  ;;  %v463_v33 = vld [vmem:[%s14443_s15 + $0x68] sm:$0xff]  ;;  %13273 = vmatpush3.msra.mxu0 %v887_v37  ;;  %13298 = vmatprep.subr.mxu1 %v16729_v46 }
  0x1b   : > { %13237 = vmatmul.mubr.msk.f32.gmra.mxu1 %vm491_vm0, %v447_v13  ;;  %v464_v34 = vld [vmem:[%s14443_s15 + $0x70] sm:$0xff]  ;;  %v465_v35 = vld [vmem:[%s14443_s15 + $0x78] sm:$0xff]  ;;  %v466_v38 = vld [vmem:[%s14496_s23] sm:$0xff]  ;;  %13338 = vmatprep.subr.mxu0 %v16729_v46 }
  0x1c   : > { %13225 = vmatmul.mubr.msk.f32.gmra.mxu0 %vm491_vm0, %v439_v15  ;;  %13239 = vmatprep.mubr.msk.f32.mxu1 %vm491_vm0, %v448_v16  ;;  %v467_v39 = vld [vmem:[%s14496_s23 + $0x8] sm:$0xff]  ;;  %v468_v40 = vld [vmem:[%s14496_s23 + $0x10] sm:$0xff]  ;;  %v469_v41 = vld [vmem:[%s14496_s23 + $0x18] sm:$0xff] }
  0x1d   : > { %13227 = vmatprep.mubr.msk.f32.mxu0 %vm491_vm0, %v440_v17  ;;  %v470_v42 = vld [vmem:[%s14496_s23 + $0x20] sm:$0xff]  ;;  %v471_v43 = vld [vmem:[%s14496_s23 + $0x28] sm:$0xff]  ;;  %v472_v44 = vld [vmem:[%s14496_s23 + $0x30] sm:$0xff] }
  0x1e   : > { %v473_v45 = vld [vmem:[%s14496_s23 + $0x38] sm:$0xff]  ;;  %v474_v47 = vld [vmem:[%s14496_s23 + $0x40] sm:$0xff]  ;;  %v475_v48 = vld [vmem:[%s14496_s23 + $0x48] sm:$0xff] }
  0x1f   : > { %13240 = vmatmul.mubr.msk.f32.gmra.mxu1 %vm491_vm0, %v449_v18  ;;  %v476_v49 = vld [vmem:[%s14496_s23 + $0x50] sm:$0xff]  ;;  %v477_v50 = vld [vmem:[%s14496_s23 + $0x58] sm:$0xff]  ;;  %v478_v51 = vld [vmem:[%s14496_s23 + $0x60] sm:$0xff] }
  0x20   : > { %13228 = vmatmul.mubr.msk.f32.gmra.mxu0 %vm491_vm0, %v441_v19  ;;  %13246 = vmatprep.mubr.msk.f32.mxu1 %vm491_vm0, %v450_v20  ;;  %v479_v52 = vld [vmem:[%s14496_s23 + $0x68] sm:$0xff]  ;;  %v480_v53 = vld [vmem:[%s14496_s23 + $0x70] sm:$0xff]  ;;  %v481_v54 = vld [vmem:[%s14496_s23 + $0x78] sm:$0xff] }
  0x21   : > { %13274 = vmatprep.mubr.msk.f32.mxu0 %vm491_vm0, %v466_v38  ;;  %v14580_v8 = vld [vmem:[%s16723_s6] ss:$0 sm:$0xff] }
  0x23   : > { %13247 = vmatmul.mubr.msk.f32.vlgmr.msra.gmra.mxu1 %vm491_vm0, %v451_v21 }
  0x24   : > { %13249 = vmatprep.mubr.msk.f32.mxu1 %vm491_vm0, %v452_v22  ;;  %13275 = vmatmul.mubr.msk.f32.vlgmr.msra.gmra.mxu0 %vm491_vm0, %v467_v39 }
  0x25   : > { %13277 = vmatprep.mubr.msk.f32.mxu0 %vm491_vm0, %v468_v40 }
  0x27   : > { %13250 = vmatmul.mubr.msk.f32.gmra.mxu1 %vm491_vm0, %v453_v23 }
  0x28   : > { %13252 = vmatprep.mubr.msk.f32.mxu1 %vm491_vm0, %v454_v24  ;;  %13278 = vmatmul.mubr.msk.f32.gmra.mxu0 %vm491_vm0, %v469_v41 }
  0x29   : > { %13280 = vmatprep.mubr.msk.f32.mxu0 %vm491_vm0, %v470_v42 }
  0x2b   : > { %13253 = vmatmul.mubr.msk.f32.gmra.mxu1 %vm491_vm0, %v455_v25 }
  0x2c   : > { %13255 = vmatprep.mubr.msk.f32.mxu1 %vm491_vm0, %v456_v26  ;;  %13281 = vmatmul.mubr.msk.f32.gmra.mxu0 %vm491_vm0, %v471_v43 }
  0x2d   : > { %13283 = vmatprep.mubr.msk.f32.mxu0 %vm491_vm0, %v472_v44 }
  0x2f   : > { %13256 = vmatmul.mubr.msk.f32.gmra.mxu1 %vm491_vm0, %v457_v27 }
  0x30   : > { %13258 = vmatprep.mubr.msk.f32.mxu1 %vm491_vm0, %v458_v28  ;;  %13284 = vmatmul.mubr.msk.f32.gmra.mxu0 %vm491_vm0, %v473_v45 }
  0x31   : > { %13286 = vmatprep.mubr.msk.f32.mxu0 %vm491_vm0, %v474_v47 }
  0x33   : > { %13259 = vmatmul.mubr.msk.f32.gmra.mxu1 %vm491_vm0, %v459_v29 }
  0x34   : > { %13261 = vmatprep.mubr.msk.f32.mxu1 %vm491_vm0, %v460_v30  ;;  %13287 = vmatmul.mubr.msk.f32.gmra.mxu0 %vm491_vm0, %v475_v48 }
  0x35   : > { %13289 = vmatprep.mubr.msk.f32.mxu0 %vm491_vm0, %v476_v49 }
  0x37   : > { %13262 = vmatmul.mubr.msk.f32.gmra.mxu1 %vm491_vm0, %v461_v31 }
  0x38   : > { %13264 = vmatprep.mubr.msk.f32.mxu1 %vm491_vm0, %v462_v32  ;;  %13290 = vmatmul.mubr.msk.f32.gmra.mxu0 %vm491_vm0, %v477_v50 }
  0x39   : > { %13292 = vmatprep.mubr.msk.f32.mxu0 %vm491_vm0, %v478_v51 }
  0x3b   : > { %13265 = vmatmul.mubr.msk.f32.gmra.mxu1 %vm491_vm0, %v463_v33 }
  0x3c   : > { %13267 = vmatprep.mubr.msk.f32.mxu1 %vm491_vm0, %v464_v34  ;;  %13293 = vmatmul.mubr.msk.f32.gmra.mxu0 %vm491_vm0, %v479_v52 }
  0x3d   : > { %13295 = vmatprep.mubr.msk.f32.mxu0 %vm491_vm0, %v480_v53 }
  0x3f   : > { %13268 = vmatmul.mubr.msk.f32.gmra.mxu1 %vm491_vm0, %v465_v35 }
  0x40   : > { %13300 = vmatprep.mubr.msk.f32.mxu1 %vm14324_vm1, %v16729_v46  ;;  %13296 = vmatmul.mubr.msk.f32.gmra.mxu0 %vm491_vm0, %v481_v54 }
  0x41   : > { %13340 = vmatprep.mubr.msk.f32.mxu0 %vm14324_vm1, %v16729_v46 }
  0xd3   : > { %v14541_v56 = vpop.f32.mrf.mxu1 }
  0xd4   : > { %v13220_v57 = vpop.f32.mrf.mxu0  ;;  %v14750_v52 = vadd.f32 %v14541_v56, %v14539_v55 }
  0xd5   : > { %v14544_v58 = vadd.f32 %v13220_v57, %v14539_v55  ;;  %v14546_v59 = vpop.f32.mrf.mxu1 }
  0xd6   : > { %v606_v60 = vpop.f32.mrf.mxu0  ;;  %v14647_v30 = vadd.f32 %v14539_v55, %v14546_v59 }
  0xd7   : > { %16789 = vst [vmem:[#allocation2_spill] sm:$0xff] %v14544_v58  ;;  %3732 = vrot.lane.b32.xlu1 %v14544_v58, %s14325_s27  ;;  %v14551_v61 = vadd.f32 %v14539_v55, %v606_v60  ;;  %v14553_v62 = vpop.f32.mrf.mxu1  ;;  %v14801_v60 = vld [vmem:[%s16725_s8] ss:$0 sm:$0xff] }
  0xd8   : > { %v13223_v63 = vpop.f32.mrf.mxu0  ;;  %v14766_v54 = vadd.f32 %v14553_v62, %v14539_v55 }
  0xd9   : > { %16790 = vst [vmem:[#allocation3_spill] sm:$0xff] %v14551_v61  ;;  %v14555_v0 = vpop.f32.mrf.mxu1  ;;  %v14560_v2 = vadd.f32 %v13223_v63, %v14539_v55 }
  0xda   : > { %v616_v1 = vpop.f32.mrf.mxu0  ;;  %v14672_v37 = vadd.f32 %v14539_v55, %v14555_v0  ;;  %16803 = vst [vmem:[#allocation16_spill] sm:$0xff] %v14766_v54 }
  0xdb   : > { %3654 = vrot.lane.b32.xlu1 %v14551_v61, %s14325_s27  ;;  %16791 = vst [vmem:[#allocation4_spill] sm:$0xff] %v14560_v2  ;;  %v14563_v3 = vadd.f32 %v14539_v55, %v616_v1  ;;  %v14565_v4 = vpop.f32.mrf.mxu1 }
  0xdc   : > { %v13226_v23 = vpop.f32.mrf.mxu0  ;;  %v14780_v57 = vadd.f32 %v14565_v4, %v14539_v55 }
  0xdd   : > { %16792 = vst [vmem:[#allocation5_spill] sm:$0xff] %v14563_v3  ;;  %3810 = vrot.lane.b32.xlu0 %v14563_v3, %s14325_s27  ;;  %v14569_v5 = vpop.f32.mrf.mxu1  ;;  %v14675_v38 = vadd.f32 %v13226_v23, %v14539_v55 }
  0xde   : > { %v626_v27 = vpop.f32.mrf.mxu0  ;;  %v14702_v44 = vadd.f32 %v14539_v55, %v14569_v5  ;;  %16805 = vst [vmem:[#allocation18_spill] sm:$0xff] %v14780_v57 }
  0xdf   : > { %3888 = vrot.lane.b32.xlu1 %v14560_v2, %s14325_s27  ;;  %v14573_v6 = vpop.f32.mrf.mxu1  ;;  %v14650_v31 = vadd.f32 %v14539_v55, %v626_v27  ;;  %16800 = vst [vmem:[#allocation13_spill] sm:$0xff] %v14675_v38 }
  0xe0   : > { %v13229_v29 = vpop.f32.mrf.mxu0  ;;  %v14791_v59 = vadd.f32 %v14573_v6, %v14539_v55 }
  0xe1   : > { %v14575_v7 = vpop.f32.mrf.mxu1  ;;  %16799 = vst [vmem:[#allocation12_spill] sm:$0xff] %v14650_v31  ;;  %v14714_v48 = vadd.f32 %v13229_v29, %v14539_v55 }
  0xe2   : > { %v636_v36 = vpop.f32.mrf.mxu0  ;;  %v14729_v50 = vadd.f32 %v14539_v55, %v14575_v7  ;;  %16806 = vst [vmem:[#allocation19_spill] sm:$0xff] %v14791_v59 }
  0xe3   : > { %v13248_v9 = vpop.f32.mrf.mxu1  ;;  %v14691_v42 = vadd.f32 %v14539_v55, %v636_v36  ;;  %16801 = vst [vmem:[#allocation14_spill] sm:$0xff] %v14714_v48 }
  0xe4   : > { %v14583_v10 = vadd.f32 %v13248_v9, %v14580_v8  ;;  %v13276_v62 = vpop.f32.mrf.mxu0 }
  0xe5   : > { %v808_v11 = vpop.f32.mrf.mxu1  ;;  %v14804_v63 = vadd.f32 %v13276_v62, %v14801_v60 }
  0xe6   : > { %16793 = vst [vmem:[#allocation6_spill] sm:$0xff] %v14583_v10  ;;  %v14586_v12 = vadd.f32 %v14580_v8, %v808_v11  ;;  %3734 = vrot.lane.b32.xlu1 %v14583_v10, %s14325_s27  ;;  %v1010_v0 = vpop.f32.mrf.mxu0 }
  0xe7   : > { %v13251_v13 = vpop.f32.mrf.mxu1  ;;  %16807 = vst [vmem:[#allocation20_spill] sm:$0xff] %v14804_v63  ;;  %v14807_v55 = vadd.f32 %v14801_v60, %v1010_v0 }
  0xe8   : > { %16794 = vst [vmem:[#allocation7_spill] sm:$0xff] %v14586_v12  ;;  %v14591_v14 = vadd.f32 %v13251_v13, %v14580_v8  ;;  %13299 = vmatpush3.xpose.msk.msra.mxu1 %vm1093_vm2, %v14586_v12  ;;  %3656 = vrot.lane.b32.xlu0 %v14586_v12, %s14325_s27  ;;  %v13279_v1 = vpop.f32.mrf.mxu0 }
  0xe9   : > { %v818_v15 = vpop.f32.mrf.mxu1  ;;  %13303 = vmatprep.subr.mxu1 %v16729_v46  ;;  %16808 = vst [vmem:[#allocation21_spill] sm:$0xff] %v14807_v55  ;;  %v14812_v4 = vadd.f32 %v13279_v1, %v14801_v60 }
  0xea   : > { %16795 = vst [vmem:[#allocation8_spill] sm:$0xff] %v14591_v14  ;;  %v14599_v16 = vadd.f32 %v14580_v8, %v818_v15  ;;  %3890 = vrot.lane.b32.xlu1 %v14591_v14, %s14325_s27  ;;  %v14815_v5 = vpop.f32.mrf.mxu0 }
  0xeb   : > { %v13254_v17 = vpop.f32.mrf.mxu1  ;;  %13301 = vmatmul.mubr.msk.f32.vlgmr.msra.gmra.mxu1 %vm1093_vm2, %v14551_v61  ;;  %16809 = vst [vmem:[#allocation22_spill] sm:$0xff] %v14812_v4 }
  0xec   : > { %16796 = vst [vmem:[#allocation9_spill] sm:$0xff] %v14599_v16  ;;  %v14606_v18 = vadd.f32 %v13254_v17, %v14580_v8  ;;  %13304 = vmatpush3.xpose.msk.msra.mxu1 %vm1093_vm2, %v14583_v10  ;;  %13305 = vmatprep.mubr.msk.f32.mxu1 %vm14324_vm1, %v16729_v46  ;;  %v13282_v6 = vpop.f32.mrf.mxu0 }
  0xed   : > { %v828_v19 = vpop.f32.mrf.mxu1  ;;  %13308 = vmatprep.subr.mxu1 %v16729_v46  ;;  %3812 = vrot.lane.b32.xlu0 %v14599_v16, %s14325_s27  ;;  %v14819_v7 = vadd.f32 %v13282_v6, %v14801_v60 }
  0xee   : > { %16797 = vst [vmem:[#allocation10_spill] sm:$0xff] %v14606_v18  ;;  %v14616_v20 = vadd.f32 %v14580_v8, %v828_v19  ;;  %4046 = vrot.lane.b32.xlu1 %v14606_v18, %s14325_s27 }
  0xef   : > { %v13257_v21 = vpop.f32.mrf.mxu1  ;;  %13306 = vmatmul.mubr.msk.f32.vlgmr.msra.gmra.mxu1 %vm1093_vm2, %v14544_v58  ;;  %16810 = vst [vmem:[#allocation23_spill] sm:$0xff] %v14819_v7 }
  0xf0   : > { %16798 = vst [vmem:[#allocation11_spill] sm:$0xff] %v14616_v20  ;;  %13309 = vmatpush3.xpose.msk.msra.mxu1 %vm1093_vm2, %v14599_v16  ;;  %13310 = vmatprep.mubr.msk.f32.mxu1 %vm14324_vm1, %v16729_v46  ;;  %v14694_v43 = vadd.f32 %v13257_v21, %v14580_v8 }
  0xf1   : > { %v838_v22 = vpop.f32.mrf.mxu1  ;;  %13313 = vmatprep.subr.mxu1 %v16729_v46  ;;  %3968 = vrot.lane.b32.xlu0 %v14616_v20, %s14325_s27 }
  0xf2   : > { %v14664_v35 = vadd.f32 %v14580_v8, %v838_v22 }
  0xf3   : > { %v13260_v24 = vpop.f32.mrf.mxu1  ;;  %13311 = vmatmul.mubr.msk.f32.vlgmr.msra.gmra.mxu1 %vm1093_vm2, %v14563_v3 }
  0xf4   : > { %13314 = vmatpush3.xpose.msk.msra.mxu1 %vm1093_vm2, %v14591_v14  ;;  %13315 = vmatprep.mubr.msk.f32.mxu1 %vm14324_vm1, %v16729_v46  ;;  %v14721_v49 = vadd.f32 %v13260_v24, %v14580_v8 }
  0xf5   : > { %v848_v25 = vpop.f32.mrf.mxu1  ;;  %13318 = vmatprep.subr.mxu1 %v16729_v46 }
  0xf6   : > { %v14637_v26 = vadd.f32 %v14580_v8, %v848_v25  ;;  %16802 = vst [vmem:[#allocation15_spill] sm:$0xff] %v14721_v49 }
  0xf7   : > { %v13263_v28 = vpop.f32.mrf.mxu1  ;;  %13316 = vmatmul.mubr.msk.f32.vlgmr.msra.gmra.mxu1 %vm1093_vm2, %v14560_v2 }
  0xf8   : > { %13319 = vmatpush3.xpose.msk.msra.mxu1 %vm1093_vm2, %v14616_v20  ;;  %13339 = vmatpush3.xpose.msk.msra.mxu0 %vm1093_vm2, %v14637_v26  ;;  %v14742_v51 = vadd.f32 %v13263_v28, %v14580_v8 }
  0xf9   : > { %v858_v32 = vpop.f32.mrf.mxu1  ;;  %13320 = vmatprep.mubr.msk.f32.mxu1 %vm14324_vm1, %v16729_v46  ;;  %13323 = vmatprep.subr.mxu1 %v16729_v46 }
  0xfa   : > { %v14656_v33 = vadd.f32 %v14580_v8, %v858_v32  ;;  %13348 = vmatprep.subr.mxu0 %v16729_v46 }
  0xfb   : > { %v13266_v34 = vpop.f32.mrf.mxu1  ;;  %13321 = vmatmul.mubr.msk.f32.vlgmr.msra.gmra.mxu1 %vm1093_vm2, %v14650_v31  ;;  %13341 = vmatmul.mubr.msk.f32.vlgmr.msra.gmra.mxu0 %vm1093_vm2, %v14647_v30 }
  0xfc   : > { %13324 = vmatpush3.xpose.msk.msra.mxu1 %vm1093_vm2, %v14606_v18  ;;  %13349 = vmatpush3.xpose.msk.msra.mxu0 %vm1093_vm2, %v14656_v33  ;;  %v14758_v53 = vadd.f32 %v13266_v34, %v14580_v8 }
  0xfd   : > { %v868_v39 = vpop.f32.mrf.mxu1  ;;  %13325 = vmatprep.mubr.msk.f32.mxu1 %vm14324_vm1, %v16729_v46  ;;  %13350 = vmatprep.mubr.msk.f32.mxu0 %vm14324_vm1, %v16729_v46 }
  0xfe   : > { %v14682_v40 = vadd.f32 %v14580_v8, %v868_v39  ;;  %13328 = vmatprep.subr.mxu1 %v16729_v46  ;;  %13358 = vmatprep.subr.mxu0 %v16729_v46 }
  0xff   : > { %v13269_v41 = vpop.f32.mrf.mxu1  ;;  %13326 = vmatmul.mubr.msk.f32.vlgmr.msra.gmra.mxu1 %vm1093_vm2, %v14675_v38  ;;  %13351 = vmatmul.mubr.msk.f32.vlgmr.msra.gmra.mxu0 %vm1093_vm2, %v14672_v37 }
 0x100   : > { %13329 = vmatpush3.xpose.msk.msra.mxu1 %vm1093_vm2, %v14664_v35  ;;  %13359 = vmatpush3.xpose.msk.msra.mxu0 %vm1093_vm2, %v14682_v40  ;;  %v14772_v56 = vadd.f32 %v13269_v41, %v14580_v8 }
 0x101   : > { %v878_v45 = vpop.f32.mrf.mxu1  ;;  %13330 = vmatprep.mubr.msk.f32.mxu1 %vm14324_vm1, %v16729_v46  ;;  %13360 = vmatprep.mubr.msk.f32.mxu0 %vm14324_vm1, %v16729_v46 }
 0x102   : > { %v14709_v47 = vadd.f32 %v14580_v8, %v878_v45  ;;  %13333 = vmatprep.subr.mxu1 %v16729_v46  ;;  %13368 = vmatprep.subr.mxu0 %v16729_v46  ;;  %16804 = vst [vmem:[#allocation17_spill] sm:$0xff] %v14772_v56  ;;  %v14821_v8 = vpop.f32.mrf.mxu0 }
 0x103   : > { %13331 = vmatmul.mubr.msk.f32.vlgmr.msra.gmra.mxu1 %vm1093_vm2, %v14691_v42  ;;  %13361 = vmatmul.mubr.msk.f32.vlgmr.msra.gmra.mxu0 %vm1093_vm2, %v14702_v44 }
 0x104   : > { %13334 = vmatpush3.xpose.msk.msra.mxu1 %vm1093_vm2, %v14694_v43  ;;  %13369 = vmatpush3.xpose.msk.msra.mxu0 %vm1093_vm2, %v14709_v47  ;;  %v13285_v9 = vpop.f32.mrf.mxu0 }
 0x105   : > { %13335 = vmatprep.mubr.msk.f32.mxu1 %vm14324_vm1, %v16729_v46  ;;  %13370 = vmatprep.mubr.msk.f32.mxu0 %vm14324_vm1, %v16729_v46  ;;  %v14824_v11 = vadd.f32 %v13285_v9, %v14801_v60 }
 0x106   : > { %13343 = vmatprep.subr.mxu1 %v16729_v46  ;;  %13378 = vmatprep.subr.mxu0 %v16729_v46  ;;  %v14826_v13 = vpop.f32.mrf.mxu0 }
 0x107   : > { %13336 = vmatmul.mubr.msk.f32.vlgmr.msra.gmra.mxu1 %vm1093_vm2, %v14714_v48  ;;  %13371 = vmatmul.mubr.msk.f32.vlgmr.msra.gmra.mxu0 %vm1093_vm2, %v14729_v50  ;;  %16811 = vst [vmem:[#allocation24_spill] sm:$0xff] %v14824_v11 }
 0x108   : > { %13344 = vmatpush3.xpose.msk.msra.mxu1 %vm1093_vm2, %v14721_v49  ;;  %13345 = vmatprep.mubr.msk.f32.mxu1 %vm14324_vm1, %v16729_v46  ;;  %v13288_v15 = vpop.f32.mrf.mxu0 }
 0x109   : > { %13353 = vmatprep.subr.mxu1 %v16729_v46  ;;  %13380 = vmatprep.mubr.msk.f32.mxu0 %vm14324_vm1, %v16729_v46  ;;  %v14829_v17 = vadd.f32 %v13288_v15, %v14801_v60 }
 0x10a   : > { %13379 = vmatpush3.msra.mxu0 %v14807_v55  ;;  %v14831_v19 = vpop.f32.mrf.mxu0 }
 0x10b   : > { %13346 = vmatmul.mubr.msk.f32.vlgmr.msra.gmra.mxu1 %vm1093_vm2, %v14750_v52  ;;  %13388 = vmatprep.subr.mxu0 %v16729_v46  ;;  %16812 = vst [vmem:[#allocation25_spill] sm:$0xff] %v14829_v17 }
 0x10c   : > { %13354 = vmatpush3.xpose.msk.msra.mxu1 %vm1093_vm2, %v14742_v51  ;;  %13355 = vmatprep.mubr.msk.f32.mxu1 %vm14324_vm1, %v16729_v46  ;;  %v13291_v21 = vpop.f32.mrf.mxu0 }
 0x10d   : > { %13363 = vmatprep.subr.mxu1 %v16729_v46  ;;  %v14834_v22 = vadd.f32 %v13291_v21, %v14801_v60 }
 0x10e   : > { %v14836_v23 = vpop.f32.mrf.mxu0 }
 0x10f   : > { %13356 = vmatmul.mubr.msk.f32.vlgmr.msra.gmra.mxu1 %vm1093_vm2, %v14766_v54  ;;  %16813 = vst [vmem:[#allocation26_spill] sm:$0xff] %v14834_v22 }
 0x110   : > { %13364 = vmatpush3.xpose.msk.msra.mxu1 %vm1093_vm2, %v14758_v53  ;;  %13365 = vmatprep.mubr.msk.f32.mxu1 %vm14324_vm1, %v16729_v46  ;;  %v13294_v24 = vpop.f32.mrf.mxu0 }
 0x111   : > { %13373 = vmatprep.subr.mxu1 %v16729_v46  ;;  %v14839_v25 = vadd.f32 %v13294_v24, %v14801_v60 }
 0x112   : > { %v14841_v27 = vpop.f32.mrf.mxu0 }
 0x113   : > { %13366 = vmatmul.mubr.msk.f32.vlgmr.msra.gmra.mxu1 %vm1093_vm2, %v14780_v57  ;;  %16814 = vst [vmem:[#allocation27_spill] sm:$0xff] %v14839_v25 }
 0x114   : > { %13374 = vmatpush3.xpose.msk.msra.mxu1 %vm1093_vm2, %v14772_v56  ;;  %13375 = vmatprep.mubr.msk.f32.mxu1 %vm14324_vm1, %v16729_v46  ;;  %v13297_v28 = vpop.f32.mrf.mxu0 }
 0x115   : > { %13383 = vmatprep.subr.mxu1 %v16729_v46  ;;  %v14844_v29 = vadd.f32 %v13297_v28, %v14801_v60 }
 0x116   : > { %v14860_v9 = vpop.f32.mrf.mxu0 }
 0x117   : > { %13376 = vmatmul.mubr.msk.f32.vlgmr.msra.gmra.mxu1 %vm1093_vm2, %v14791_v59  ;;  %16815 = vst [vmem:[#allocation28_spill] sm:$0xff] %v14844_v29 }
 0x118   : > { %13385 = vmatprep.mubr.msk.f32.mxu1 %vm14324_vm1, %v16729_v46  ;;  %13384 = vmatpush3.msra.mxu1 %v14804_v63 }
 0x119   : > { %13393 = vmatprep.subr.mxu1 %v16729_v46 }
 0x1ab   : > { %v14846_v32 = vpop.f32.mrf.mxu1 }
 0x1ac   : > { %v2310_v34 = vsel %vm1093_vm2, %v14846_v32, -inf }
 0x1ad   : > { %2311 = vmax.xlane.f32.xlu0 %v2310_v34  ;;  %v13302_v36 = vpop.f32.mrf.mxu1 }
 0x1af   : > { %v14850_v39 = vpop.f32.mrf.mxu1 }
 0x1b0   : > { %v2313_v41 = vsel %vm1093_vm2, %v14850_v39, -inf }
 0x1b1   : > { %2314 = vmax.xlane.f32.xlu0 %v2313_v41  ;;  %v13307_v45 = vpop.f32.mrf.mxu1 }
 0x1b3   : > { %v14854_v62 = vpop.f32.mrf.mxu1 }
 0x1b4   : > { %v2316_v0 = vsel %vm1093_vm2, %v14854_v62, -inf }
 0x1b5   : > { %2317 = vmax.xlane.f32.xlu1 %v2316_v0  ;;  %v13312_v1 = vpop.f32.mrf.mxu1 }
 0x1b7   : > { %v14858_v6 = vpop.f32.mrf.mxu1 }
 0x1b8   : > { %v2319_v15 = vsel %vm1093_vm2, %v14858_v6, -inf }
 0x1b9   : > { %2320 = vmax.xlane.f32.xlu1 %v2319_v15  ;;  %v13317_v21 = vpop.f32.mrf.mxu1 }
 0x1bb   : > { %v14864_v24 = vpop.f32.mrf.mxu1  ;;  %v14866_v28 = vpop.f32.mrf.mxu0 }
 0x1bc   : > { %v2322_v34 = vsel %vm1093_vm2, %v14864_v24, -inf  ;;  %v2334_v1 = vsel %vm1093_vm2, %v14866_v28, -inf }
 0x1bd   : > { %v13342_v36 = vpop.f32.mrf.mxu0  ;;  %2323 = vmax.xlane.f32.xlu0 %v2322_v34  ;;  %v13322_v41 = vpop.f32.mrf.mxu1 }
 0x1bf   : > { %v14870_v45 = vpop.f32.mrf.mxu1  ;;  %v14872_v0 = vpop.f32.mrf.mxu0 }
 0x1c0   : > { %v2325_v15 = vsel %vm1093_vm2, %v14870_v45, -inf  ;;  %v2340_v34 = vsel %vm1093_vm2, %v14872_v0, -inf }
 0x1c1   : > { %v13352_v21 = vpop.f32.mrf.mxu0  ;;  %2335 = vmax.xlane.f32.xlu0 %v2334_v1  ;;  %2326 = vmax.xlane.f32.xlu1 %v2325_v15  ;;  %v13327_v46 = vpop.f32.mrf.mxu1 }
 0x1c3   : > { %v14878_v20 = vpop.f32.mrf.mxu1  ;;  %v14880_v3 = vpop.f32.mrf.mxu0 }
 0x1c4   : > { %v2328_v16 = vsel %vm1093_vm2, %v14878_v20, -inf }
 0x1c5   : > { %v13362_v36 = vpop.f32.mrf.mxu0  ;;  %2341 = vmax.xlane.f32.xlu0 %v2340_v34  ;;  %v13332_v41 = vpop.f32.mrf.mxu1  ;;  %v2346_v34 = vsel %vm1093_vm2, %v14880_v3, -inf }
 0x1c7   : > { %v14886_v18 = vpop.f32.mrf.mxu1  ;;  %v14888_v61 = vpop.f32.mrf.mxu0 }
 0x1c8   : > { %v2331_v46 = vsel %vm1093_vm2, %v14886_v18, -inf  ;;  %v2352_v2 = vsel %vm1093_vm2, %v14888_v61, -inf }
 0x1c9   : > { %v13372_v1 = vpop.f32.mrf.mxu0  ;;  %2329 = vmax.xlane.f32.xlu0 %v2328_v16  ;;  %2332 = vmax.xlane.f32.xlu1 %v2331_v46  ;;  %v13337_v15 = vpop.f32.mrf.mxu1 }
 0x1cb   : > { %v14892_v21 = vpop.f32.mrf.mxu1 }
 0x1cc   : > { %v2337_v15 = vsel %vm1093_vm2, %v14892_v21, -inf }
 0x1cd   : > { %2347 = vmax.xlane.f32.xlu0 %v2346_v34  ;;  %v13347_v36 = vpop.f32.mrf.mxu1 }
 0x1ce   : > { %v14916_v36 = vpop.permute.xlu1 %3732 }
 0x1cf   : > { %v14896_v41 = vpop.f32.mrf.mxu1  ;;  %16816 = vst [vmem:[#allocation29_spill] sm:$0xff] %v14916_v36 }
 0x1d1   : > { %2353 = vmax.xlane.f32.xlu0 %v2352_v2  ;;  %v13357_v12 = vpop.f32.mrf.mxu1  ;;  %v2343_v2 = vsel %vm1093_vm2, %v14896_v41, -inf }
 0x1d3   : > { %v14900_v14 = vpop.f32.mrf.mxu1 }
 0x1d4   : > { %v2349_v12 = vsel %vm1093_vm2, %v14900_v14, -inf }
 0x1d5   : > { %v13367_v1 = vpop.f32.mrf.mxu1 }
 0x1d6   : > { %v14918_v1 = vpop.permute.xlu0 %3810 }
 0x1d7   : > { %v14902_v16 = vpop.f32.mrf.mxu1  ;;  %16817 = vst [vmem:[#allocation30_spill] sm:$0xff] %v14918_v1 }
 0x1d8   : > { %v2355_v34 = vsel %vm1093_vm2, %v14902_v16, -inf }
 0x1d9   : > { %v13377_v46 = vpop.f32.mrf.mxu1 }
 0x1da   : > { %4044 = vrot.lane.b32.xlu1 %v14675_v38, %s14325_s27  ;;  %v14920_v46 = vpop.permute.xlu1 %3654 }
 0x1db   : > { %16818 = vst [vmem:[#allocation31_spill] sm:$0xff] %v14920_v46 }
 0x1e7   : > { %3966 = vrot.lane.b32.xlu0 %v14650_v31, %s14325_s27  ;;  %v14922_v31 = vpop.permute.xlu0 %3656 }
 0x1eb   : > { %v14926_v38 = vpop.permute.xlu0 %3812 }
 0x1ec   : > { %16820 = vst [vmem:[#allocation33_spill] sm:$0xff] %v14926_v38 }
 0x1ef   : > { %v14930_v58 = vpop.permute.xlu0 %3968 }
 0x1f0   : > { %16822 = vst [vmem:[#allocation35_spill] sm:$0xff] %v14930_v58 }
 0x1fe   : > { %2338 = vmax.xlane.f32.xlu1 %v2337_v15  ;;  %v14924_v15 = vpop.permute.xlu1 %3888 }
 0x1ff   : > { %16819 = vst [vmem:[#allocation32_spill] sm:$0xff] %v14924_v15 }
 0x202   : > { %2344 = vmax.xlane.f32.xlu1 %v2343_v2  ;;  %v14928_v2 = vpop.permute.xlu1 %3734 }
 0x203   : > { %16821 = vst [vmem:[#allocation34_spill] sm:$0xff] %v14928_v2 }
 0x206   : > { %2350 = vmax.xlane.f32.xlu1 %v2349_v12  ;;  %v14932_v12 = vpop.permute.xlu1 %3890 }
 0x207   : > { %16823 = vst [vmem:[#allocation36_spill] sm:$0xff] %v14932_v12 }
 0x20a   : > { %2356 = vmax.xlane.f32.xlu1 %v2355_v34  ;;  %v14935_v36 = vpop.permute.xlu1 %4046 }
 0x236   : > { %v2312_v10 = vpop.xlane.xlu0 %2311 }
 0x237   : > { %v2358_v34 = vsub.f32 %v14846_v32, %v2312_v10 }
 0x239   : > { %v2374_v63 = vmul.f32 1.442695, %v2358_v34 }
 0x23a   : > { %v2315_v29 = vpop.xlane.xlu0 %2314 }
 0x23b   : > { %14059 = vpow2.f32 %v2374_v63  ;;  %v2359_v25 = vsub.f32 %v14850_v39, %v2315_v29 }
 0x23d   : > { %v2376_v22 = vmul.f32 1.442695, %v2359_v25 }
 0x23e   : > { %v2318_v15 = vpop.xlane.xlu1 %2317 }
 0x23f   : > { %14061 = vpow2.f32 %v2376_v22  ;;  %v2360_v1 = vsub.f32 %v14854_v62, %v2318_v15 }
 0x241   : > { %v2378_v2 = vmul.f32 1.442695, %v2360_v1 }
 0x242   : > { %v2321_v38 = vpop.xlane.xlu1 %2320 }
 0x243   : > { %14063 = vpow2.f32 %v2378_v2  ;;  %v2361_v12 = vsub.f32 %v14858_v6, %v2321_v38 }
 0x245   : > { %v2380_v58 = vmul.f32 1.442695, %v2361_v12 }
 0x246   : > { %v2324_v46 = vpop.xlane.xlu0 %2323 }
 0x247   : > { %14065 = vpow2.f32 %v2380_v58  ;;  %v2362_v10 = vsub.f32 %v14864_v24, %v2324_v46 }
 0x248   : > { %v14941_v32 = vpop.eup %14059 }
 0x249   : > { %v2382_v63 = vmul.f32 1.442695, %v2362_v10  ;;  %v2406_v25 = vsel %vm1093_vm2, %v14941_v32, 0.0 }
 0x24a   : > { %v2336_v29 = vpop.xlane.xlu0 %2335  ;;  %v2327_v22 = vpop.xlane.xlu1 %2326  ;;  %2407 = vadd.xlane.f32.xlu0 %v2406_v25 }
 0x24b   : > { %14067 = vpow2.f32 %v2382_v63  ;;  %v2366_v39 = vsub.f32 %v14866_v28, %v2336_v29  ;;  %v2363_v62 = vsub.f32 %v14870_v45, %v2327_v22 }
 0x24c   : > { %v14947_v38 = vpop.eup %14061 }
 0x24d   : > { %v2390_v6 = vmul.f32 1.442695, %v2366_v39  ;;  %v2384_v58 = vmul.f32 1.442695, %v2363_v62  ;;  %v2409_v24 = vsel %vm1093_vm2, %v14947_v38, 0.0 }
 0x24e   : > { %v2342_v1 = vpop.xlane.xlu0 %2341  ;;  %2410 = vadd.xlane.f32.xlu1 %v2409_v24 }
 0x24f   : > { %14069 = vpow2.f32 %v2390_v6  ;;  %v2368_v46 = vsub.f32 %v14872_v0, %v2342_v1 }
 0x250   : > { %v14952_v15 = vpop.eup %14063  ;;  %14071 = vpow2.f32 %v2384_v58 }
 0x251   : > { %v2394_v2 = vmul.f32 1.442695, %v2368_v46  ;;  %v2412_v28 = vsel %vm1093_vm2, %v14952_v15, 0.0 }
 0x252   : > { %2413 = vadd.xlane.f32.xlu0 %v2412_v28  ;;  %v2330_v45 = vpop.xlane.xlu0 %2329  ;;  %v2333_v1 = vpop.xlane.xlu1 %2332 }
 0x253   : > { %14073 = vpow2.f32 %v2394_v2  ;;  %v2364_v12 = vsub.f32 %v14878_v20, %v2330_v45  ;;  %v2365_v46 = vsub.f32 %v14886_v18, %v2333_v1 }
 0x254   : > { %v14957_v34 = vpop.eup %14065 }
 0x255   : > { %v2386_v10 = vmul.f32 1.442695, %v2364_v12  ;;  %v2415_v63 = vsel %vm1093_vm2, %v14957_v34, 0.0  ;;  %v2388_v28 = vmul.f32 1.442695, %v2365_v46 }
 0x256   : > { %2416 = vadd.xlane.f32.xlu1 %v2415_v63  ;;  %v2348_v2 = vpop.xlane.xlu0 %2347 }
 0x257   : > { %14075 = vpow2.f32 %v2386_v10  ;;  %v2370_v45 = vsub.f32 %v14880_v3, %v2348_v2 }
 0x258   : > { %v14961_v0 = vpop.eup %14067  ;;  %14077 = vpow2.f32 %v2388_v28 }
 0x259   : > { %v2418_v25 = vsel %vm1093_vm2, %v14961_v0, 0.0  ;;  %v2398_v10 = vmul.f32 1.442695, %v2370_v45 }
 0x25a   : > { %2419 = vadd.xlane.f32.xlu0 %v2418_v25  ;;  %v2354_v12 = vpop.xlane.xlu0 %2353 }
 0x25b   : > { %v2372_v63 = vsub.f32 %v14888_v61, %v2354_v12  ;;  %14079 = vpow2.f32 %v2398_v10 }
 0x25c   : > { %v14965_v29 = vpop.eup %14069 }
 0x25d   : > { %v14967_v22 = vpop.eup %14071  ;;  %v2430_v20 = vsel %vm1093_vm2, %v14965_v29, 0.0  ;;  %v2402_v25 = vmul.f32 1.442695, %v2372_v63 }
 0x25e   : > { %2431 = vadd.xlane.f32.xlu0 %v2430_v20  ;;  %v2421_v39 = vsel %vm1093_vm2, %v14967_v22, 0.0 }
 0x25f   : > { %2422 = vadd.xlane.f32.xlu1 %v2421_v39  ;;  %14081 = vpow2.f32 %v2402_v25 }
 0x260   : > { %v14973_v62 = vpop.eup %14073 }
 0x261   : > { %v2436_v6 = vsel %vm1093_vm2, %v14973_v62, 0.0 }
 0x262   : > { %2437 = vadd.xlane.f32.xlu0 %v2436_v6 }
 0x264   : > { %v14977_v58 = vpop.eup %14075 }
 0x265   : > { %v2424_v24 = vsel %vm1093_vm2, %v14977_v58, 0.0  ;;  %v14988_v20 = vpop.eup %14077 }
 0x266   : > { %2425 = vadd.xlane.f32.xlu0 %v2424_v24  ;;  %v2427_v18 = vsel %vm1093_vm2, %v14988_v20, 0.0  ;;  %v15002_v24 = vpop.permute.xlu1 %4044 }
 0x268   : > { %v14992_v39 = vpop.eup %14079 }
 0x269   : > { %v2442_v6 = vsel %vm1093_vm2, %v14992_v39, 0.0 }
 0x26c   : > { %v14996_v3 = vpop.eup %14081 }
 0x26d   : > { %v2448_v61 = vsel %vm1093_vm2, %v14996_v3, 0.0 }
 0x270   : > { %4202 = vrot.lane.b32.xlu1 %v14694_v43, %s14325_s27 }
 0x27c   : > { %4124 = vrot.lane.b32.xlu0 %v14664_v35, %s14325_s27 }
 0x287   : > { %v2339_v1 = vpop.xlane.xlu1 %2338 }
 0x288   : > { %v2367_v2 = vsub.f32 %v14892_v21, %v2339_v1 }
 0x28a   : > { %v2392_v45 = vmul.f32 1.442695, %v2367_v2 }
 0x28b   : > { %v2345_v46 = vpop.xlane.xlu1 %2344 }
 0x28c   : > { %v2369_v12 = vsub.f32 %v14896_v41, %v2345_v46  ;;  %14083 = vpow2.f32 %v2392_v45 }
 0x28e   : > { %v2396_v10 = vmul.f32 1.442695, %v2369_v12 }
 0x28f   : > { %v2351_v28 = vpop.xlane.xlu1 %2350 }
 0x290   : > { %v2371_v63 = vsub.f32 %v14900_v14, %v2351_v28  ;;  %14085 = vpow2.f32 %v2396_v10 }
 0x292   : > { %v2400_v21 = vmul.f32 1.442695, %v2371_v63 }
 0x293   : > { %v2357_v25 = vpop.xlane.xlu1 %2356 }
 0x294   : > { %2428 = vadd.xlane.f32.xlu1 %v2427_v18  ;;  %v2373_v18 = vsub.f32 %v14902_v16, %v2357_v25  ;;  %14087 = vpow2.f32 %v2400_v21  ;;  %v15030_v16 = vpop.permute.xlu0 %3966 }
 0x296   : > { %v2404_v41 = vmul.f32 1.442695, %v2373_v18 }
 0x298   : > { %14089 = vpow2.f32 %v2404_v41  ;;  %v15051_v41 = vadd.f32 %v14801_v60, %v14815_v5 }
 0x29a   : > { %16824 = vst [vmem:[#allocation37_spill] sm:$0xff] %v15051_v41 }
 0x29b   : > { %2443 = vadd.xlane.f32.xlu0 %v2442_v6  ;;  %v15020_v6 = vpop.eup %14083 }
 0x29c   : > { %v2433_v14 = vsel %vm1093_vm2, %v15020_v6, 0.0 }
 0x29f   : > { %2449 = vadd.xlane.f32.xlu0 %v2448_v61  ;;  %v15026_v61 = vpop.eup %14085 }
 0x2a0   : > { %v2439_v1 = vsel %vm1093_vm2, %v15026_v61, 0.0 }
 0x2a1   : > { %v15034_v46 = vpop.eup %14087 }
 0x2a2   : > { %v2445_v28 = vsel %vm1093_vm2, %v15034_v46, 0.0 }
 0x2a5   : > { %4200 = vrot.lane.b32.xlu1 %v14714_v48, %s14325_s27  ;;  %v15040_v45 = vpop.eup %14089 }
 0x2a6   : > { %v2451_v10 = vsel %vm1093_vm2, %v15040_v45, 0.0 }
 0x2a9   : > { %4358 = vrot.lane.b32.xlu1 %v14721_v49, %s14325_s27 }
 0x2b5   : > { %4122 = vrot.lane.b32.xlu0 %v14691_v42, %s14325_s27 }
 0x2b9   : > { %4280 = vrot.lane.b32.xlu0 %v14637_v26, %s14325_s27 }
 0x2bd   : > { %4278 = vrot.lane.b32.xlu0 %v14647_v30, %s14325_s27 }
 0x2c1   : > { %4436 = vrot.lane.b32.xlu0 %v14656_v33, %s14325_s27 }
 0x2c5   : > { %4434 = vrot.lane.b32.xlu0 %v14672_v37, %s14325_s27 }
 0x2c9   : > { %4592 = vrot.lane.b32.xlu0 %v14682_v40, %s14325_s27 }
 0x2cd   : > { %2434 = vadd.xlane.f32.xlu1 %v2433_v14  ;;  %4590 = vrot.lane.b32.xlu0 %v14702_v44, %s14325_s27 }
 0x2d1   : > { %2440 = vadd.xlane.f32.xlu1 %v2439_v1  ;;  %4748 = vrot.lane.b32.xlu0 %v14709_v47, %s14325_s27 }
 0x2d3   : > { %v2408_v2 = vpop.xlane.xlu0 %2407 }
 0x2d4   : > { %14091 = vrcp.f32 %v2408_v2  ;;  %v16825_v2 = vmov 0.0  }
 0x2d5   : > { %2446 = vadd.xlane.f32.xlu1 %v2445_v28  ;;  %4746 = vrot.lane.b32.xlu0 %v14729_v50, %s14325_s27 }
 0x2d7   : > { %v2411_v12 = vpop.xlane.xlu1 %2410 }
 0x2d8   : > { %14093 = vrcp.f32 %v2411_v12 }
 0x2d9   : > { %2452 = vadd.xlane.f32.xlu1 %v2451_v10  ;;  %5079 = vrot.lane.b32.xlu0 %v14807_v55, %s14325_s27 }
 0x2db   : > { %v2414_v63 = vpop.xlane.xlu0 %2413 }
 0x2dc   : > { %14095 = vrcp.f32 %v2414_v63 }
 0x2df   : > { %v2417_v25 = vpop.xlane.xlu1 %2416 }
 0x2e0   : > { %14097 = vrcp.f32 %v2417_v25 }
 0x2e1   : > { %v14092_v21 = vpop.eup %14091 }
 0x2e2   : > { %v2470_v18 = vmul.f32 %v14092_v21, %v14941_v32 }
 0x2e3   : > { %v2420_v14 = vpop.xlane.xlu0 %2419 }
 0x2e4   : > { %14099 = vrcp.f32 %v2420_v14  ;;  %13381 = vmatmul.mubr.msk.f32.vlgmr.msra.gmra.mxu0 %vm1093_vm2, %v2470_v18 }
 0x2e5   : > { %v14094_v1 = vpop.eup %14093  ;;  %13389 = vmatpush3.msra.mxu0 %v15051_v41  ;;  %13390 = vmatprep.mubr.msk.f32.mxu0 %vm14324_vm1, %v16825_v2 }
 0x2e6   : > { %v2471_v28 = vmul.f32 %v14094_v1, %v14947_v38  ;;  %13398 = vmatprep.subr.mxu0 %v16825_v2  ;;  %v15069_v38 = vadd.f32 %v14801_v60, %v14821_v8 }
 0x2e7   : > { %v2432_v12 = vpop.xlane.xlu0 %2431 }
 0x2e8   : > { %v2423_v32 = vpop.xlane.xlu1 %2422  ;;  %13386 = vmatmul.mubr.msk.f32.vlgmr.msra.gmra.mxu1 %vm1093_vm2, %v2471_v28  ;;  %16826 = vst [vmem:[#allocation38_spill] sm:$0xff] %v15069_v38 }
 0x2e9   : > { %v14096_v5 = vpop.eup %14095  ;;  %14101 = vrcp.f32 %v2423_v32  ;;  %13394 = vmatpush3.msra.mxu1 %v14812_v4  ;;  %13395 = vmatprep.mubr.msk.f32.mxu1 %vm14324_vm1, %v16825_v2  ;;  %v15123_v32 = vadd.f32 %v14801_v60, %v14836_v23 }
 0x2ea   : > { %4356 = vrot.lane.b32.xlu1 %v14750_v52, %s14325_s27  ;;  %v2472_v10 = vmul.f32 %v14096_v5, %v14952_v15  ;;  %13403 = vmatprep.subr.mxu1 %v16825_v2  ;;  %v15133_v5 = vadd.f32 %v14801_v60, %v14841_v27 }
 0x2eb   : > { %v2438_v63 = vpop.xlane.xlu0 %2437  ;;  %16829 = vst [vmem:[#allocation41_spill] sm:$0xff] %v15123_v32 }
 0x2ec   : > { %13391 = vmatmul.mubr.msk.f32.vlgmr.msra.gmra.mxu0 %vm1093_vm2, %v2472_v10  ;;  %16830 = vst [vmem:[#allocation42_spill] sm:$0xff] %v15133_v5  ;;  %v15140_v23 = vpop.permute.xlu1 %4202 }
 0x2ed   : > { %v14098_v25 = vpop.eup %14097  ;;  %13399 = vmatpush3.msra.mxu0 %v15069_v38  ;;  %13400 = vmatprep.mubr.msk.f32.mxu0 %vm14324_vm1, %v16825_v2 }
 0x2ee   : > { %4514 = vrot.lane.b32.xlu1 %v14742_v51, %s14325_s27  ;;  %v2473_v15 = vmul.f32 %v14098_v25, %v14957_v34  ;;  %13408 = vmatprep.subr.mxu0 %v16825_v2  ;;  %v15089_v34 = vadd.f32 %v14801_v60, %v14826_v13 }
 0x2ef   : > { %v2426_v21 = vpop.xlane.xlu0 %2425 }
 0x2f0   : > { %14103 = vrcp.f32 %v2426_v21  ;;  %13396 = vmatmul.mubr.msk.f32.vlgmr.msra.gmra.mxu1 %vm1093_vm2, %v2473_v15  ;;  %16827 = vst [vmem:[#allocation39_spill] sm:$0xff] %v15089_v34 }
 0x2f1   : > { %v14100_v8 = vpop.eup %14099  ;;  %13404 = vmatpush3.msra.mxu1 %v14819_v7  ;;  %13405 = vmatprep.mubr.msk.f32.mxu1 %vm14324_vm1, %v16825_v2  ;;  %14105 = vrcp.f32 %v2432_v12 }
 0x2f2   : > { %4512 = vrot.lane.b32.xlu1 %v14766_v54, %s14325_s27  ;;  %v2474_v18 = vmul.f32 %v14100_v8, %v14961_v0  ;;  %13413 = vmatprep.subr.mxu1 %v16825_v2  ;;  %14107 = vrcp.f32 %v2438_v63 }
 0x2f3   : > { %v4125_v10 = vpop.permute.xlu0 %4124 }
 0x2f4   : > { %13401 = vmatmul.mubr.msk.f32.vlgmr.msra.gmra.mxu0 %vm1093_vm2, %v2474_v18 }
 0x2f5   : > { %13409 = vmatpush3.msra.mxu0 %v15089_v34  ;;  %13410 = vmatprep.mubr.msk.f32.mxu0 %vm14324_vm1, %v16825_v2 }
 0x2f6   : > { %v14102_v14 = vpop.eup %14101  ;;  %4670 = vrot.lane.b32.xlu1 %v14758_v53, %s14325_s27  ;;  %13418 = vmatprep.subr.mxu0 %v16825_v2 }
 0x2f7   : > { %v2475_v0 = vmul.f32 %v14102_v14, %v14967_v22  ;;  %v15111_v22 = vadd.f32 %v14801_v60, %v14831_v19  ;;  %v15151_v14 = vadd.f32 %v14801_v60, %v14860_v9  ;;  %v16831_v9 = vld [vmem:[#allocation31_spill] sm:$0xff] }
 0x2f9   : > { %13406 = vmatmul.mubr.msk.f32.vlgmr.msra.gmra.mxu1 %vm1093_vm2, %v2475_v0  ;;  %16828 = vst [vmem:[#allocation40_spill] sm:$0xff] %v15111_v22 }
 0x2fa   : > { %13414 = vmatpush3.msra.mxu1 %v14824_v11  ;;  %4668 = vrot.lane.b32.xlu1 %v14780_v57, %s14325_s27 }
 0x2fb   : > { %13415 = vmatprep.mubr.msk.f32.mxu1 %vm14324_vm1, %v16825_v2  ;;  %13423 = vmatprep.subr.mxu1 %v16825_v2 }
 0x2fd   : > { %v14104_v13 = vpop.eup %14103 }
 0x2fe   : > { %4826 = vrot.lane.b32.xlu1 %v14772_v56, %s14325_s27  ;;  %v2476_v1 = vmul.f32 %v14104_v13, %v14977_v58  ;;  %v14106_v28 = vpop.eup %14105 }
 0x2ff   : > { %v2478_v12 = vmul.f32 %v14106_v28, %v14965_v29  ;;  %v14108_v58 = vpop.eup %14107  ;;  %v16833_v28 = vld [vmem:[#allocation30_spill] sm:$0xff] }
 0x300   : > { %13411 = vmatmul.mubr.msk.f32.vlgmr.msra.gmra.mxu0 %vm1093_vm2, %v2476_v1  ;;  %v2480_v19 = vmul.f32 %v14108_v58, %v14973_v62 }
 0x301   : > { %13419 = vmatpush3.msra.mxu0 %v15111_v22  ;;  %13420 = vmatprep.mubr.msk.f32.mxu0 %vm14324_vm1, %v16825_v2 }
 0x302   : > { %4824 = vrot.lane.b32.xlu1 %v14791_v59, %s14325_s27  ;;  %13428 = vmatprep.subr.mxu0 %v16825_v2 }
 0x304   : > { %13421 = vmatmul.mubr.msk.f32.vlgmr.msra.gmra.mxu0 %vm1093_vm2, %v2478_v12 }
 0x305   : > { %13429 = vmatpush3.msra.mxu0 %v15123_v32  ;;  %13430 = vmatprep.mubr.msk.f32.mxu0 %vm14324_vm1, %v16825_v2 }
 0x306   : > { %13438 = vmatprep.subr.mxu0 %v16825_v2 }
 0x308   : > { %13431 = vmatmul.mubr.msk.f32.vlgmr.msra.gmra.mxu0 %vm1093_vm2, %v2480_v19 }
 0x309   : > { %13439 = vmatpush3.msra.mxu0 %v15133_v5  ;;  %13440 = vmatprep.mubr.msk.f32.mxu0 %vm14324_vm1, %v16825_v2 }
 0x30a   : > { %13448 = vmatprep.subr.mxu0 %v16825_v2 }
 0x31d   : > { %v2429_v29 = vpop.xlane.xlu1 %2428 }
 0x31e   : > { %14109 = vrcp.f32 %v2429_v29 }
 0x321   : > { %v15190_v58 = vpop.permute.xlu1 %4200 }
 0x324   : > { %v2444_v63 = vpop.xlane.xlu0 %2443 }
 0x325   : > { %14111 = vrcp.f32 %v2444_v63  ;;  %v15198_v19 = vpop.permute.xlu1 %4358 }
 0x328   : > { %v2450_v62 = vpop.xlane.xlu0 %2449 }
 0x329   : > { %14113 = vrcp.f32 %v2450_v62 }
 0x32b   : > { %v14110_v27 = vpop.eup %14109 }
 0x32c   : > { %v4123_v25 = vpop.permute.xlu0 %4122  ;;  %v2477_v15 = vmul.f32 %v14110_v27, %v14988_v20 }
 0x32e   : > { %13416 = vmatmul.mubr.msk.f32.vlgmr.msra.gmra.mxu1 %vm1093_vm2, %v2477_v15 }
 0x32f   : > { %13424 = vmatpush3.msra.mxu1 %v14829_v17  ;;  %13425 = vmatprep.mubr.msk.f32.mxu1 %vm14324_vm1, %v16825_v2 }
 0x330   : > { %v4281_v21 = vpop.permute.xlu0 %4280  ;;  %13433 = vmatprep.subr.mxu1 %v16825_v2 }
 0x332   : > { %v14112_v8 = vpop.eup %14111 }
 0x333   : > { %v2482_v18 = vmul.f32 %v14112_v8, %v14992_v39  ;;  %v16832_v39 = vld [vmem:[#allocation33_spill] sm:$0xff] }
 0x334   : > { %v4279_v0 = vpop.permute.xlu0 %4278 }
 0x335   : > { %13441 = vmatmul.mubr.msk.f32.vlgmr.msra.gmra.mxu0 %vm1093_vm2, %v2482_v18  ;;  %v16835_v18 = vld [vmem:[#allocation26_spill] sm:$0xff] }
 0x336   : > { %v14114_v20 = vpop.eup %14113  ;;  %13449 = vmatpush3.msra.mxu0 %v15151_v14  ;;  %13450 = vmatprep.mubr.msk.f32.mxu0 %vm14324_vm1, %v16825_v2 }
 0x337   : > { %13458 = vmatprep.subr.mxu0 %v16825_v2  ;;  %v2484_v13 = vmul.f32 %v14114_v20, %v14996_v3 }
 0x338   : > { %v4437_v1 = vpop.permute.xlu0 %4436 }
 0x339   : > { %13451 = vmatmul.mubr.msk.f32.vlgmr.msra.gmra.mxu0 %vm1093_vm2, %v2484_v13  ;;  %v16836_v13 = vld [vmem:[#allocation27_spill] sm:$0xff] }
 0x33a   : > { %13459 = vmatpush3.xpose.msk.msra.mxu0 %vm1093_vm2, %v14922_v31  ;;  %13460 = vmatprep.mubr.msk.f32.mxu0 %vm14324_vm1, %v16825_v2  ;;  %v16834_v31 = vld [vmem:[#allocation35_spill] sm:$0xff] }
 0x33b   : > { %13468 = vmatprep.subr.mxu0 %v16825_v2 }
 0x33c   : > { %v4435_v60 = vpop.permute.xlu0 %4434 }
 0x33d   : > { %13461 = vmatmul.mubr.msk.f32.vlgmr.msra.gmra.mxu0 %vm1093_vm2, %v16831_v9  ;;  %v16837_v9 = vld [vmem:[#allocation28_spill] sm:$0xff] }
 0x33e   : > { %13469 = vmatpush3.xpose.msk.msra.mxu0 %vm1093_vm2, %v16832_v39  ;;  %13470 = vmatprep.mubr.msk.f32.mxu0 %vm14324_vm1, %v16825_v2 }
 0x33f   : > { %13478 = vmatprep.subr.mxu0 %v16825_v2 }
 0x340   : > { %v4593_v3 = vpop.permute.xlu0 %4592 }
 0x341   : > { %13471 = vmatmul.mubr.msk.f32.vlgmr.msra.gmra.mxu0 %vm1093_vm2, %v16833_v28  ;;  %v16840_v28 = vld [vmem:[#allocation36_spill] sm:$0xff] }
 0x342   : > { %13479 = vmatpush3.xpose.msk.msra.mxu0 %vm1093_vm2, %v16834_v31  ;;  %13480 = vmatprep.mubr.msk.f32.mxu0 %vm14324_vm1, %v16825_v2  ;;  %v16841_v31 = vld [vmem:[#allocation32_spill] sm:$0xff] }
 0x343   : > { %13488 = vmatprep.subr.mxu0 %v16825_v2 }
 0x344   : > { %v4591_v12 = vpop.permute.xlu0 %4590 }
 0x345   : > { %13481 = vmatmul.mubr.msk.f32.vlgmr.msra.gmra.mxu0 %vm1093_vm2, %v15030_v16 }
 0x346   : > { %13489 = vmatpush3.xpose.msk.msra.mxu0 %vm1093_vm2, %v4125_v10  ;;  %13490 = vmatprep.mubr.msk.f32.mxu0 %vm14324_vm1, %v16825_v2 }
 0x347   : > { %13498 = vmatprep.subr.mxu0 %v16825_v2 }
 0x348   : > { %v4749_v16 = vpop.permute.xlu0 %4748 }
 0x349   : > { %13491 = vmatmul.mubr.msk.f32.vlgmr.msra.gmra.mxu0 %vm1093_vm2, %v4123_v25 }
 0x34a   : > { %13499 = vmatpush3.xpose.msk.msra.mxu0 %vm1093_vm2, %v4281_v21  ;;  %13500 = vmatprep.mubr.msk.f32.mxu0 %vm14324_vm1, %v16825_v2 }
 0x34b   : > { %13508 = vmatprep.subr.mxu0 %v16825_v2 }
 0x34c   : > { %v4747_v29 = vpop.permute.xlu0 %4746 }
 0x34d   : > { %13501 = vmatmul.mubr.msk.f32.vlgmr.msra.gmra.mxu0 %vm1093_vm2, %v4279_v0 }
 0x34e   : > { %13509 = vmatpush3.xpose.msk.msra.mxu0 %vm1093_vm2, %v4437_v1  ;;  %13510 = vmatprep.mubr.msk.f32.mxu0 %vm14324_vm1, %v16825_v2 }
 0x34f   : > { %13518 = vmatprep.subr.mxu0 %v16825_v2 }
 0x350   : > { %v5080_v63 = vpop.permute.xlu0 %5079 }
 0x351   : > { %13511 = vmatmul.mubr.msk.f32.vlgmr.msra.gmra.mxu0 %vm1093_vm2, %v4435_v60 }
 0x352   : > { %13519 = vmatpush3.xpose.msk.msra.mxu0 %vm1093_vm2, %v4593_v3  ;;  %13520 = vmatprep.mubr.msk.f32.mxu0 %vm14324_vm1, %v16825_v2  ;;  %v16838_v3 = vld [vmem:[#allocation34_spill] sm:$0xff] }
 0x353   : > { %13528 = vmatprep.subr.mxu0 %v16825_v2 }
 0x355   : > { %13521 = vmatmul.mubr.msk.f32.vlgmr.msra.gmra.mxu0 %vm1093_vm2, %v4591_v12 }
 0x356   : > { %13529 = vmatpush3.xpose.msk.msra.mxu0 %vm1093_vm2, %v4749_v16  ;;  %v2435_v10 = vpop.xlane.xlu1 %2434  ;;  %13530 = vmatprep.mubr.msk.f32.mxu0 %vm14324_vm1, %v16825_v2 }
 0x357   : > { %14115 = vrcp.f32 %v2435_v10  ;;  %13538 = vmatprep.subr.mxu0 %v16825_v2 }
 0x359   : > { %13531 = vmatmul.mubr.msk.f32.vlgmr.msra.gmra.mxu0 %vm1093_vm2, %v4747_v29 }
 0x35a   : > { %13539 = vmatpush3.msra.mxu0 %v5080_v63  ;;  %v2441_v62 = vpop.xlane.xlu1 %2440  ;;  %13540 = vmatprep.mubr.msk.f32.mxu0 %vm14324_vm1, %v16825_v2 }
 0x35b   : > { %14117 = vrcp.f32 %v2441_v62  ;;  %13548 = vmatprep.subr.mxu0 %v16825_v2 }
 0x35e   : > { %v2447_v27 = vpop.xlane.xlu1 %2446 }
 0x35f   : > { %14119 = vrcp.f32 %v2447_v27 }
 0x362   : > { %v2453_v25 = vpop.xlane.xlu1 %2452 }
 0x363   : > { %14121 = vrcp.f32 %v2453_v25 }
 0x364   : > { %v14116_v15 = vpop.eup %14115 }
 0x365   : > { %v2479_v21 = vmul.f32 %v14116_v15, %v15020_v6 }
 0x366   : > { %v4357_v1 = vpop.permute.xlu1 %4356 }
 0x367   : > { %13426 = vmatmul.mubr.msk.f32.vlgmr.msra.gmra.mxu1 %vm1093_vm2, %v2479_v21 }
 0x368   : > { %v14118_v8 = vpop.eup %14117  ;;  %13434 = vmatpush3.msra.mxu1 %v16835_v18  ;;  %13435 = vmatprep.mubr.msk.f32.mxu1 %vm14324_vm1, %v16825_v2 }
 0x369   : > { %13443 = vmatprep.subr.mxu1 %v16825_v2  ;;  %v2481_v0 = vmul.f32 %v14118_v8, %v15026_v61 }
 0x36a   : > { %v4515_v39 = vpop.permute.xlu1 %4514 }
 0x36b   : > { %13436 = vmatmul.mubr.msk.f32.vlgmr.msra.gmra.mxu1 %vm1093_vm2, %v2481_v0 }
 0x36c   : > { %v14120_v20 = vpop.eup %14119  ;;  %13444 = vmatpush3.msra.mxu1 %v16836_v13  ;;  %13445 = vmatprep.mubr.msk.f32.mxu1 %vm14324_vm1, %v16825_v2 }
 0x36d   : > { %13453 = vmatprep.subr.mxu1 %v16825_v2  ;;  %v2483_v6 = vmul.f32 %v14120_v20, %v15034_v46  ;;  %v16839_v46 = vld [vmem:[#allocation29_spill] sm:$0xff] }
 0x36f   : > { %13446 = vmatmul.mubr.msk.f32.vlgmr.msra.gmra.mxu1 %vm1093_vm2, %v2483_v6 }
 0x370   : > { %v14122_v60 = vpop.eup %14121  ;;  %13454 = vmatpush3.msra.mxu1 %v16837_v9  ;;  %13455 = vmatprep.mubr.msk.f32.mxu1 %vm14324_vm1, %v16825_v2 }
 0x371   : > { %13463 = vmatprep.subr.mxu1 %v16825_v2  ;;  %v2485_v61 = vmul.f32 %v14122_v60, %v15040_v45  ;;  %v4513_v45 = vpop.permute.xlu1 %4512 }
 0x373   : > { %13456 = vmatmul.mubr.msk.f32.vlgmr.msra.gmra.mxu1 %vm1093_vm2, %v2485_v61 }
 0x374   : > { %13464 = vmatpush3.xpose.msk.msra.mxu1 %vm1093_vm2, %v16838_v3  ;;  %13465 = vmatprep.mubr.msk.f32.mxu1 %vm14324_vm1, %v16825_v2 }
 0x375   : > { %13473 = vmatprep.subr.mxu1 %v16825_v2  ;;  %v4671_v12 = vpop.permute.xlu1 %4670 }
 0x377   : > { %13466 = vmatmul.mubr.msk.f32.vlgmr.msra.gmra.mxu1 %vm1093_vm2, %v16839_v46 }
 0x378   : > { %13474 = vmatpush3.xpose.msk.msra.mxu1 %vm1093_vm2, %v16840_v28  ;;  %13475 = vmatprep.mubr.msk.f32.mxu1 %vm14324_vm1, %v16825_v2 }
 0x379   : > { %13483 = vmatprep.subr.mxu1 %v16825_v2 }
 0x37b   : > { %13476 = vmatmul.mubr.msk.f32.vlgmr.msra.gmra.mxu1 %vm1093_vm2, %v16841_v31 }
 0x37c   : > { %13484 = vmatpush3.xpose.msk.msra.mxu1 %vm1093_vm2, %v14935_v36  ;;  %13485 = vmatprep.mubr.msk.f32.mxu1 %vm14324_vm1, %v16825_v2  ;;  %v4669_v36 = vpop.permute.xlu1 %4668 }
 0x37d   : > { %13493 = vmatprep.subr.mxu1 %v16825_v2 }
 0x37f   : > { %13486 = vmatmul.mubr.msk.f32.vlgmr.msra.gmra.mxu1 %vm1093_vm2, %v15002_v24 }
 0x380   : > { %13494 = vmatpush3.xpose.msk.msra.mxu1 %vm1093_vm2, %v15140_v23  ;;  %13495 = vmatprep.mubr.msk.f32.mxu1 %vm14324_vm1, %v16825_v2  ;;  %v4827_v24 = vpop.permute.xlu1 %4826 }
 0x381   : > { %13503 = vmatprep.subr.mxu1 %v16825_v2 }
 0x383   : > { %13496 = vmatmul.mubr.msk.f32.vlgmr.msra.gmra.mxu1 %vm1093_vm2, %v15190_v58 }
 0x384   : > { %13504 = vmatpush3.xpose.msk.msra.mxu1 %vm1093_vm2, %v15198_v19  ;;  %13505 = vmatprep.mubr.msk.f32.mxu1 %vm14324_vm1, %v16825_v2  ;;  %v4825_v23 = vpop.permute.xlu1 %4824 }
 0x385   : > { %13513 = vmatprep.subr.mxu1 %v16825_v2 }
 0x387   : > { %13506 = vmatmul.mubr.msk.f32.vlgmr.msra.gmra.mxu1 %vm1093_vm2, %v4357_v1 }
 0x388   : > { %13514 = vmatpush3.xpose.msk.msra.mxu1 %vm1093_vm2, %v4515_v39  ;;  %13515 = vmatprep.mubr.msk.f32.mxu1 %vm14324_vm1, %v16825_v2 }
 0x389   : > { %13523 = vmatprep.subr.mxu1 %v16825_v2 }
 0x38b   : > { %13516 = vmatmul.mubr.msk.f32.vlgmr.msra.gmra.mxu1 %vm1093_vm2, %v4513_v45 }
 0x38c   : > { %13524 = vmatpush3.xpose.msk.msra.mxu1 %vm1093_vm2, %v4671_v12  ;;  %13525 = vmatprep.mubr.msk.f32.mxu1 %vm14324_vm1, %v16825_v2 }
 0x38d   : > { %13533 = vmatprep.subr.mxu1 %v16825_v2 }
 0x38f   : > { %13526 = vmatmul.mubr.msk.f32.vlgmr.msra.gmra.mxu1 %vm1093_vm2, %v4669_v36 }
 0x390   : > { %13534 = vmatpush3.xpose.msk.msra.mxu1 %vm1093_vm2, %v4827_v24  ;;  %13535 = vmatprep.mubr.msk.f32.mxu1 %vm14324_vm1, %v16825_v2 }
 0x391   : > { %13543 = vmatprep.subr.mxu1 %v16825_v2 }
 0x393   : > { %13536 = vmatmul.mubr.msk.f32.vlgmr.msra.gmra.mxu1 %vm1093_vm2, %v4825_v23 }
 0x394   : > { %13545 = vmatprep.mubr.msk.f32.mxu1 %vm14324_vm1, %v16825_v2 }
 0x3a4   : > { %v15284_v58 = vpop.f32.mrf.mxu0 }
 0x3a6   : > { %v13382_v16 = vpop.f32.mrf.mxu0 }
 0x3a8   : > { %v15286_v19 = vpop.f32.mrf.mxu1 }
 0x3aa   : > { %v13387_v29 = vpop.f32.mrf.mxu1 }
 0x3ac   : > { %v15288_v10 = vpop.f32.mrf.mxu0 }
 0x3ae   : > { %v13392_v63 = vpop.f32.mrf.mxu0 }
 0x3b0   : > { %v15290_v62 = vpop.f32.mrf.mxu1 }
 0x3b2   : > { %v13397_v27 = vpop.f32.mrf.mxu1 }
 0x3b4   : > { %v15292_v25 = vpop.f32.mrf.mxu0 }
 0x3b6   : > { %v13402_v15 = vpop.f32.mrf.mxu0 }
 0x3b9   : > { %v15294_v21 = vpop.f32.mrf.mxu1 }
 0x3bb   : > { %v13407_v8 = vpop.f32.mrf.mxu1 }
 0x3c0   : > { %v15296_v0 = vpop.f32.mrf.mxu0 }
 0x3c1   : > { %16842 = vst [vmem:[#allocation31_spill] sm:$0xff] %v15296_v0 }
 0x3c2   : > { %v13412_v20 = vpop.f32.mrf.mxu0 }
 0x3c4   : > { %v15298_v6 = vpop.f32.mrf.mxu0 }
 0x3c5   : > { %16843 = vst [vmem:[#allocation33_spill] sm:$0xff] %v15298_v6 }
 0x3c6   : > { %v13422_v1 = vpop.f32.mrf.mxu0 }
 0x3c8   : > { %v15300_v60 = vpop.f32.mrf.mxu0 }
 0x3c9   : > { %16844 = vst [vmem:[#allocation30_spill] sm:$0xff] %v15300_v60 }
 0x3ca   : > { %v13432_v61 = vpop.f32.mrf.mxu0 }
 0x3ee   : > { %v15302_v39 = vpop.f32.mrf.mxu1 }
 0x3ef   : > { %16845 = vst [vmem:[#allocation35_spill] sm:$0xff] %v15302_v39 }
 0x3f0   : > { %v13417_v3 = vpop.f32.mrf.mxu1 }
 0x3f5   : > { %v15304_v46 = vpop.f32.mrf.mxu0 }
 0x3f6   : > { %16846 = vst [vmem:[#allocation28_spill] sm:$0xff] %v15304_v46 }
 0x3f7   : > { %v13442_v28 = vpop.f32.mrf.mxu0 }
 0x3f9   : > { %v15306_v45 = vpop.f32.mrf.mxu0 }
 0x3fa   : > { %16847 = vst [vmem:[#allocation34_spill] sm:$0xff] %v15306_v45 }
 0x3fb   : > { %v13452_v31 = vpop.f32.mrf.mxu0 }
 0x3fd   : > { %v15308_v12 = vpop.f32.mrf.mxu0 }
 0x3fe   : > { %v4902_v36 = vsel %vm1093_vm2, %v15308_v12, -inf }
 0x3ff   : > { %4903 = vmax.xlane.f32.xlu0 %v4902_v36  ;;  %v13462_v24 = vpop.f32.mrf.mxu0 }
 0x401   : > { %v15312_v23 = vpop.f32.mrf.mxu0 }
 0x402   : > { %v4908_v16 = vsel %vm1093_vm2, %v15312_v23, -inf }
 0x403   : > { %4909 = vmax.xlane.f32.xlu0 %v4908_v16  ;;  %v13472_v29 = vpop.f32.mrf.mxu0 }
 0x405   : > { %v15316_v63 = vpop.f32.mrf.mxu0 }
 0x407   : > { %v13482_v27 = vpop.f32.mrf.mxu0 }
 0x409   : > { %v15318_v15 = vpop.f32.mrf.mxu0 }
 0x40b   : > { %v13492_v8 = vpop.f32.mrf.mxu0 }
 0x40d   : > { %v15320_v20 = vpop.f32.mrf.mxu0 }
 0x40f   : > { %v13502_v1 = vpop.f32.mrf.mxu0 }
 0x411   : > { %v15322_v61 = vpop.f32.mrf.mxu0 }
 0x412   : > { %v4932_v6 = vsel %vm1093_vm2, %v15322_v61, -inf }
 0x413   : > { %v13512_v3 = vpop.f32.mrf.mxu0 }
 0x415   : > { %v15324_v28 = vpop.f32.mrf.mxu0 }
 0x416   : > { %v4938_v39 = vsel %vm1093_vm2, %v15324_v28, -inf }
 0x417   : > { %v13522_v31 = vpop.f32.mrf.mxu0 }
 0x419   : > { %v15326_v36 = vpop.f32.mrf.mxu0 }
 0x41a   : > { %v4944_v0 = vsel %vm1093_vm2, %v15326_v36, -inf }
 0x41b   : > { %v13532_v24 = vpop.f32.mrf.mxu0 }
 0x427   : > { %v15328_v16 = vpop.f32.mrf.mxu1 }
 0x428   : > { %16848 = vst [vmem:[#allocation29_spill] sm:$0xff] %v15328_v16  ;;  %v4926_v16 = vsel %vm1093_vm2, %v15320_v20, -inf }
 0x429   : > { %v13427_v29 = vpop.f32.mrf.mxu1 }
 0x42b   : > { %v15330_v55 = vpop.f32.mrf.mxu1 }
 0x42c   : > { %16849 = vst [vmem:[#allocation36_spill] sm:$0xff] %v15330_v55 }
 0x42d   : > { %v13437_v27 = vpop.f32.mrf.mxu1 }
 0x42f   : > { %v15332_v45 = vpop.f32.mrf.mxu1 }
 0x430   : > { %16850 = vst [vmem:[#allocation32_spill] sm:$0xff] %v15332_v45 }
 0x431   : > { %v13447_v8 = vpop.f32.mrf.mxu1 }
 0x432   : > { %v4914_v8 = vsel %vm1093_vm2, %v15316_v63, -inf }
 0x433   : > { %v15334_v46 = vpop.f32.mrf.mxu1 }
 0x434   : > { %16851 = vst [vmem:[#allocation43_spill] sm:$0xff] %v15334_v46 }
 0x435   : > { %v13457_v1 = vpop.f32.mrf.mxu1 }
 0x437   : > { %v15336_v60 = vpop.f32.mrf.mxu1 }
 0x438   : > { %v4905_v3 = vsel %vm1093_vm2, %v15336_v60, -inf }
 0x439   : > { %4906 = vmax.xlane.f32.xlu1 %v4905_v3  ;;  %v13467_v31 = vpop.f32.mrf.mxu1 }
 0x43a   : > { %v4920_v31 = vsel %vm1093_vm2, %v15318_v15, -inf }
 0x43b   : > { %v15340_v24 = vpop.f32.mrf.mxu1 }
 0x43c   : > { %v4911_v29 = vsel %vm1093_vm2, %v15340_v24, -inf }
 0x43d   : > { %4912 = vmax.xlane.f32.xlu0 %v4911_v29  ;;  %v13477_v27 = vpop.f32.mrf.mxu1 }
 0x43f   : > { %v15344_v55 = vpop.f32.mrf.mxu1 }
 0x440   : > { %v4917_v1 = vsel %vm1093_vm2, %v15344_v55, -inf }
 0x441   : > { %4915 = vmax.xlane.f32.xlu0 %v4914_v8  ;;  %4918 = vmax.xlane.f32.xlu1 %v4917_v1  ;;  %v13487_v46 = vpop.f32.mrf.mxu1 }
 0x443   : > { %v15350_v3 = vpop.f32.mrf.mxu1 }
 0x444   : > { %v4923_v29 = vsel %vm1093_vm2, %v15350_v3, -inf }
 0x445   : > { %4921 = vmax.xlane.f32.xlu0 %v4920_v31  ;;  %4924 = vmax.xlane.f32.xlu1 %v4923_v29  ;;  %v13497_v27 = vpop.f32.mrf.mxu1 }
 0x447   : > { %v15356_v45 = vpop.f32.mrf.mxu1 }
 0x448   : > { %v4929_v8 = vsel %vm1093_vm2, %v15356_v45, -inf }
 0x449   : > { %4927 = vmax.xlane.f32.xlu0 %v4926_v16  ;;  %4930 = vmax.xlane.f32.xlu1 %v4929_v8  ;;  %v13507_v46 = vpop.f32.mrf.mxu1 }
 0x44b   : > { %v15362_v1 = vpop.f32.mrf.mxu1 }
 0x44c   : > { %v4935_v31 = vsel %vm1093_vm2, %v15362_v1, -inf }
 0x44d   : > { %4933 = vmax.xlane.f32.xlu0 %v4932_v6  ;;  %4936 = vmax.xlane.f32.xlu1 %v4935_v31  ;;  %v13517_v29 = vpop.f32.mrf.mxu1 }
 0x44e   : > { %v16852_v29 = vld [vmem:[#allocation20_spill] sm:$0xff] }
 0x44f   : > { %v15368_v27 = vpop.f32.mrf.mxu1 }
 0x450   : > { %v4941_v16 = vsel %vm1093_vm2, %v15368_v27, -inf }
 0x451   : > { %4939 = vmax.xlane.f32.xlu0 %v4938_v39  ;;  %4942 = vmax.xlane.f32.xlu1 %v4941_v16  ;;  %v13527_v8 = vpop.f32.mrf.mxu1 }
 0x453   : > { %v15374_v46 = vpop.f32.mrf.mxu1 }
 0x454   : > { %v4947_v6 = vsel %vm1093_vm2, %v15374_v46, -inf }
 0x455   : > { %4945 = vmax.xlane.f32.xlu0 %v4944_v0  ;;  %4948 = vmax.xlane.f32.xlu1 %v4947_v6  ;;  %v13537_v31 = vpop.f32.mrf.mxu1 }
 0x466   : > { %5156 = vrot.lane.b32.xlu1 %v16852_v29, %s14325_s27 }
 0x46b   : > { %5233 = vrot.lane.b32.xlu0 %v15051_v41, %s14325_s27 }
 0x46f   : > { %5310 = vrot.lane.b32.xlu0 %v14812_v4, %s14325_s27 }
 0x473   : > { %5387 = vrot.lane.b32.xlu0 %v15069_v38, %s14325_s27 }
 0x477   : > { %5464 = vrot.lane.b32.xlu0 %v14819_v7, %s14325_s27 }
 0x47b   : > { %5541 = vrot.lane.b32.xlu0 %v15089_v34, %s14325_s27 }
 0x47f   : > { %5618 = vrot.lane.b32.xlu0 %v14824_v11, %s14325_s27 }
 0x483   : > { %5695 = vrot.lane.b32.xlu0 %v15111_v22, %s14325_s27 }
 0x487   : > { %5772 = vrot.lane.b32.xlu0 %v14829_v17, %s14325_s27 }
 0x488   : > { %v4904_v0 = vpop.xlane.xlu0 %4903 }
 0x489   : > { %v4950_v39 = vsub.f32 %v15308_v12, %v4904_v0 }
 0x48b   : > { %5849 = vrot.lane.b32.xlu0 %v15123_v32, %s14325_s27  ;;  %v4966_v8 = vmul.f32 1.442695, %v4950_v39 }
 0x48c   : > { %v4910_v16 = vpop.xlane.xlu0 %4909 }
 0x48d   : > { %v4952_v6 = vsub.f32 %v15312_v23, %v4910_v16  ;;  %14123 = vpow2.f32 %v4966_v8 }
 0x48f   : > { %v4970_v31 = vmul.f32 1.442695, %v4952_v6 }
 0x491   : > { %14125 = vpow2.f32 %v4970_v31 }
 0x49a   : > { %v15402_v11 = vpop.eup %14123 }
 0x49b   : > { %v4998_v22 = vsel %vm1093_vm2, %v15402_v11, 0.0 }
 0x49e   : > { %v15406_v34 = vpop.eup %14125 }
 0x49f   : > { %v5004_v32 = vsel %vm1093_vm2, %v15406_v34, 0.0 }
 0x4aa   : > { %4999 = vadd.xlane.f32.xlu0 %v4998_v22 }
 0x4ae   : > { %5005 = vadd.xlane.f32.xlu0 %v5004_v32 }
 0x4c2   : > { %v4907_v12 = vpop.xlane.xlu1 %4906 }
 0x4c3   : > { %v4951_v0 = vsub.f32 %v15336_v60, %v4907_v12 }
 0x4c5   : > { %v4968_v39 = vmul.f32 1.442695, %v4951_v0 }
 0x4c6   : > { %v4913_v23 = vpop.xlane.xlu0 %4912 }
 0x4c7   : > { %14127 = vpow2.f32 %v4968_v39  ;;  %v4953_v16 = vsub.f32 %v15340_v24, %v4913_v23 }
 0x4c9   : > { %v4972_v8 = vmul.f32 1.442695, %v4953_v16 }
 0x4ca   : > { %v4916_v6 = vpop.xlane.xlu0 %4915  ;;  %v4919_v31 = vpop.xlane.xlu1 %4918 }
 0x4cb   : > { %14129 = vpow2.f32 %v4972_v8  ;;  %v4954_v7 = vsub.f32 %v15316_v63, %v4916_v6  ;;  %v4955_v22 = vsub.f32 %v15344_v55, %v4919_v31 }
 0x4cd   : > { %v4974_v38 = vmul.f32 1.442695, %v4954_v7  ;;  %v4976_v4 = vmul.f32 1.442695, %v4955_v22 }
 0x4ce   : > { %v4922_v41 = vpop.xlane.xlu0 %4921  ;;  %v4925_v32 = vpop.xlane.xlu1 %4924 }
 0x4cf   : > { %14131 = vpow2.f32 %v4974_v38  ;;  %v4956_v60 = vsub.f32 %v15318_v15, %v4922_v41  ;;  %v4957_v12 = vsub.f32 %v15350_v3, %v4925_v32 }
 0x4d0   : > { %14133 = vpow2.f32 %v4976_v4 }
 0x4d1   : > { %v4978_v0 = vmul.f32 1.442695, %v4956_v60  ;;  %v4980_v24 = vmul.f32 1.442695, %v4957_v12 }
 0x4d2   : > { %v4928_v39 = vpop.xlane.xlu0 %4927  ;;  %v4931_v23 = vpop.xlane.xlu1 %4930 }
 0x4d3   : > { %14135 = vpow2.f32 %v4978_v0  ;;  %v4958_v16 = vsub.f32 %v15320_v20, %v4928_v39  ;;  %v4959_v63 = vsub.f32 %v15356_v45, %v4931_v23 }
 0x4d4   : > { %v15418_v55 = vpop.eup %14127  ;;  %14137 = vpow2.f32 %v4980_v24 }
 0x4d5   : > { %v4982_v7 = vmul.f32 1.442695, %v4958_v16  ;;  %v4984_v8 = vmul.f32 1.442695, %v4959_v63  ;;  %v5001_v41 = vsel %vm1093_vm2, %v15418_v55, 0.0 }
 0x4d6   : > { %v4934_v38 = vpop.xlane.xlu0 %4933  ;;  %v4937_v15 = vpop.xlane.xlu1 %4936  ;;  %5002 = vadd.xlane.f32.xlu1 %v5001_v41 }
 0x4d7   : > { %14139 = vpow2.f32 %v4982_v7  ;;  %v4960_v4 = vsub.f32 %v15322_v61, %v4934_v38  ;;  %v4961_v3 = vsub.f32 %v15362_v1, %v4937_v15 }
 0x4d8   : > { %v15424_v6 = vpop.eup %14129  ;;  %14141 = vpow2.f32 %v4984_v8 }
 0x4d9   : > { %v4986_v45 = vmul.f32 1.442695, %v4960_v4  ;;  %v4988_v20 = vmul.f32 1.442695, %v4961_v3  ;;  %v5007_v31 = vsel %vm1093_vm2, %v15424_v6, 0.0 }
 0x4da   : > { %v4940_v22 = vpop.xlane.xlu0 %4939  ;;  %v4943_v32 = vpop.xlane.xlu1 %4942  ;;  %5008 = vadd.xlane.f32.xlu1 %v5007_v31 }
 0x4db   : > { %14143 = vpow2.f32 %v4986_v45  ;;  %v4962_v60 = vsub.f32 %v15324_v28, %v4940_v22  ;;  %v4963_v12 = vsub.f32 %v15368_v27, %v4943_v32 }
 0x4dc   : > { %v15430_v0 = vpop.eup %14131  ;;  %14145 = vpow2.f32 %v4988_v20 }
 0x4dd   : > { %v15432_v61 = vpop.eup %14133  ;;  %v4990_v1 = vmul.f32 1.442695, %v4962_v60  ;;  %v4992_v24 = vmul.f32 1.442695, %v4963_v12  ;;  %v5010_v39 = vsel %vm1093_vm2, %v15430_v0, 0.0 }
 0x4de   : > { %5011 = vadd.xlane.f32.xlu0 %v5010_v39  ;;  %v4946_v23 = vpop.xlane.xlu0 %4945  ;;  %v5013_v16 = vsel %vm1093_vm2, %v15432_v61, 0.0  ;;  %v4949_v63 = vpop.xlane.xlu1 %4948 }
 0x4df   : > { %14147 = vpow2.f32 %v4990_v1  ;;  %v4964_v28 = vsub.f32 %v15326_v36, %v4946_v23  ;;  %5014 = vadd.xlane.f32.xlu1 %v5013_v16  ;;  %v4965_v27 = vsub.f32 %v15374_v46, %v4949_v63 }
 0x4e0   : > { %v15440_v7 = vpop.eup %14135  ;;  %14149 = vpow2.f32 %v4992_v24 }
 0x4e1   : > { %v15442_v8 = vpop.eup %14137  ;;  %v4994_v41 = vmul.f32 1.442695, %v4964_v28  ;;  %v5016_v38 = vsel %vm1093_vm2, %v15440_v7, 0.0  ;;  %v4996_v15 = vmul.f32 1.442695, %v4965_v27 }
 0x4e2   : > { %5017 = vadd.xlane.f32.xlu0 %v5016_v38  ;;  %v5019_v4 = vsel %vm1093_vm2, %v15442_v8, 0.0  ;;  %v5157_v3 = vpop.permute.xlu1 %5156  ;;  %v5234_v27 = vpop.permute.xlu0 %5233 }
 0x4e3   : > { %14151 = vpow2.f32 %v4994_v41  ;;  %5020 = vadd.xlane.f32.xlu1 %v5019_v4  ;;  %13544 = vmatpush3.msra.mxu1 %v5157_v3  ;;  %v16854_v4 = vld [vmem:[#allocation2_spill] sm:$0xff] }
 0x4e4   : > { %v15448_v36 = vpop.eup %14139  ;;  %13553 = vmatprep.subr.mxu1 %v16825_v2  ;;  %14153 = vpow2.f32 %v4996_v15  ;;  %v16853_v15 = vld [vmem:[#allocation6_spill] sm:$0xff] }
 0x4e5   : > { %v15451_v46 = vpop.eup %14141  ;;  %v5022_v45 = vsel %vm1093_vm2, %v15448_v36, 0.0 }
 0x4e6   : > { %5023 = vadd.xlane.f32.xlu0 %v5022_v45  ;;  %v5025_v20 = vsel %vm1093_vm2, %v15451_v46, 0.0  ;;  %v15483_v41 = vpop.permute.xlu0 %5310  ;;  %v16855_v45 = vld [vmem:[#allocation8_spill] sm:$0xff] }
 0x4e7   : > { %5026 = vadd.xlane.f32.xlu1 %v5025_v20  ;;  %v16856_v20 = vld [vmem:[#allocation7_spill] sm:$0xff] }
 0x4e8   : > { %v15457_v31 = vpop.eup %14143 }
 0x4e9   : > { %v15459_v22 = vpop.eup %14145  ;;  %v5028_v32 = vsel %vm1093_vm2, %v15457_v31, 0.0 }
 0x4ea   : > { %5029 = vadd.xlane.f32.xlu0 %v5028_v32  ;;  %v5031_v60 = vsel %vm1093_vm2, %v15459_v22, 0.0  ;;  %v5388_v38 = vpop.permute.xlu0 %5387 }
 0x4eb   : > { %5032 = vadd.xlane.f32.xlu1 %v5031_v60  ;;  %v16857_v60 = vld [vmem:[#allocation4_spill] sm:$0xff] }
 0x4ec   : > { %v15465_v12 = vpop.eup %14147 }
 0x4ed   : > { %v15467_v1 = vpop.eup %14149  ;;  %v5034_v24 = vsel %vm1093_vm2, %v15465_v12, 0.0 }
 0x4ee   : > { %5035 = vadd.xlane.f32.xlu0 %v5034_v24  ;;  %v5037_v39 = vsel %vm1093_vm2, %v15467_v1, 0.0  ;;  %v15497_v3 = vpop.permute.xlu0 %5464  ;;  %v16858_v24 = vld [vmem:[#allocation3_spill] sm:$0xff] }
 0x4ef   : > { %5038 = vadd.xlane.f32.xlu1 %v5037_v39  ;;  %v16859_v39 = vld [vmem:[#allocation10_spill] sm:$0xff] }
 0x4f0   : > { %v15473_v23 = vpop.eup %14151 }
 0x4f1   : > { %v5040_v16 = vsel %vm1093_vm2, %v15473_v23, 0.0  ;;  %v15477_v63 = vpop.eup %14153 }
 0x4f2   : > { %v5043_v28 = vsel %vm1093_vm2, %v15477_v63, 0.0  ;;  %v15503_v32 = vpop.permute.xlu0 %5541 }
 0x4f3   : > { %5041 = vadd.xlane.f32.xlu1 %v5040_v16  ;;  %v16860_v16 = vld [vmem:[#allocation9_spill] sm:$0xff] }
 0x4f7   : > { %5044 = vadd.xlane.f32.xlu1 %v5043_v28  ;;  %v15513_v28 = vpop.permute.xlu0 %5618 }
 0x504   : > { %6003 = vrot.lane.b32.xlu0 %v15133_v5, %s14325_s27 }
 0x508   : > { %5926 = vrot.lane.b32.xlu1 %v16835_v18, %s14325_s27  ;;  %6080 = vrot.lane.b32.xlu0 %v16836_v13, %s14325_s27 }
 0x50c   : > { %6776 = vrot.lane.b32.xlu1 %v16853_v15, %s14326_s13  ;;  %6157 = vrot.lane.b32.xlu0 %v15151_v14, %s14325_s27  ;;  %v15519_v15 = vpop.permute.xlu0 %5695 }
 0x510   : > { %6774 = vrot.lane.b32.xlu1 %v16854_v4, %s14326_s13  ;;  %6234 = vrot.lane.b32.xlu0 %v16837_v9, %s14325_s27  ;;  %v16862_v4 = vld [vmem:[#allocation5_spill] sm:$0xff] }
 0x514   : > { %6932 = vrot.lane.b32.xlu1 %v16855_v45, %s14326_s13  ;;  %6698 = vrot.lane.b32.xlu0 %v16856_v20, %s14326_s13  ;;  %v16861_v45 = vld [vmem:[#allocation13_spill] sm:$0xff] }
 0x518   : > { %6930 = vrot.lane.b32.xlu1 %v16857_v60, %s14326_s13  ;;  %6696 = vrot.lane.b32.xlu0 %v16858_v24, %s14326_s13  ;;  %v16863_v60 = vld [vmem:[#allocation11_spill] sm:$0xff] }
 0x51c   : > { %7088 = vrot.lane.b32.xlu1 %v16859_v39, %s14326_s13  ;;  %6854 = vrot.lane.b32.xlu0 %v16860_v16, %s14326_s13  ;;  %v16864_v39 = vld [vmem:[#allocation12_spill] sm:$0xff]  ;;  %v15529_v16 = vpop.permute.xlu0 %5772 }
 0x520   : > { %7086 = vrot.lane.b32.xlu1 %v16861_v45, %s14326_s13  ;;  %6852 = vrot.lane.b32.xlu0 %v16862_v4, %s14326_s13  ;;  %v15535_v45 = vpop.permute.xlu0 %5849 }
 0x524   : > { %7244 = vrot.lane.b32.xlu1 %v14694_v43, %s14326_s13  ;;  %7010 = vrot.lane.b32.xlu0 %v16863_v60, %s14326_s13 }
 0x528   : > { %7242 = vrot.lane.b32.xlu1 %v14714_v48, %s14326_s13  ;;  %7008 = vrot.lane.b32.xlu0 %v16864_v39, %s14326_s13 }
 0x52c   : > { %7400 = vrot.lane.b32.xlu1 %v14721_v49, %s14326_s13  ;;  %7166 = vrot.lane.b32.xlu0 %v14664_v35, %s14326_s13 }
 0x530   : > { %7398 = vrot.lane.b32.xlu1 %v14750_v52, %s14326_s13  ;;  %7164 = vrot.lane.b32.xlu0 %v14691_v42, %s14326_s13 }
 0x533   : > { %v5000_v48 = vpop.xlane.xlu0 %4999 }
 0x534   : > { %14155 = vrcp.f32 %v5000_v48  ;;  %7556 = vrot.lane.b32.xlu1 %v14742_v51, %s14326_s13  ;;  %7322 = vrot.lane.b32.xlu0 %v14637_v26, %s14326_s13 }
 0x537   : > { %v5006_v49 = vpop.xlane.xlu0 %5005 }
 0x538   : > { %14157 = vrcp.f32 %v5006_v49  ;;  %7554 = vrot.lane.b32.xlu1 %v14766_v54, %s14326_s13  ;;  %7320 = vrot.lane.b32.xlu0 %v14647_v30, %s14326_s13 }
 0x53c   : > { %7712 = vrot.lane.b32.xlu1 %v14758_v53, %s14326_s13  ;;  %7478 = vrot.lane.b32.xlu0 %v14656_v33, %s14326_s13 }
 0x540   : > { %7710 = vrot.lane.b32.xlu1 %v14780_v57, %s14326_s13  ;;  %7476 = vrot.lane.b32.xlu0 %v14672_v37, %s14326_s13 }
 0x541   : > { %v14156_v48 = vpop.eup %14155 }
 0x542   : > { %v5062_v49 = vmul.f32 %v14156_v48, %v15402_v11 }
 0x544   : > { %7868 = vrot.lane.b32.xlu1 %v14772_v56, %s14326_s13  ;;  %7634 = vrot.lane.b32.xlu0 %v14682_v40, %s14326_s13 }
 0x545   : > { %v14158_v54 = vpop.eup %14157  ;;  %13541 = vmatmul.mubr.msk.f32.vlgmr.msra.gmra.mxu0 %vm1093_vm2, %v5062_v49 }
 0x546   : > { %13549 = vmatpush3.msra.mxu0 %v5234_v27  ;;  %13550 = vmatprep.mubr.msk.f32.mxu0 %vm14324_vm1, %v16825_v2  ;;  %v5064_v57 = vmul.f32 %v14158_v54, %v15406_v34 }
 0x547   : > { %13558 = vmatprep.subr.mxu0 %v16825_v2 }
 0x548   : > { %7866 = vrot.lane.b32.xlu1 %v14791_v59, %s14326_s13  ;;  %7632 = vrot.lane.b32.xlu0 %v14702_v44, %s14326_s13 }
 0x549   : > { %13551 = vmatmul.mubr.msk.f32.vlgmr.msra.gmra.mxu0 %vm1093_vm2, %v5064_v57 }
 0x54a   : > { %13559 = vmatpush3.msra.mxu0 %v5388_v38  ;;  %13560 = vmatprep.mubr.msk.f32.mxu0 %vm14324_vm1, %v16825_v2 }
 0x54b   : > { %13568 = vmatprep.subr.mxu0 %v16825_v2 }
 0x54c   : > { %7790 = vrot.lane.b32.xlu0 %v14709_v47, %s14326_s13 }
 0x550   : > { %7788 = vrot.lane.b32.xlu0 %v14729_v50, %s14326_s13 }
 0x554   : > { %8196 = vrot.lane.b32.xlu0 %v16852_v29, %s14326_s13 }
 0x55f   : > { %v5003_v54 = vpop.xlane.xlu1 %5002 }
 0x560   : > { %14159 = vrcp.f32 %v5003_v54 }
 0x563   : > { %v5009_v11 = vpop.xlane.xlu1 %5008 }
 0x564   : > { %14161 = vrcp.f32 %v5009_v11 }
 0x567   : > { %v5012_v57 = vpop.xlane.xlu0 %5011 }
 0x568   : > { %14163 = vrcp.f32 %v5012_v57  ;;  %v5015_v34 = vpop.xlane.xlu1 %5014 }
 0x569   : > { %14165 = vrcp.f32 %v5015_v34 }
 0x56b   : > { %v5018_v27 = vpop.xlane.xlu0 %5017 }
 0x56c   : > { %14167 = vrcp.f32 %v5018_v27  ;;  %v5021_v38 = vpop.xlane.xlu1 %5020 }
 0x56d   : > { %v14160_v48 = vpop.eup %14159  ;;  %14169 = vrcp.f32 %v5021_v38 }
 0x56e   : > { %v5063_v49 = vmul.f32 %v14160_v48, %v15418_v55 }
 0x56f   : > { %v5024_v59 = vpop.xlane.xlu0 %5023 }
 0x570   : > { %14171 = vrcp.f32 %v5024_v59  ;;  %v5027_v56 = vpop.xlane.xlu1 %5026  ;;  %13546 = vmatmul.mubr.msk.f32.vlgmr.msra.gmra.mxu1 %vm1093_vm2, %v5063_v49 }
 0x571   : > { %v14162_v29 = vpop.eup %14161  ;;  %14173 = vrcp.f32 %v5027_v56  ;;  %13554 = vmatpush3.msra.mxu1 %v15483_v41  ;;  %13555 = vmatprep.mubr.msk.f32.mxu1 %vm14324_vm1, %v16825_v2 }
 0x572   : > { %13563 = vmatprep.subr.mxu1 %v16825_v2  ;;  %v5065_v54 = vmul.f32 %v14162_v29, %v15424_v6 }
 0x573   : > { %v5030_v11 = vpop.xlane.xlu0 %5029 }
 0x574   : > { %14175 = vrcp.f32 %v5030_v11  ;;  %v5033_v57 = vpop.xlane.xlu1 %5032  ;;  %13556 = vmatmul.mubr.msk.f32.vlgmr.msra.gmra.mxu1 %vm1093_vm2, %v5065_v54 }
 0x575   : > { %v14164_v59 = vpop.eup %14163  ;;  %14177 = vrcp.f32 %v5033_v57  ;;  %13564 = vmatpush3.msra.mxu1 %v15497_v3  ;;  %13565 = vmatprep.mubr.msk.f32.mxu1 %vm14324_vm1, %v16825_v2 }
 0x576   : > { %v14166_v56 = vpop.eup %14165  ;;  %13573 = vmatprep.subr.mxu1 %v16825_v2  ;;  %v5066_v55 = vmul.f32 %v14164_v59, %v15430_v0 }
 0x577   : > { %v5036_v41 = vpop.xlane.xlu0 %5035  ;;  %v5067_v29 = vmul.f32 %v14166_v56, %v15432_v61 }
 0x578   : > { %14179 = vrcp.f32 %v5036_v41  ;;  %v5039_v6 = vpop.xlane.xlu1 %5038  ;;  %13561 = vmatmul.mubr.msk.f32.vlgmr.msra.gmra.mxu0 %vm1093_vm2, %v5066_v55 }
 0x579   : > { %v14168_v34 = vpop.eup %14167  ;;  %14181 = vrcp.f32 %v5039_v6  ;;  %13566 = vmatmul.mubr.msk.f32.vlgmr.msra.gmra.mxu1 %vm1093_vm2, %v5067_v29  ;;  %13569 = vmatpush3.msra.mxu0 %v15503_v32  ;;  %v1090_v29 = vld [vmem:[%s16726_s9 + $0x8] sm:$0xff] }
 0x57a   : > { %v14170_v3 = vpop.eup %14169  ;;  %13574 = vmatpush3.msra.mxu1 %v15513_v28  ;;  %13570 = vmatprep.mubr.msk.f32.mxu0 %vm14324_vm1, %v16825_v2  ;;  %v5068_v0 = vmul.f32 %v14168_v34, %v15440_v7 }
 0x57b   : > { %13578 = vmatprep.subr.mxu0 %v16825_v2  ;;  %v6004_v61 = vpop.permute.xlu0 %6003  ;;  %13575 = vmatprep.mubr.msk.f32.mxu1 %vm14324_vm1, %v16825_v2  ;;  %v5069_v27 = vmul.f32 %v14170_v3, %v15442_v8 }
 0x57c   : > { %13583 = vmatprep.subr.mxu1 %v16825_v2  ;;  %v5042_v38 = vpop.xlane.xlu1 %5041  ;;  %13571 = vmatmul.mubr.msk.f32.vlgmr.msra.gmra.mxu0 %vm1093_vm2, %v5068_v0 }
 0x57d   : > { %v14172_v32 = vpop.eup %14171  ;;  %14183 = vrcp.f32 %v5042_v38  ;;  %13576 = vmatmul.mubr.msk.f32.vlgmr.msra.gmra.mxu1 %vm1093_vm2, %v5069_v27  ;;  %13579 = vmatpush3.msra.mxu0 %v15519_v15 }
 0x57e   : > { %v14174_v7 = vpop.eup %14173  ;;  %13584 = vmatpush3.msra.mxu1 %v15529_v16  ;;  %13580 = vmatprep.mubr.msk.f32.mxu0 %vm14324_vm1, %v16825_v2  ;;  %v5070_v28 = vmul.f32 %v14172_v32, %v15448_v36 }
 0x57f   : > { %13588 = vmatprep.subr.mxu0 %v16825_v2  ;;  %v6081_v8 = vpop.permute.xlu0 %6080  ;;  %13585 = vmatprep.mubr.msk.f32.mxu1 %vm14324_vm1, %v16825_v2  ;;  %v5071_v48 = vmul.f32 %v14174_v7, %v15451_v46 }
 0x580   : > { %v5045_v49 = vpop.xlane.xlu1 %5044  ;;  %13581 = vmatmul.mubr.msk.f32.vlgmr.msra.gmra.mxu0 %vm1093_vm2, %v5070_v28  ;;  %13593 = vmatprep.subr.mxu1 %v16825_v2  ;;  %v16866_v28 = vld [vmem:[#allocation35_spill] sm:$0xff] }
 0x581   : > { %v14176_v15 = vpop.eup %14175  ;;  %14185 = vrcp.f32 %v5045_v49  ;;  %13586 = vmatmul.mubr.msk.f32.vlgmr.msra.gmra.mxu1 %vm1093_vm2, %v5071_v48  ;;  %13589 = vmatpush3.msra.mxu0 %v15535_v45  ;;  %v16868_v48 = vld [vmem:[#allocation29_spill] sm:$0xff]  ;;  %v16869_v49 = vld [vmem:[#allocation30_spill] sm:$0xff] }
 0x582   : > { %v14178_v36 = vpop.eup %14177  ;;  %13590 = vmatprep.mubr.msk.f32.mxu0 %vm14324_vm1, %v16825_v2  ;;  %13598 = vmatprep.subr.mxu0 %v16825_v2  ;;  %v5072_v16 = vmul.f32 %v14176_v15, %v15457_v31 }
 0x583   : > { %v6158_v46 = vpop.permute.xlu0 %6157  ;;  %13595 = vmatprep.mubr.msk.f32.mxu1 %vm14324_vm1, %v16825_v2  ;;  %v5073_v54 = vmul.f32 %v14178_v36, %v15459_v22  ;;  %v16870_v36 = vld [vmem:[#allocation36_spill] sm:$0xff] }
 0x584   : > { %v5927_v11 = vpop.permute.xlu1 %5926  ;;  %13591 = vmatmul.mubr.msk.f32.vlgmr.msra.gmra.mxu0 %vm1093_vm2, %v5072_v16  ;;  %v16871_v16 = vld [vmem:[#allocation28_spill] sm:$0xff] }
 0x585   : > { %v14180_v57 = vpop.eup %14179  ;;  %13594 = vmatpush3.msra.mxu1 %v5927_v11  ;;  %13599 = vmatpush3.msra.mxu0 %v6004_v61  ;;  %v16872_v11 = vld [vmem:[#allocation32_spill] sm:$0xff] }
 0x586   : > { %v14182_v45 = vpop.eup %14181  ;;  %13596 = vmatmul.mubr.msk.f32.vlgmr.msra.gmra.mxu1 %vm1093_vm2, %v5073_v54  ;;  %13603 = vmatprep.subr.mxu1 %v16825_v2  ;;  %v5074_v59 = vmul.f32 %v14180_v57, %v15465_v12  ;;  %v1089_v12 = vld [vmem:[%s16726_s9] sm:$0xff] }
 0x587   : > { %13604 = vmatpush3.msra.mxu1 %v6081_v8  ;;  %13600 = vmatprep.mubr.msk.f32.mxu0 %vm14324_vm1, %v16825_v2  ;;  %v6235_v31 = vpop.permute.xlu0 %6234  ;;  %v5075_v22 = vmul.f32 %v14182_v45, %v15467_v1  ;;  %v16867_v8 = vld [vmem:[#allocation33_spill] sm:$0xff]  ;;  %v16873_v57 = vld [vmem:[#allocation34_spill] sm:$0xff] }
 0x588   : > { %13608 = vmatprep.subr.mxu0 %v16825_v2  ;;  %v6777_v56 = vpop.permute.xlu1 %6776  ;;  %13601 = vmatmul.mubr.msk.f32.vlgmr.msra.gmra.mxu0 %vm1093_vm2, %v5074_v59  ;;  %v16874_v59 = vld [vmem:[#allocation43_spill] sm:$0xff] }
 0x589   : > { %13605 = vmatprep.mubr.msk.f32.mxu1 %vm14324_vm1, %v16825_v2  ;;  %13609 = vmatpush3.msra.mxu0 %v6158_v46 }
 0x58a   : > { %v14184_v55 = vpop.eup %14183  ;;  %13613 = vmatprep.subr.mxu1 %v16825_v2  ;;  %13606 = vmatmul.mubr.msk.f32.vlgmr.msra.gmra.mxu1 %vm1093_vm2, %v5075_v22 }
 0x58b   : > { %13614 = vmatpush3.msra.mxu1 %v6235_v31  ;;  %13610 = vmatprep.mubr.msk.f32.mxu0 %vm14324_vm1, %v16825_v2  ;;  %v15647_v1 = vpop.permute.xlu0 %6698  ;;  %v5076_v41 = vmul.f32 %v14184_v55, %v15473_v23 }
 0x58c   : > { %v6775_v6 = vpop.permute.xlu1 %6774  ;;  %13615 = vmatprep.mubr.msk.f32.mxu1 %vm14324_vm1, %v16825_v2  ;;  %13644 = vmatprep.subr.mxu1 %v1089_v12 }
 0x58d   : > { %13611 = vmatmul.mubr.msk.f32.vlgmr.msra.gmra.mxu0 %vm1093_vm2, %v5076_v41  ;;  %13618 = vmatprep.subr.mxu0 %v1090_v29 }
 0x58e   : > { %v14186_v34 = vpop.eup %14185  ;;  %13619 = vmatpush3.msra.mxu0 %v1090_v29 }
 0x58f   : > { %v15656_v3 = vpop.permute.xlu0 %6696  ;;  %v5077_v0 = vmul.f32 %v14186_v34, %v15477_v63  ;;  %13670 = vmatprep.subr.mxu0 %v16825_v2 }
 0x590   : > { %v6933_v23 = vpop.permute.xlu1 %6932 }
 0x591   : > { %13616 = vmatmul.mubr.msk.f32.vlgmr.msra.gmra.mxu1 %vm1093_vm2, %v5077_v0 }
 0x592   : > { %13646 = vmatprep.mubr.msk.f32.mxu1 %vm1093_vm2, %v15284_v58  ;;  %13645 = vmatpush3.msra.mxu1 %v1089_v12 }
 0x593   : > { %v15663_v61 = vpop.permute.xlu0 %6854  ;;  %13675 = vmatprep.subr.mxu1 %v16825_v2 }
 0x594   : > { %v6931_v27 = vpop.permute.xlu1 %6930 }
 0x595   : > { %13647 = vmatmul.mubr.msk.f32.vlgmr.msra.gmra.mxu1 %vm1093_vm2, %v15286_v19  ;;  %v16865_v19 = vld [vmem:[#allocation31_spill] sm:$0xff] }
 0x596   : > { %13676 = vmatpush3.xpose.msk.msra.mxu1 %vm1093_vm2, %v6777_v56  ;;  %13649 = vmatprep.mubr.msk.f32.mxu1 %vm1093_vm2, %v15288_v10 }
 0x597   : > { %v15671_v63 = vpop.permute.xlu0 %6852  ;;  %13685 = vmatprep.subr.mxu1 %v16825_v2 }
 0x598   : > { %v7089_v38 = vpop.permute.xlu1 %7088 }
 0x599   : > { %13650 = vmatmul.mubr.msk.f32.gmra.mxu1 %vm1093_vm2, %v15290_v62 }
 0x59a   : > { %13652 = vmatprep.mubr.msk.f32.mxu1 %vm1093_vm2, %v15292_v25 }
 0x59b   : > { %v15678_v58 = vpop.permute.xlu0 %7010 }
 0x59c   : > { %v7087_v32 = vpop.permute.xlu1 %7086 }
 0x59d   : > { %13653 = vmatmul.mubr.msk.f32.gmra.mxu1 %vm1093_vm2, %v15294_v21 }
 0x59e   : > { %13655 = vmatprep.mubr.msk.f32.mxu1 %vm1093_vm2, %v16865_v19 }
 0x59f   : > { %v15684_v10 = vpop.permute.xlu0 %7008 }
 0x5a0   : > { %v7245_v7 = vpop.permute.xlu1 %7244 }
 0x5a1   : > { %13656 = vmatmul.mubr.msk.f32.gmra.mxu1 %vm1093_vm2, %v16866_v28 }
 0x5a2   : > { %13658 = vmatprep.mubr.msk.f32.mxu1 %vm1093_vm2, %v16867_v8 }
 0x5a3   : > { %v15690_v62 = vpop.permute.xlu0 %7166 }
 0x5a4   : > { %v7243_v25 = vpop.permute.xlu1 %7242 }
 0x5a5   : > { %13659 = vmatmul.mubr.msk.f32.gmra.mxu1 %vm1093_vm2, %v16868_v48 }
 0x5a6   : > { %13661 = vmatprep.mubr.msk.f32.mxu1 %vm1093_vm2, %v16869_v49 }
 0x5a7   : > { %v15696_v21 = vpop.permute.xlu0 %7164 }
 0x5a8   : > { %v7401_v15 = vpop.permute.xlu1 %7400 }
 0x5a9   : > { %13662 = vmatmul.mubr.msk.f32.gmra.mxu1 %vm1093_vm2, %v16870_v36 }
 0x5aa   : > { %13664 = vmatprep.mubr.msk.f32.mxu1 %vm1093_vm2, %v16871_v16 }
 0x5ab   : > { %v15702_v46 = vpop.permute.xlu0 %7322 }
 0x5ac   : > { %v7399_v54 = vpop.permute.xlu1 %7398 }
 0x5ad   : > { %13665 = vmatmul.mubr.msk.f32.gmra.mxu1 %vm1093_vm2, %v16872_v11 }
 0x5ae   : > { %13667 = vmatprep.mubr.msk.f32.mxu1 %vm1093_vm2, %v16873_v57 }
 0x5af   : > { %v15708_v45 = vpop.permute.xlu0 %7320 }
 0x5b0   : > { %v7557_v31 = vpop.permute.xlu1 %7556 }
 0x5b1   : > { %13668 = vmatmul.mubr.msk.f32.gmra.mxu1 %vm1093_vm2, %v16874_v59 }
 0x5b2   : > { %13677 = vmatprep.mubr.msk.f32.mxu1 %vm14324_vm1, %v16825_v2 }
 0x5b3   : > { %v15714_v22 = vpop.permute.xlu0 %7478 }
 0x5b4   : > { %v7555_v12 = vpop.permute.xlu1 %7554 }
 0x5b5   : > { %13678 = vmatmul.mubr.msk.f32.vlgmr.msra.gmra.mxu1 %vm1093_vm2, %v6775_v6 }
 0x5b6   : > { %13686 = vmatpush3.xpose.msk.msra.mxu1 %vm1093_vm2, %v6933_v23  ;;  %13687 = vmatprep.mubr.msk.f32.mxu1 %vm14324_vm1, %v16825_v2 }
 0x5b7   : > { %v15720_v56 = vpop.permute.xlu0 %7476  ;;  %13695 = vmatprep.subr.mxu1 %v16825_v2 }
 0x5b8   : > { %v7713_v41 = vpop.permute.xlu1 %7712 }
 0x5b9   : > { %13688 = vmatmul.mubr.msk.f32.vlgmr.msra.gmra.mxu1 %vm1093_vm2, %v6931_v27 }
 0x5ba   : > { %13696 = vmatpush3.xpose.msk.msra.mxu1 %vm1093_vm2, %v7089_v38  ;;  %13697 = vmatprep.mubr.msk.f32.mxu1 %vm14324_vm1, %v16825_v2 }
 0x5bb   : > { %v15727_v55 = vpop.permute.xlu0 %7634  ;;  %13705 = vmatprep.subr.mxu1 %v16825_v2 }
 0x5bc   : > { %v7711_v6 = vpop.permute.xlu1 %7710 }
 0x5bd   : > { %13698 = vmatmul.mubr.msk.f32.vlgmr.msra.gmra.mxu1 %vm1093_vm2, %v7087_v32 }
 0x5be   : > { %13706 = vmatpush3.xpose.msk.msra.mxu1 %vm1093_vm2, %v7245_v7  ;;  %13707 = vmatprep.mubr.msk.f32.mxu1 %vm14324_vm1, %v16825_v2 }
 0x5bf   : > { %v15734_v29 = vpop.permute.xlu0 %7632  ;;  %13715 = vmatprep.subr.mxu1 %v16825_v2 }
 0x5c0   : > { %v7869_v0 = vpop.permute.xlu1 %7868 }
 0x5c1   : > { %13708 = vmatmul.mubr.msk.f32.vlgmr.msra.gmra.mxu1 %vm1093_vm2, %v7243_v25 }
 0x5c2   : > { %13716 = vmatpush3.xpose.msk.msra.mxu1 %vm1093_vm2, %v7401_v15  ;;  %13717 = vmatprep.mubr.msk.f32.mxu1 %vm14324_vm1, %v16825_v2 }
 0x5c3   : > { %13725 = vmatprep.subr.mxu1 %v16825_v2  ;;  %v15742_v34 = vpop.permute.xlu0 %7790 }
 0x5c4   : > { %v7867_v27 = vpop.permute.xlu1 %7866 }
 0x5c5   : > { %13718 = vmatmul.mubr.msk.f32.vlgmr.msra.gmra.mxu1 %vm1093_vm2, %v7399_v54 }
 0x5c6   : > { %13726 = vmatpush3.xpose.msk.msra.mxu1 %vm1093_vm2, %v7557_v31  ;;  %13727 = vmatprep.mubr.msk.f32.mxu1 %vm14324_vm1, %v16825_v2 }
 0x5c7   : > { %13735 = vmatprep.subr.mxu1 %v16825_v2  ;;  %v15753_v23 = vpop.permute.xlu0 %7788 }
 0x5c9   : > { %13728 = vmatmul.mubr.msk.f32.vlgmr.msra.gmra.mxu1 %vm1093_vm2, %v7555_v12 }
 0x5ca   : > { %13736 = vmatpush3.xpose.msk.msra.mxu1 %vm1093_vm2, %v7713_v41  ;;  %13737 = vmatprep.mubr.msk.f32.mxu1 %vm14324_vm1, %v16825_v2 }
 0x5cb   : > { %13745 = vmatprep.subr.mxu1 %v16825_v2  ;;  %v8197_v38 = vpop.permute.xlu0 %8196 }
 0x5cd   : > { %13738 = vmatmul.mubr.msk.f32.vlgmr.msra.gmra.mxu1 %vm1093_vm2, %v7711_v6 }
 0x5ce   : > { %13746 = vmatpush3.xpose.msk.msra.mxu1 %vm1093_vm2, %v7869_v0  ;;  %13747 = vmatprep.mubr.msk.f32.mxu1 %vm14324_vm1, %v16825_v2 }
 0x5cf   : > { %13755 = vmatprep.subr.mxu1 %v16825_v2 }
 0x5d1   : > { %13748 = vmatmul.mubr.msk.f32.vlgmr.msra.gmra.mxu1 %vm1093_vm2, %v7867_v27 }
 0x5d2   : > { %13756 = vmatpush3.msra.mxu1 %v8197_v38  ;;  %13757 = vmatprep.mubr.msk.f32.mxu1 %vm14324_vm1, %v16825_v2 }
 0x5d3   : > { %13765 = vmatprep.subr.mxu1 %v16825_v2 }
 0x605   : > { %v5151_v32 = vpop.f32.mrf.mxu0 }
 0x606   : > { %13620 = vmatprep.mubr.msk.f32.mxu0 %vm1093_vm2, %v5151_v32 }
 0x607   : > { %v13542_v19 = vpop.f32.mrf.mxu0 }
 0x609   : > { %v5305_v7 = vpop.f32.mrf.mxu0 }
 0x60b   : > { %v13552_v28 = vpop.f32.mrf.mxu0 }
 0x630   : > { %v5228_v8 = vpop.f32.mrf.mxu1 }
 0x631   : > { %13621 = vmatmul.mubr.msk.f32.vlgmr.msra.gmra.mxu0 %vm1093_vm2, %v5228_v8 }
 0x632   : > { %13671 = vmatpush3.xpose.msk.msra.mxu0 %vm1093_vm2, %v15647_v1  ;;  %v13547_v25 = vpop.f32.mrf.mxu1  ;;  %13623 = vmatprep.mubr.msk.f32.mxu0 %vm1093_vm2, %v5305_v7 }
 0x633   : > { %13680 = vmatprep.subr.mxu0 %v16825_v2 }
 0x634   : > { %v5382_v48 = vpop.f32.mrf.mxu1 }
 0x635   : > { %13624 = vmatmul.mubr.msk.f32.gmra.mxu0 %vm1093_vm2, %v5382_v48 }
 0x636   : > { %v13557_v49 = vpop.f32.mrf.mxu1 }
 0x638   : > { %v5459_v15 = vpop.f32.mrf.mxu0 }
 0x639   : > { %v5536_v36 = vpop.f32.mrf.mxu1  ;;  %13626 = vmatprep.mubr.msk.f32.mxu0 %vm1093_vm2, %v5459_v15 }
 0x63a   : > { %v13562_v16 = vpop.f32.mrf.mxu0  ;;  %13627 = vmatmul.mubr.msk.f32.gmra.mxu0 %vm1093_vm2, %v5536_v36 }
 0x63b   : > { %v13567_v54 = vpop.f32.mrf.mxu1 }
 0x63c   : > { %v5613_v11 = vpop.f32.mrf.mxu0 }
 0x63d   : > { %v5690_v57 = vpop.f32.mrf.mxu1  ;;  %13629 = vmatprep.mubr.msk.f32.mxu0 %vm1093_vm2, %v5613_v11 }
 0x63e   : > { %v13572_v1 = vpop.f32.mrf.mxu0  ;;  %13630 = vmatmul.mubr.msk.f32.gmra.mxu0 %vm1093_vm2, %v5690_v57 }
 0x63f   : > { %v13577_v59 = vpop.f32.mrf.mxu1 }
 0x640   : > { %v5767_v31 = vpop.f32.mrf.mxu0 }
 0x641   : > { %v5844_v12 = vpop.f32.mrf.mxu1  ;;  %13632 = vmatprep.mubr.msk.f32.mxu0 %vm1093_vm2, %v5767_v31 }
 0x642   : > { %v13582_v41 = vpop.f32.mrf.mxu0  ;;  %13633 = vmatmul.mubr.msk.f32.gmra.mxu0 %vm1093_vm2, %v5844_v12 }
 0x643   : > { %v13587_v6 = vpop.f32.mrf.mxu1 }
 0x644   : > { %v5921_v0 = vpop.f32.mrf.mxu0 }
 0x645   : > { %13635 = vmatprep.mubr.msk.f32.mxu0 %vm1093_vm2, %v5921_v0 }
 0x646   : > { %v5998_v27 = vpop.f32.mrf.mxu1  ;;  %v13592_v38 = vpop.f32.mrf.mxu0 }
 0x647   : > { %13636 = vmatmul.mubr.msk.f32.gmra.mxu0 %vm1093_vm2, %v5998_v27 }
 0x648   : > { %v13597_v32 = vpop.f32.mrf.mxu1  ;;  %v6075_v19 = vpop.f32.mrf.mxu0 }
 0x649   : > { %13638 = vmatprep.mubr.msk.f32.mxu0 %vm1093_vm2, %v6075_v19 }
 0x64a   : > { %v6152_v7 = vpop.f32.mrf.mxu1  ;;  %v13602_v28 = vpop.f32.mrf.mxu0 }
 0x64b   : > { %13639 = vmatmul.mubr.msk.f32.gmra.mxu0 %vm1093_vm2, %v6152_v7  ;;  %v16886_v7 = vld [vmem:[#allocation21_spill] sm:$0xff] }
 0x64c   : > { %v13607_v8 = vpop.f32.mrf.mxu1 }
 0x64d   : > { %v6229_v25 = vpop.f32.mrf.mxu0 }
 0x64e   : > { %13641 = vmatprep.mubr.msk.f32.mxu0 %vm1093_vm2, %v6229_v25 }
 0x64f   : > { %v13612_v48 = vpop.f32.mrf.mxu0 }
 0x651   : > { %v6306_v49 = vpop.f32.mrf.mxu1 }
 0x652   : > { %13642 = vmatmul.mubr.msk.f32.gmra.mxu0 %vm1093_vm2, %v6306_v49 }
 0x653   : > { %v13617_v15 = vpop.f32.mrf.mxu1  ;;  %13672 = vmatprep.mubr.msk.f32.mxu0 %vm14324_vm1, %v16825_v2 }
 0x655   : > { %v15786_v36 = vpop.f32.mrf.mxu1 }
 0x656   : > { %13673 = vmatmul.mubr.msk.f32.vlgmr.msra.gmra.mxu0 %vm1093_vm2, %v15656_v3 }
 0x657   : > { %13681 = vmatpush3.xpose.msk.msra.mxu0 %vm1093_vm2, %v15663_v61  ;;  %v15792_v16 = vpop.f32.mrf.mxu1  ;;  %13682 = vmatprep.mubr.msk.f32.mxu0 %vm14324_vm1, %v16825_v2 }
 0x658   : > { %13690 = vmatprep.subr.mxu0 %v16825_v2 }
 0x659   : > { %v15797_v54 = vpop.f32.mrf.mxu1 }
 0x65a   : > { %13683 = vmatmul.mubr.msk.f32.vlgmr.msra.gmra.mxu0 %vm1093_vm2, %v15671_v63 }
 0x65b   : > { %13691 = vmatpush3.xpose.msk.msra.mxu0 %vm1093_vm2, %v15678_v58  ;;  %v15803_v11 = vpop.f32.mrf.mxu1  ;;  %13692 = vmatprep.mubr.msk.f32.mxu0 %vm14324_vm1, %v16825_v2 }
 0x65c   : > { %13700 = vmatprep.subr.mxu0 %v16825_v2 }
 0x65d   : > { %v15808_v3 = vpop.f32.mrf.mxu1 }
 0x65e   : > { %13693 = vmatmul.mubr.msk.f32.vlgmr.msra.gmra.mxu0 %vm1093_vm2, %v15684_v10 }
 0x65f   : > { %13701 = vmatpush3.xpose.msk.msra.mxu0 %vm1093_vm2, %v15690_v62  ;;  %v15814_v61 = vpop.f32.mrf.mxu1  ;;  %13702 = vmatprep.mubr.msk.f32.mxu0 %vm14324_vm1, %v16825_v2 }
 0x660   : > { %16875 = vst [vmem:[#allocation7_spill] sm:$0xff] %v15814_v61  ;;  %13710 = vmatprep.subr.mxu0 %v16825_v2 }
 0x661   : > { %v15819_v63 = vpop.f32.mrf.mxu1 }
 0x662   : > { %16876 = vst [vmem:[#allocation3_spill] sm:$0xff] %v15819_v63  ;;  %13703 = vmatmul.mubr.msk.f32.vlgmr.msra.gmra.mxu0 %vm1093_vm2, %v15696_v21 }
 0x663   : > { %13711 = vmatpush3.xpose.msk.msra.mxu0 %vm1093_vm2, %v15702_v46  ;;  %v15825_v58 = vpop.f32.mrf.mxu1  ;;  %13712 = vmatprep.mubr.msk.f32.mxu0 %vm14324_vm1, %v16825_v2 }
 0x664   : > { %16877 = vst [vmem:[#allocation5_spill] sm:$0xff] %v15825_v58  ;;  %13720 = vmatprep.subr.mxu0 %v16825_v2 }
 0x665   : > { %v15830_v10 = vpop.f32.mrf.mxu1 }
 0x666   : > { %16878 = vst [vmem:[#allocation11_spill] sm:$0xff] %v15830_v10  ;;  %13713 = vmatmul.mubr.msk.f32.vlgmr.msra.gmra.mxu0 %vm1093_vm2, %v15708_v45 }
 0x667   : > { %13721 = vmatpush3.xpose.msk.msra.mxu0 %vm1093_vm2, %v15714_v22  ;;  %v15836_v62 = vpop.f32.mrf.mxu1  ;;  %13722 = vmatprep.mubr.msk.f32.mxu0 %vm14324_vm1, %v16825_v2 }
 0x668   : > { %16879 = vst [vmem:[#allocation12_spill] sm:$0xff] %v15836_v62  ;;  %13730 = vmatprep.subr.mxu0 %v16825_v2 }
 0x669   : > { %v15841_v21 = vpop.f32.mrf.mxu1 }
 0x66a   : > { %16880 = vst [vmem:[#allocation31_spill] sm:$0xff] %v15841_v21  ;;  %13723 = vmatmul.mubr.msk.f32.vlgmr.msra.gmra.mxu0 %vm1093_vm2, %v15720_v56 }
 0x66b   : > { %13731 = vmatpush3.xpose.msk.msra.mxu0 %vm1093_vm2, %v15727_v55  ;;  %v15847_v46 = vpop.f32.mrf.mxu1  ;;  %13732 = vmatprep.mubr.msk.f32.mxu0 %vm14324_vm1, %v16825_v2 }
 0x66c   : > { %16881 = vst [vmem:[#allocation35_spill] sm:$0xff] %v15847_v46  ;;  %13740 = vmatprep.subr.mxu0 %v16825_v2 }
 0x66d   : > { %v15852_v45 = vpop.f32.mrf.mxu1 }
 0x66e   : > { %16882 = vst [vmem:[#allocation33_spill] sm:$0xff] %v15852_v45  ;;  %13733 = vmatmul.mubr.msk.f32.vlgmr.msra.gmra.mxu0 %vm1093_vm2, %v15734_v29 }
 0x66f   : > { %13741 = vmatpush3.xpose.msk.msra.mxu0 %vm1093_vm2, %v15742_v34  ;;  %v15858_v22 = vpop.f32.mrf.mxu1  ;;  %13742 = vmatprep.mubr.msk.f32.mxu0 %vm14324_vm1, %v16825_v2 }
 0x670   : > { %16883 = vst [vmem:[#allocation29_spill] sm:$0xff] %v15858_v22  ;;  %13750 = vmatprep.subr.mxu0 %v16825_v2 }
 0x671   : > { %v15863_v56 = vpop.f32.mrf.mxu1 }
 0x672   : > { %16884 = vst [vmem:[#allocation30_spill] sm:$0xff] %v15863_v56  ;;  %13743 = vmatmul.mubr.msk.f32.vlgmr.msra.gmra.mxu0 %vm1093_vm2, %v15753_v23 }
 0x673   : > { %v15867_v55 = vpop.f32.mrf.mxu1  ;;  %13752 = vmatprep.mubr.msk.f32.mxu0 %vm14324_vm1, %v16825_v2 }
 0x674   : > { %16885 = vst [vmem:[#allocation36_spill] sm:$0xff] %v15867_v55 }
 0x675   : > { %v6848_v29 = vpop.f32.mrf.mxu1 }
 0x676   : > { %v7947_v34 = vsel %vm1093_vm2, %v6848_v29, -inf }
 0x677   : > { %7948 = vmax.xlane.f32.xlu1 %v7947_v34  ;;  %v13679_v57 = vpop.f32.mrf.mxu1 }
 0x679   : > { %v7004_v1 = vpop.f32.mrf.mxu1 }
 0x67a   : > { %v7953_v59 = vsel %vm1093_vm2, %v7004_v1, -inf }
 0x67b   : > { %7954 = vmax.xlane.f32.xlu0 %v7953_v59  ;;  %v13689_v31 = vpop.f32.mrf.mxu1 }
 0x67d   : > { %v7160_v12 = vpop.f32.mrf.mxu1 }
 0x67e   : > { %v7959_v41 = vsel %vm1093_vm2, %v7160_v12, -inf }
 0x67f   : > { %7960 = vmax.xlane.f32.xlu0 %v7959_v41  ;;  %v13699_v23 = vpop.f32.mrf.mxu1 }
 0x681   : > { %v7316_v6 = vpop.f32.mrf.mxu1 }
 0x682   : > { %v7965_v0 = vsel %vm1093_vm2, %v7316_v6, -inf }
 0x683   : > { %7966 = vmax.xlane.f32.xlu0 %v7965_v0  ;;  %v13709_v27 = vpop.f32.mrf.mxu1 }
 0x685   : > { %v7472_v38 = vpop.f32.mrf.mxu1 }
 0x686   : > { %v7971_v32 = vsel %vm1093_vm2, %v7472_v38, -inf }
 0x687   : > { %7972 = vmax.xlane.f32.xlu0 %v7971_v32  ;;  %v13719_v19 = vpop.f32.mrf.mxu1 }
 0x688   : > { %8120 = vrot.lane.b32.xlu1 %v16886_v7, %s14326_s13 }
 0x689   : > { %v7628_v28 = vpop.f32.mrf.mxu1 }
 0x68a   : > { %v7977_v8 = vsel %vm1093_vm2, %v7628_v28, -inf }
 0x68b   : > { %7978 = vmax.xlane.f32.xlu0 %v7977_v8  ;;  %v13729_v25 = vpop.f32.mrf.mxu1 }
 0x68d   : > { %v15879_v48 = vpop.f32.mrf.mxu1 }
 0x68e   : > { %v7983_v49 = vsel %vm1093_vm2, %v15879_v48, -inf }
 0x68f   : > { %7984 = vmax.xlane.f32.xlu0 %v7983_v49  ;;  %v13739_v15 = vpop.f32.mrf.mxu1 }
 0x691   : > { %v15883_v34 = vpop.f32.mrf.mxu1 }
 0x692   : > { %v7989_v57 = vsel %vm1093_vm2, %v15883_v34, -inf }
 0x693   : > { %7990 = vmax.xlane.f32.xlu0 %v7989_v57  ;;  %v13749_v59 = vpop.f32.mrf.mxu1 }
 0x6f1   : > { %v15887_v31 = vpop.f32.mrf.mxu0 }
 0x6f3   : > { %v15889_v41 = vpop.f32.mrf.mxu0 }
 0x6f5   : > { %v15891_v23 = vpop.f32.mrf.mxu0 }
 0x6f7   : > { %v15893_v0 = vpop.f32.mrf.mxu0 }
 0x6fa   : > { %v15895_v27 = vpop.f32.mrf.mxu0 }
 0x6fc   : > { %v15897_v32 = vpop.f32.mrf.mxu0 }
 0x6fe   : > { %v15899_v19 = vpop.f32.mrf.mxu0 }
 0x6ff   : > { %16887 = vst [vmem:[#allocation28_spill] sm:$0xff] %v15899_v19 }
 0x700   : > { %v7949_v8 = vpop.xlane.xlu1 %7948  ;;  %v15901_v25 = vpop.f32.mrf.mxu0 }
 0x701   : > { %16888 = vst [vmem:[#allocation32_spill] sm:$0xff] %v15901_v25  ;;  %v7993_v49 = vsub.f32 %v6848_v29, %v7949_v8 }
 0x702   : > { %v15903_v15 = vpop.f32.mrf.mxu0 }
 0x703   : > { %16889 = vst [vmem:[#allocation34_spill] sm:$0xff] %v15903_v15  ;;  %v8010_v57 = vmul.f32 1.442695, %v7993_v49 }
 0x704   : > { %v8121_v59 = vpop.permute.xlu1 %8120  ;;  %v7955_v7 = vpop.xlane.xlu0 %7954 }
 0x705   : > { %14187 = vpow2.f32 %v8010_v57  ;;  %v7995_v55 = vsub.f32 %v7004_v1, %v7955_v7  ;;  %v15905_v56 = vpop.f32.mrf.mxu0  ;;  %13751 = vmatpush3.msra.mxu0 %v8121_v59 }
 0x706   : > { %16890 = vst [vmem:[#allocation43_spill] sm:$0xff] %v15905_v56  ;;  %13760 = vmatprep.subr.mxu0 %v16825_v2 }
 0x707   : > { %v8014_v22 = vmul.f32 1.442695, %v7995_v55  ;;  %v15908_v45 = vpop.f32.mrf.mxu0 }
 0x708   : > { %16891 = vst [vmem:[#allocation44_spill] sm:$0xff] %v15908_v45  ;;  %v7961_v46 = vpop.xlane.xlu0 %7960 }
 0x709   : > { %v15910_v21 = vpop.f32.mrf.mxu0  ;;  %14189 = vpow2.f32 %v8014_v22  ;;  %v7997_v29 = vsub.f32 %v7160_v12, %v7961_v46 }
 0x70a   : > { %16892 = vst [vmem:[#allocation45_spill] sm:$0xff] %v15910_v21 }
 0x70b   : > { %v15912_v8 = vpop.f32.mrf.mxu0  ;;  %v8018_v62 = vmul.f32 1.442695, %v7997_v29 }
 0x70c   : > { %16893 = vst [vmem:[#allocation46_spill] sm:$0xff] %v15912_v8  ;;  %v7967_v49 = vpop.xlane.xlu0 %7966 }
 0x70d   : > { %v7999_v10 = vsub.f32 %v7316_v6, %v7967_v49  ;;  %v15914_v57 = vpop.f32.mrf.mxu0  ;;  %14191 = vpow2.f32 %v8018_v62 }
 0x70e   : > { %16894 = vst [vmem:[#allocation47_spill] sm:$0xff] %v15914_v57 }
 0x70f   : > { %v8022_v55 = vmul.f32 1.442695, %v7999_v10 }
 0x710   : > { %v7973_v1 = vpop.xlane.xlu0 %7972 }
 0x711   : > { %v8001_v45 = vsub.f32 %v7472_v38, %v7973_v1  ;;  %14193 = vpow2.f32 %v8022_v55 }
 0x712   : > { %v15916_v7 = vpop.eup %14187  ;;  %v15918_v59 = vpop.f32.mrf.mxu0 }
 0x713   : > { %16895 = vst [vmem:[#allocation48_spill] sm:$0xff] %v15918_v59  ;;  %v8043_v21 = vsel %vm1093_vm2, %v15916_v7, 0.0  ;;  %v8026_v6 = vmul.f32 1.442695, %v8001_v45 }
 0x714   : > { %v15922_v22 = vpop.f32.mrf.mxu0  ;;  %v7979_v46 = vpop.xlane.xlu0 %7978  ;;  %8044 = vadd.xlane.f32.xlu0 %v8043_v21 }
 0x715   : > { %16896 = vst [vmem:[#allocation49_spill] sm:$0xff] %v15922_v22  ;;  %v8003_v12 = vsub.f32 %v7628_v28, %v7979_v46  ;;  %14195 = vpow2.f32 %v8026_v6 }
 0x716   : > { %v15924_v29 = vpop.f32.mrf.mxu0  ;;  %v15928_v57 = vpop.eup %14189 }
 0x717   : > { %v7944_v49 = vsel %vm1093_vm2, %v15924_v29, -inf  ;;  %v8030_v38 = vmul.f32 1.442695, %v8003_v12  ;;  %v8049_v21 = vsel %vm1093_vm2, %v15928_v57, 0.0 }
 0x718   : > { %v13674_v62 = vpop.f32.mrf.mxu0  ;;  %v7985_v10 = vpop.xlane.xlu0 %7984  ;;  %7945 = vmax.xlane.f32.xlu0 %v7944_v49 }
 0x719   : > { %v8005_v22 = vsub.f32 %v15879_v48, %v7985_v10  ;;  %14197 = vpow2.f32 %v8030_v38 }
 0x71a   : > { %v15930_v1 = vpop.f32.mrf.mxu0  ;;  %v15942_v49 = vpop.eup %14191 }
 0x71b   : > { %v8034_v46 = vmul.f32 1.442695, %v8005_v22  ;;  %v7950_v6 = vsel %vm1093_vm2, %v15930_v1, -inf }
 0x71c   : > { %v13684_v28 = vpop.f32.mrf.mxu0  ;;  %8050 = vadd.xlane.f32.xlu0 %v8049_v21  ;;  %v7991_v45 = vpop.xlane.xlu0 %7990 }
 0x71d   : > { %v8007_v62 = vsub.f32 %v15883_v34, %v7991_v45  ;;  %14199 = vpow2.f32 %v8034_v46  ;;  %v8055_v34 = vsel %vm1093_vm2, %v15942_v49, 0.0 }
 0x71e   : > { %v15935_v55 = vpop.f32.mrf.mxu0  ;;  %v15950_v21 = vpop.eup %14193 }
 0x71f   : > { %v7956_v12 = vsel %vm1093_vm2, %v15935_v55, -inf  ;;  %v8038_v38 = vmul.f32 1.442695, %v8007_v62  ;;  %v8061_v46 = vsel %vm1093_vm2, %v15950_v21, 0.0 }
 0x720   : > { %v13694_v48 = vpop.f32.mrf.mxu0  ;;  %7957 = vmax.xlane.f32.xlu1 %v7956_v12  ;;  %7951 = vmax.xlane.f32.xlu0 %v7950_v6 }
 0x721   : > { %14201 = vpow2.f32 %v8038_v38 }
 0x722   : > { %v15944_v10 = vpop.f32.mrf.mxu0  ;;  %v15958_v62 = vpop.eup %14195 }
 0x723   : > { %v7962_v22 = vsel %vm1093_vm2, %v15944_v10, -inf  ;;  %v8067_v38 = vsel %vm1093_vm2, %v15958_v62, 0.0 }
 0x724   : > { %v13704_v28 = vpop.f32.mrf.mxu0  ;;  %7963 = vmax.xlane.f32.xlu1 %v7962_v22  ;;  %8056 = vadd.xlane.f32.xlu0 %v8055_v34 }
 0x726   : > { %v15952_v45 = vpop.f32.mrf.mxu0  ;;  %v15962_v59 = vpop.eup %14197 }
 0x727   : > { %v7968_v12 = vsel %vm1093_vm2, %v15952_v45, -inf }
 0x728   : > { %v13714_v6 = vpop.f32.mrf.mxu0  ;;  %7969 = vmax.xlane.f32.xlu1 %v7968_v12  ;;  %8062 = vadd.xlane.f32.xlu0 %v8061_v46  ;;  %v8073_v12 = vsel %vm1093_vm2, %v15962_v59, 0.0 }
 0x72a   : > { %v15960_v48 = vpop.f32.mrf.mxu0  ;;  %v15974_v46 = vpop.eup %14199 }
 0x72b   : > { %v7974_v22 = vsel %vm1093_vm2, %v15960_v48, -inf }
 0x72c   : > { %v13724_v34 = vpop.f32.mrf.mxu0  ;;  %7975 = vmax.xlane.f32.xlu1 %v7974_v22  ;;  %8068 = vadd.xlane.f32.xlu0 %v8067_v38  ;;  %v8079_v22 = vsel %vm1093_vm2, %v15974_v46, 0.0 }
 0x72e   : > { %v15968_v28 = vpop.f32.mrf.mxu0  ;;  %v15982_v38 = vpop.eup %14201 }
 0x72f   : > { %v7980_v6 = vsel %vm1093_vm2, %v15968_v28, -inf  ;;  %v8085_v58 = vsel %vm1093_vm2, %v15982_v38, 0.0 }
 0x730   : > { %v13734_v8 = vpop.f32.mrf.mxu0  ;;  %7981 = vmax.xlane.f32.xlu1 %v7980_v6  ;;  %8074 = vadd.xlane.f32.xlu0 %v8073_v12  ;;  %v16898_v6 = vld [vmem:[#allocation22_spill] sm:$0xff] }
 0x731   : > { %v16897_v8 = vld [vmem:[#allocation37_spill] sm:$0xff]  ;;  %v16899_v12 = vld [vmem:[#allocation38_spill] sm:$0xff] }
 0x732   : > { %v15976_v56 = vpop.f32.mrf.mxu0 }
 0x733   : > { %v7986_v34 = vsel %vm1093_vm2, %v15976_v56, -inf }
 0x734   : > { %v13744_v15 = vpop.f32.mrf.mxu0  ;;  %7987 = vmax.xlane.f32.xlu1 %v7986_v34  ;;  %8080 = vadd.xlane.f32.xlu0 %v8079_v22  ;;  %v16901_v34 = vld [vmem:[#allocation39_spill] sm:$0xff]  ;;  %v16903_v22 = vld [vmem:[#allocation40_spill] sm:$0xff] }
 0x735   : > { %v16900_v15 = vld [vmem:[#allocation23_spill] sm:$0xff] }
 0x738   : > { %8086 = vadd.xlane.f32.xlu1 %v8085_v58  ;;  %v16902_v58 = vld [vmem:[#allocation24_spill] sm:$0xff] }
 0x749   : > { %8804 = vrot.lane.b32.xlu1 %v14829_v17, %s14326_s13  ;;  %v16904_v17 = vld [vmem:[#allocation41_spill] sm:$0xff] }
 0x74a   : > { %8272 = vrot.lane.b32.xlu0 %v16897_v8, %s14326_s13 }
 0x74e   : > { %8348 = vrot.lane.b32.xlu0 %v16898_v6, %s14326_s13 }
 0x752   : > { %8424 = vrot.lane.b32.xlu0 %v16899_v12, %s14326_s13 }
 0x756   : > { %8500 = vrot.lane.b32.xlu0 %v16900_v15, %s14326_s13 }
 0x75a   : > { %8576 = vrot.lane.b32.xlu0 %v16901_v34, %s14326_s13 }
 0x75e   : > { %8652 = vrot.lane.b32.xlu0 %v16902_v58, %s14326_s13 }
 0x762   : > { %8728 = vrot.lane.b32.xlu0 %v16903_v22, %s14326_s13 }
 0x766   : > { %8880 = vrot.lane.b32.xlu0 %v16904_v17, %s14326_s13 }
 0x76a   : > { %8956 = vrot.lane.b32.xlu0 %v16835_v18, %s14326_s13 }
 0x76e   : > { %9032 = vrot.lane.b32.xlu0 %v15133_v5, %s14326_s13 }
 0x772   : > { %9108 = vrot.lane.b32.xlu0 %v16836_v13, %s14326_s13 }
 0x79d   : > { %v8045_v15 = vpop.xlane.xlu0 %8044 }
 0x79e   : > { %14203 = vrcp.f32 %v8045_v15 }
 0x7a1   : > { %v7946_v34 = vpop.xlane.xlu0 %7945 }
 0x7a2   : > { %v7992_v58 = vsub.f32 %v15924_v29, %v7946_v34 }
 0x7a4   : > { %v8008_v12 = vmul.f32 1.442695, %v7992_v58 }
 0x7a5   : > { %v8051_v6 = vpop.xlane.xlu0 %8050 }
 0x7a6   : > { %14205 = vpow2.f32 %v8008_v12 }
 0x7a9   : > { %v7958_v22 = vpop.xlane.xlu1 %7957  ;;  %v7952_v8 = vpop.xlane.xlu0 %7951 }
 0x7aa   : > { %v7996_v17 = vsub.f32 %v15935_v55, %v7958_v22  ;;  %v7994_v18 = vsub.f32 %v15930_v1, %v7952_v8 }
 0x7ab   : > { %v14204_v25 = vpop.eup %14203 }
 0x7ac   : > { %v8105_v5 = vmul.f32 %v14204_v25, %v15916_v7  ;;  %v8012_v63 = vmul.f32 1.442695, %v7994_v18  ;;  %v8016_v19 = vmul.f32 1.442695, %v7996_v17 }
 0x7ad   : > { %v7964_v13 = vpop.xlane.xlu1 %7963  ;;  %v8057_v61 = vpop.xlane.xlu0 %8056 }
 0x7ae   : > { %v7998_v15 = vsub.f32 %v15944_v10, %v7964_v13  ;;  %13758 = vmatmul.mubr.msk.f32.vlgmr.msra.gmra.mxu1 %vm1093_vm2, %v8105_v5  ;;  %14207 = vpow2.f32 %v8012_v63 }
 0x7af   : > { %13767 = vmatprep.mubr.msk.f32.mxu1 %vm14324_vm1, %v16825_v2  ;;  %14209 = vpow2.f32 %v8016_v19 }
 0x7b0   : > { %v8020_v29 = vmul.f32 1.442695, %v7998_v15  ;;  %14211 = vrcp.f32 %v8051_v6 }
 0x7b1   : > { %v7970_v55 = vpop.xlane.xlu1 %7969  ;;  %v8063_v12 = vpop.xlane.xlu0 %8062 }
 0x7b2   : > { %v8000_v1 = vsub.f32 %v15952_v45, %v7970_v55  ;;  %14213 = vpow2.f32 %v8020_v29 }
 0x7b3   : > { %v16019_v8 = vpop.eup %14205 }
 0x7b4   : > { %v8040_v17 = vsel %vm1093_vm2, %v16019_v8, 0.0  ;;  %v8024_v18 = vmul.f32 1.442695, %v8000_v1 }
 0x7b5   : > { %v7976_v13 = vpop.xlane.xlu1 %7975  ;;  %8041 = vadd.xlane.f32.xlu1 %v8040_v17  ;;  %v8069_v5 = vpop.xlane.xlu0 %8068 }
 0x7b6   : > { %v8002_v63 = vsub.f32 %v15960_v48, %v7976_v13  ;;  %14215 = vpow2.f32 %v8024_v18 }
 0x7b7   : > { %14217 = vrcp.f32 %v8057_v61 }
 0x7b8   : > { %v8028_v19 = vmul.f32 1.442695, %v8002_v63 }
 0x7b9   : > { %v7982_v25 = vpop.xlane.xlu1 %7981  ;;  %v8075_v7 = vpop.xlane.xlu0 %8074 }
 0x7ba   : > { %v8004_v10 = vsub.f32 %v15968_v28, %v7982_v25  ;;  %14219 = vpow2.f32 %v8028_v19 }
 0x7bb   : > { %v16025_v45 = vpop.eup %14207 }
 0x7bc   : > { %v8032_v6 = vmul.f32 1.442695, %v8004_v10  ;;  %v8046_v58 = vsel %vm1093_vm2, %v16025_v45, 0.0  ;;  %v16029_v15 = vpop.eup %14209 }
 0x7bd   : > { %v7988_v34 = vpop.xlane.xlu1 %7987  ;;  %v8081_v22 = vpop.xlane.xlu0 %8080  ;;  %8047 = vadd.xlane.f32.xlu1 %v8046_v58  ;;  %v8052_v28 = vsel %vm1093_vm2, %v16029_v15, 0.0 }
 0x7be   : > { %v8006_v48 = vsub.f32 %v15976_v56, %v7988_v34  ;;  %v14212_v55 = vpop.eup %14211  ;;  %14221 = vpow2.f32 %v8032_v6 }
 0x7bf   : > { %v16036_v61 = vpop.eup %14213  ;;  %v8107_v17 = vmul.f32 %v14212_v55, %v15928_v57 }
 0x7c0   : > { %v8036_v29 = vmul.f32 1.442695, %v8006_v48  ;;  %v8058_v18 = vsel %vm1093_vm2, %v16036_v61, 0.0 }
 0x7c1   : > { %v16034_v1 = vpop.permute.xlu0 %8272  ;;  %8053 = vadd.xlane.f32.xlu1 %v8052_v28 }
 0x7c2   : > { %14223 = vpow2.f32 %v8036_v29 }
 0x7c3   : > { %14225 = vrcp.f32 %v8063_v12  ;;  %v16041_v13 = vpop.eup %14215 }
 0x7c4   : > { %v14218_v63 = vpop.eup %14217  ;;  %14227 = vrcp.f32 %v8069_v5  ;;  %v8064_v57 = vsel %vm1093_vm2, %v16041_v13, 0.0 }
 0x7c5   : > { %v8349_v56 = vpop.permute.xlu0 %8348  ;;  %8059 = vadd.xlane.f32.xlu1 %v8058_v18  ;;  %v8109_v25 = vmul.f32 %v14218_v63, %v15942_v49  ;;  %14229 = vrcp.f32 %v8075_v7  ;;  %v16066_v49 = vpop.xlane.xlu1 %8086 }
 0x7c6   : > { %13766 = vmatpush3.msra.mxu1 %v8349_v56  ;;  %14231 = vrcp.f32 %v8081_v22 }
 0x7c7   : > { %13768 = vmatmul.mubr.msk.f32.vlgmr.msra.gmra.mxu1 %vm1093_vm2, %v8107_v17  ;;  %13775 = vmatprep.subr.mxu1 %v16825_v2  ;;  %v16051_v19 = vpop.eup %14219 }
 0x7c8   : > { %13777 = vmatprep.mubr.msk.f32.mxu1 %vm14324_vm1, %v16825_v2  ;;  %v8070_v10 = vsel %vm1093_vm2, %v16051_v19, 0.0 }
 0x7c9   : > { %v16049_v12 = vpop.permute.xlu0 %8424  ;;  %8065 = vadd.xlane.f32.xlu1 %v8064_v57  ;;  %v8805_v56 = vpop.permute.xlu1 %8804 }
 0x7cb   : > { %v16056_v34 = vpop.eup %14221 }
 0x7cc   : > { %v8076_v48 = vsel %vm1093_vm2, %v16056_v34, 0.0 }
 0x7cd   : > { %v8501_v6 = vpop.permute.xlu0 %8500  ;;  %8071 = vadd.xlane.f32.xlu1 %v8070_v10 }
 0x7ce   : > { %13776 = vmatpush3.msra.mxu1 %v8501_v6 }
 0x7cf   : > { %v16058_v58 = vpop.eup %14223  ;;  %13778 = vmatmul.mubr.msk.f32.vlgmr.msra.gmra.mxu1 %vm1093_vm2, %v8109_v25  ;;  %13785 = vmatprep.subr.mxu1 %v16825_v2 }
 0x7d0   : > { %v8082_v5 = vsel %vm1093_vm2, %v16058_v58, 0.0  ;;  %13787 = vmatprep.mubr.msk.f32.mxu1 %vm14324_vm1, %v16825_v2  ;;  %v14226_v55 = vpop.eup %14225 }
 0x7d1   : > { %8083 = vadd.xlane.f32.xlu0 %v8082_v5  ;;  %v16070_v29 = vpop.permute.xlu0 %8576  ;;  %8077 = vadd.xlane.f32.xlu1 %v8076_v48  ;;  %v8111_v28 = vmul.f32 %v14226_v55, %v15950_v21  ;;  %v14228_v18 = vpop.eup %14227  ;;  %v16905_v5 = vld [vmem:[#allocation6_spill] sm:$0xff] }
 0x7d2   : > { %v8113_v7 = vmul.f32 %v14228_v18, %v15958_v62  ;;  %v14230_v57 = vpop.eup %14229  ;;  %v16907_v48 = vld [vmem:[#allocation2_spill] sm:$0xff] }
 0x7d3   : > { %v8115_v25 = vmul.f32 %v14230_v57, %v15962_v59  ;;  %v14232_v22 = vpop.eup %14231  ;;  %v16910_v55 = vld [vmem:[#allocation10_spill] sm:$0xff] }
 0x7d4   : > { %v8117_v6 = vmul.f32 %v14232_v22, %v15974_v46  ;;  %v16908_v46 = vld [vmem:[#allocation8_spill] sm:$0xff] }
 0x7d5   : > { %v8653_v17 = vpop.permute.xlu0 %8652 }
 0x7d6   : > { %13786 = vmatpush3.msra.mxu1 %v8653_v17 }
 0x7d7   : > { %13788 = vmatmul.mubr.msk.f32.vlgmr.msra.gmra.mxu1 %vm1093_vm2, %v8111_v28  ;;  %13795 = vmatprep.subr.mxu1 %v16825_v2  ;;  %v16911_v28 = vld [vmem:[#allocation13_spill] sm:$0xff] }
 0x7d8   : > { %13796 = vmatpush3.msra.mxu1 %v8805_v56  ;;  %13797 = vmatprep.mubr.msk.f32.mxu1 %vm14324_vm1, %v16825_v2 }
 0x7d9   : > { %v16078_v63 = vpop.permute.xlu0 %8728  ;;  %13805 = vmatprep.subr.mxu1 %v16825_v2 }
 0x7db   : > { %13798 = vmatmul.mubr.msk.f32.vlgmr.msra.gmra.mxu1 %vm1093_vm2, %v8113_v7 }
 0x7dc   : > { %13807 = vmatprep.mubr.msk.f32.mxu1 %vm14324_vm1, %v16825_v2 }
 0x7dd   : > { %v16084_v21 = vpop.permute.xlu0 %8880 }
 0x7e1   : > { %v8957_v10 = vpop.permute.xlu0 %8956 }
 0x7e2   : > { %13806 = vmatpush3.msra.mxu1 %v8957_v10  ;;  %9184 = vrot.lane.b32.xlu1 %v15151_v14, %s14326_s13 }
 0x7e3   : > { %13808 = vmatmul.mubr.msk.f32.vlgmr.msra.gmra.mxu1 %vm1093_vm2, %v8115_v25  ;;  %13815 = vmatprep.subr.mxu1 %v16825_v2 }
 0x7e4   : > { %13817 = vmatprep.mubr.msk.f32.mxu1 %vm14324_vm1, %v16825_v2 }
 0x7e5   : > { %v16093_v62 = vpop.permute.xlu0 %9032 }
 0x7e6   : > { %9547 = vrot.lane.b32.xlu1 %v16856_v20, %s14327_s19  ;;  %v16906_v20 = vld [vmem:[#allocation9_spill] sm:$0xff] }
 0x7e7   : > { %9260 = vrot.lane.b32.xlu0 %v16837_v9, %s14326_s13 }
 0x7e9   : > { %v9109_v59 = vpop.permute.xlu0 %9108 }
 0x7ea   : > { %13816 = vmatpush3.msra.mxu1 %v9109_v59  ;;  %9625 = vrot.lane.b32.xlu1 %v16905_v5, %s14327_s19 }
 0x7eb   : > { %9545 = vrot.lane.b32.xlu0 %v16858_v24, %s14327_s19  ;;  %13818 = vmatmul.mubr.msk.f32.vlgmr.msra.gmra.mxu1 %vm1093_vm2, %v8117_v6  ;;  %v16909_v24 = vld [vmem:[#allocation4_spill] sm:$0xff] }
 0x7ec   : > { %13825 = vmatprep.subr.mxu1 %v16825_v2  ;;  %13827 = vmatprep.mubr.msk.f32.mxu1 %vm14324_vm1, %v16825_v2 }
 0x7ee   : > { %9703 = vrot.lane.b32.xlu1 %v16906_v20, %s14327_s19 }
 0x7ef   : > { %9623 = vrot.lane.b32.xlu0 %v16907_v48, %s14327_s19 }
 0x7f2   : > { %9781 = vrot.lane.b32.xlu1 %v16908_v46, %s14327_s19 }
 0x7f3   : > { %9701 = vrot.lane.b32.xlu0 %v16862_v4, %s14327_s19  ;;  %v16912_v4 = vld [vmem:[#allocation14_spill] sm:$0xff] }
 0x7f6   : > { %9859 = vrot.lane.b32.xlu1 %v16863_v60, %s14327_s19 }
 0x7f7   : > { %9779 = vrot.lane.b32.xlu0 %v16909_v24, %s14327_s19 }
 0x7fa   : > { %9937 = vrot.lane.b32.xlu1 %v16910_v55, %s14327_s19 }
 0x7fb   : > { %9857 = vrot.lane.b32.xlu0 %v16864_v39, %s14327_s19 }
 0x7fe   : > { %10015 = vrot.lane.b32.xlu1 %v14664_v35, %s14327_s19  ;;  %v16913_v35 = vld [vmem:[#allocation15_spill] sm:$0xff] }
 0x7ff   : > { %9935 = vrot.lane.b32.xlu0 %v16911_v28, %s14327_s19 }
 0x802   : > { %10093 = vrot.lane.b32.xlu1 %v14694_v43, %s14327_s19 }
 0x803   : > { %10013 = vrot.lane.b32.xlu0 %v14691_v42, %s14327_s19 }
 0x806   : > { %10171 = vrot.lane.b32.xlu1 %v14637_v26, %s14327_s19  ;;  %v16914_v26 = vld [vmem:[#allocation16_spill] sm:$0xff] }
 0x807   : > { %10091 = vrot.lane.b32.xlu0 %v16912_v4, %s14327_s19 }
 0x80a   : > { %10169 = vrot.lane.b32.xlu1 %v14647_v30, %s14327_s19  ;;  %v16915_v30 = vld [vmem:[#allocation18_spill] sm:$0xff] }
 0x80b   : > { %10249 = vrot.lane.b32.xlu0 %v16913_v35, %s14327_s19 }
 0x80e   : > { %10327 = vrot.lane.b32.xlu1 %v14656_v33, %s14327_s19  ;;  %v16916_v33 = vld [vmem:[#allocation17_spill] sm:$0xff] }
 0x80f   : > { %10247 = vrot.lane.b32.xlu0 %v14750_v52, %s14327_s19 }
 0x812   : > { %10325 = vrot.lane.b32.xlu1 %v14672_v37, %s14327_s19  ;;  %v16917_v37 = vld [vmem:[#allocation19_spill] sm:$0xff] }
 0x813   : > { %10405 = vrot.lane.b32.xlu0 %v14742_v51, %s14327_s19 }
 0x816   : > { %10483 = vrot.lane.b32.xlu1 %v14682_v40, %s14327_s19 }
 0x817   : > { %10403 = vrot.lane.b32.xlu0 %v16914_v26, %s14327_s19 }
 0x81a   : > { %10481 = vrot.lane.b32.xlu1 %v14702_v44, %s14327_s19 }
 0x81b   : > { %10561 = vrot.lane.b32.xlu0 %v14758_v53, %s14327_s19 }
 0x81e   : > { %10639 = vrot.lane.b32.xlu1 %v14709_v47, %s14327_s19 }
 0x81f   : > { %10559 = vrot.lane.b32.xlu0 %v16915_v30, %s14327_s19 }
 0x822   : > { %10637 = vrot.lane.b32.xlu1 %v14729_v50, %s14327_s19 }
 0x823   : > { %10717 = vrot.lane.b32.xlu0 %v16916_v33, %s14327_s19 }
 0x827   : > { %10715 = vrot.lane.b32.xlu0 %v16917_v37, %s14327_s19 }
 0x83e   : > { %v8042_v40 = vpop.xlane.xlu1 %8041 }
 0x83f   : > { %14233 = vrcp.f32 %v8042_v40 }
 0x846   : > { %v8048_v42 = vpop.xlane.xlu1 %8047 }
 0x847   : > { %14235 = vrcp.f32 %v8048_v42 }
 0x84a   : > { %v8054_v43 = vpop.xlane.xlu1 %8053 }
 0x84b   : > { %14237 = vrcp.f32 %v8054_v43 }
 0x84c   : > { %v14234_v44 = vpop.eup %14233  ;;  %14239 = vrcp.f32 %v16066_v49 }
 0x84d   : > { %v8104_v47 = vmul.f32 %v14234_v44, %v16019_v8 }
 0x84e   : > { %v8060_v51 = vpop.xlane.xlu1 %8059 }
 0x84f   : > { %13753 = vmatmul.mubr.msk.f32.vlgmr.msra.gmra.mxu0 %vm1093_vm2, %v8104_v47  ;;  %14241 = vrcp.f32 %v8060_v51 }
 0x850   : > { %13761 = vmatpush3.msra.mxu0 %v16034_v1  ;;  %13762 = vmatprep.mubr.msk.f32.mxu0 %vm14324_vm1, %v16825_v2 }
 0x851   : > { %13770 = vmatprep.subr.mxu0 %v16825_v2 }
 0x852   : > { %v8066_v50 = vpop.xlane.xlu1 %8065 }
 0x853   : > { %14243 = vrcp.f32 %v8066_v50 }
 0x854   : > { %v14236_v52 = vpop.eup %14235 }
 0x855   : > { %v8106_v53 = vmul.f32 %v14236_v52, %v16025_v45 }
 0x856   : > { %v8072_v60 = vpop.xlane.xlu1 %8071 }
 0x857   : > { %14245 = vrcp.f32 %v8072_v60  ;;  %13763 = vmatmul.mubr.msk.f32.vlgmr.msra.gmra.mxu0 %vm1093_vm2, %v8106_v53 }
 0x858   : > { %v14238_v39 = vpop.eup %14237  ;;  %13771 = vmatpush3.msra.mxu0 %v16049_v12  ;;  %13772 = vmatprep.mubr.msk.f32.mxu0 %vm14324_vm1, %v16825_v2 }
 0x859   : > { %v8108_v8 = vmul.f32 %v14238_v39, %v16029_v15  ;;  %13780 = vmatprep.subr.mxu0 %v16825_v2  ;;  %v14240_v49 = vpop.eup %14239 }
 0x85a   : > { %v8084_v1 = vpop.xlane.xlu0 %8083  ;;  %v8078_v17 = vpop.xlane.xlu1 %8077  ;;  %v8119_v12 = vmul.f32 %v14240_v49, %v15982_v38 }
 0x85b   : > { %14247 = vrcp.f32 %v8078_v17  ;;  %13773 = vmatmul.mubr.msk.f32.vlgmr.msra.gmra.mxu0 %vm1093_vm2, %v8108_v8 }
 0x85c   : > { %v14242_v45 = vpop.eup %14241  ;;  %13781 = vmatpush3.msra.mxu0 %v16070_v29  ;;  %13782 = vmatprep.mubr.msk.f32.mxu0 %vm14324_vm1, %v16825_v2  ;;  %14249 = vrcp.f32 %v8084_v1 }
 0x85d   : > { %v8110_v18 = vmul.f32 %v14242_v45, %v16036_v61  ;;  %13790 = vmatprep.subr.mxu0 %v16825_v2 }
 0x85e   : > { %v9261_v15 = vpop.permute.xlu0 %9260  ;;  %v9185_v56 = vpop.permute.xlu1 %9184 }
 0x85f   : > { %13826 = vmatpush3.msra.mxu1 %v9261_v15  ;;  %13783 = vmatmul.mubr.msk.f32.vlgmr.msra.gmra.mxu0 %vm1093_vm2, %v8110_v18 }
 0x860   : > { %13828 = vmatmul.mubr.msk.f32.vlgmr.msra.gmra.mxu1 %vm1093_vm2, %v8119_v12  ;;  %v14244_v7 = vpop.eup %14243  ;;  %13791 = vmatpush3.msra.mxu0 %v16078_v63 }
 0x861   : > { %13792 = vmatprep.mubr.msk.f32.mxu0 %vm14324_vm1, %v16825_v2  ;;  %v8112_v38 = vmul.f32 %v14244_v7, %v16041_v13  ;;  %13800 = vmatprep.subr.mxu0 %v16825_v2 }
 0x862   : > { %13856 = vmatprep.subr.mxu1 %v16825_v2  ;;  %v9546_v61 = vpop.permute.xlu0 %9545  ;;  %v9548_v29 = vpop.permute.xlu1 %9547  ;;  %13858 = vmatprep.mubr.msk.f32.mxu1 %vm14324_vm1, %v16825_v2 }
 0x863   : > { %13793 = vmatmul.mubr.msk.f32.vlgmr.msra.gmra.mxu0 %vm1093_vm2, %v8112_v38  ;;  %13857 = vmatpush3.xpose.msk.msra.mxu1 %vm1093_vm2, %v9548_v29 }
 0x864   : > { %v14246_v57 = vpop.eup %14245  ;;  %13801 = vmatpush3.msra.mxu0 %v16084_v21  ;;  %13802 = vmatprep.mubr.msk.f32.mxu0 %vm14324_vm1, %v16825_v2 }
 0x865   : > { %v8114_v13 = vmul.f32 %v14246_v57, %v16051_v19  ;;  %13810 = vmatprep.subr.mxu0 %v16825_v2  ;;  %13861 = vmatprep.subr.mxu1 %v16825_v2 }
 0x866   : > { %v9624_v63 = vpop.permute.xlu0 %9623  ;;  %v9626_v25 = vpop.permute.xlu1 %9625  ;;  %13859 = vmatmul.mubr.msk.f32.vlgmr.msra.gmra.mxu1 %vm1093_vm2, %v9546_v61 }
 0x867   : > { %13803 = vmatmul.mubr.msk.f32.vlgmr.msra.gmra.mxu0 %vm1093_vm2, %v8114_v13  ;;  %13862 = vmatpush3.xpose.msk.msra.mxu1 %vm1093_vm2, %v9626_v25 }
 0x868   : > { %v14248_v10 = vpop.eup %14247  ;;  %13811 = vmatpush3.msra.mxu0 %v16093_v62  ;;  %13863 = vmatprep.mubr.msk.f32.mxu1 %vm14324_vm1, %v16825_v2 }
 0x869   : > { %v8116_v19 = vmul.f32 %v14248_v10, %v16056_v34  ;;  %13812 = vmatprep.mubr.msk.f32.mxu0 %vm14324_vm1, %v16825_v2  ;;  %13820 = vmatprep.subr.mxu0 %v16825_v2  ;;  %v14250_v22 = vpop.eup %14249  ;;  %v1091_v34 = vld [vmem:[%s16726_s9 + $0x10] sm:$0xff] }
 0x86a   : > { %v9702_v21 = vpop.permute.xlu0 %9701  ;;  %v9704_v59 = vpop.permute.xlu1 %9703  ;;  %13864 = vmatmul.mubr.msk.f32.vlgmr.msra.gmra.mxu1 %vm1093_vm2, %v9624_v63  ;;  %13866 = vmatprep.subr.mxu1 %v16825_v2  ;;  %v8118_v62 = vmul.f32 %v14250_v22, %v16058_v58 }
 0x86b   : > { %13813 = vmatmul.mubr.msk.f32.vlgmr.msra.gmra.mxu0 %vm1093_vm2, %v8116_v19  ;;  %13867 = vmatpush3.xpose.msk.msra.mxu1 %vm1093_vm2, %v9704_v59 }
 0x86c   : > { %13821 = vmatpush3.msra.mxu0 %v9185_v56  ;;  %13868 = vmatprep.mubr.msk.f32.mxu1 %vm14324_vm1, %v16825_v2 }
 0x86d   : > { %13822 = vmatprep.mubr.msk.f32.mxu0 %vm14324_vm1, %v16825_v2  ;;  %13871 = vmatprep.subr.mxu1 %v16825_v2 }
 0x86e   : > { %v9780_v6 = vpop.permute.xlu0 %9779  ;;  %v16228_v5 = vpop.f32.mrf.mxu1  ;;  %13869 = vmatmul.mubr.msk.f32.vlgmr.msra.gmra.mxu1 %vm1093_vm2, %v9702_v21  ;;  %13830 = vmatprep.subr.mxu0 %v1091_v34 }
 0x86f   : > { %v9782_v20 = vpop.permute.xlu1 %9781  ;;  %13823 = vmatmul.mubr.msk.f32.vlgmr.msra.gmra.mxu0 %vm1093_vm2, %v8118_v62  ;;  %13873 = vmatprep.mubr.msk.f32.mxu1 %vm14324_vm1, %v16825_v2 }
 0x870   : > { %13872 = vmatpush3.xpose.msk.msra.mxu1 %vm1093_vm2, %v9782_v20  ;;  %v13759_v48 = vpop.f32.mrf.mxu1  ;;  %13831 = vmatpush3.msra.mxu0 %v1091_v34 }
 0x871   : > { %13876 = vmatprep.subr.mxu1 %v16825_v2  ;;  %13896 = vmatprep.subr.mxu0 %v16825_v2 }
 0x872   : > { %v9858_v58 = vpop.permute.xlu0 %9857 }
 0x873   : > { %v9860_v46 = vpop.permute.xlu1 %9859  ;;  %13874 = vmatmul.mubr.msk.f32.vlgmr.msra.gmra.mxu1 %vm1093_vm2, %v9780_v6 }
 0x874   : > { %13877 = vmatpush3.xpose.msk.msra.mxu1 %vm1093_vm2, %v9860_v46  ;;  %13878 = vmatprep.mubr.msk.f32.mxu1 %vm14324_vm1, %v16825_v2 }
 0x875   : > { %13881 = vmatprep.subr.mxu1 %v16825_v2 }
 0x876   : > { %v9936_v24 = vpop.permute.xlu0 %9935 }
 0x877   : > { %v9938_v55 = vpop.permute.xlu1 %9937  ;;  %13879 = vmatmul.mubr.msk.f32.vlgmr.msra.gmra.mxu1 %vm1093_vm2, %v9858_v58 }
 0x878   : > { %13882 = vmatpush3.xpose.msk.msra.mxu1 %vm1093_vm2, %v9938_v55  ;;  %13883 = vmatprep.mubr.msk.f32.mxu1 %vm14324_vm1, %v16825_v2 }
 0x879   : > { %13886 = vmatprep.subr.mxu1 %v16825_v2 }
 0x87a   : > { %v10014_v28 = vpop.permute.xlu0 %10013 }
 0x87b   : > { %v10016_v4 = vpop.permute.xlu1 %10015  ;;  %13884 = vmatmul.mubr.msk.f32.vlgmr.msra.gmra.mxu1 %vm1093_vm2, %v9936_v24 }
 0x87c   : > { %13887 = vmatpush3.xpose.msk.msra.mxu1 %vm1093_vm2, %v10016_v4  ;;  %13888 = vmatprep.mubr.msk.f32.mxu1 %vm14324_vm1, %v16825_v2 }
 0x87d   : > { %13891 = vmatprep.subr.mxu1 %v16825_v2 }
 0x87e   : > { %v10092_v35 = vpop.permute.xlu0 %10091 }
 0x87f   : > { %v10094_v26 = vpop.permute.xlu1 %10093  ;;  %13889 = vmatmul.mubr.msk.f32.vlgmr.msra.gmra.mxu1 %vm1093_vm2, %v10014_v28 }
 0x880   : > { %13892 = vmatpush3.xpose.msk.msra.mxu1 %vm1093_vm2, %v10094_v26  ;;  %13893 = vmatprep.mubr.msk.f32.mxu1 %vm14324_vm1, %v16825_v2 }
 0x881   : > { %13901 = vmatprep.subr.mxu1 %v16825_v2 }
 0x882   : > { %v10250_v30 = vpop.permute.xlu0 %10249 }
 0x883   : > { %13894 = vmatmul.mubr.msk.f32.vlgmr.msra.gmra.mxu1 %vm1093_vm2, %v10092_v35  ;;  %v10172_v15 = vpop.permute.xlu1 %10171 }
 0x884   : > { %13902 = vmatpush3.xpose.msk.msra.mxu1 %vm1093_vm2, %v10250_v30  ;;  %13903 = vmatprep.mubr.msk.f32.mxu1 %vm14324_vm1, %v16825_v2 }
 0x885   : > { %13911 = vmatprep.subr.mxu1 %v16825_v2 }
 0x886   : > { %v10248_v33 = vpop.permute.xlu0 %10247 }
 0x887   : > { %v8420_v37 = vpop.f32.mrf.mxu1  ;;  %13904 = vmatmul.mubr.msk.f32.vlgmr.msra.gmra.mxu1 %vm1093_vm2, %v10248_v33  ;;  %v10170_v29 = vpop.permute.xlu1 %10169 }
 0x888   : > { %13913 = vmatprep.mubr.msk.f32.mxu1 %vm14324_vm1, %v16825_v2 }
 0x889   : > { %v13769_v40 = vpop.f32.mrf.mxu1 }
 0x88a   : > { %v10406_v42 = vpop.permute.xlu0 %10405 }
 0x88b   : > { %13912 = vmatpush3.xpose.msk.msra.mxu1 %vm1093_vm2, %v10406_v42  ;;  %v10328_v19 = vpop.permute.xlu1 %10327 }
 0x88c   : > { %13921 = vmatprep.subr.mxu1 %v16825_v2 }
 0x88e   : > { %v10404_v43 = vpop.permute.xlu0 %10403 }
 0x88f   : > { %v8572_v44 = vpop.f32.mrf.mxu1  ;;  %13914 = vmatmul.mubr.msk.f32.vlgmr.msra.gmra.mxu1 %vm1093_vm2, %v10404_v43  ;;  %v10326_v6 = vpop.permute.xlu1 %10325 }
 0x890   : > { %13923 = vmatprep.mubr.msk.f32.mxu1 %vm14324_vm1, %v16825_v2 }
 0x891   : > { %v13779_v47 = vpop.f32.mrf.mxu1 }
 0x892   : > { %v10562_v51 = vpop.permute.xlu0 %10561 }
 0x893   : > { %13922 = vmatpush3.xpose.msk.msra.mxu1 %vm1093_vm2, %v10562_v51  ;;  %v10484_v28 = vpop.permute.xlu1 %10483 }
 0x894   : > { %13931 = vmatprep.subr.mxu1 %v16825_v2 }
 0x896   : > { %v10560_v50 = vpop.permute.xlu0 %10559 }
 0x897   : > { %v8724_v52 = vpop.f32.mrf.mxu1  ;;  %13924 = vmatmul.mubr.msk.f32.vlgmr.msra.gmra.mxu1 %vm1093_vm2, %v10560_v50  ;;  %v10482_v42 = vpop.permute.xlu1 %10481 }
 0x898   : > { %13933 = vmatprep.mubr.msk.f32.mxu1 %vm14324_vm1, %v16825_v2 }
 0x899   : > { %v13789_v53 = vpop.f32.mrf.mxu1 }
 0x89a   : > { %v10718_v60 = vpop.permute.xlu0 %10717 }
 0x89b   : > { %v8876_v39 = vpop.f32.mrf.mxu1  ;;  %13932 = vmatpush3.xpose.msk.msra.mxu1 %vm1093_vm2, %v10718_v60  ;;  %v10640_v50 = vpop.permute.xlu1 %10639 }
 0x89c   : > { %13941 = vmatprep.subr.mxu1 %v16825_v2 }
 0x89d   : > { %v13799_v8 = vpop.f32.mrf.mxu1 }
 0x89e   : > { %v10716_v1 = vpop.permute.xlu0 %10715 }
 0x89f   : > { %13934 = vmatmul.mubr.msk.f32.vlgmr.msra.gmra.mxu1 %vm1093_vm2, %v10716_v1  ;;  %v10638_v1 = vpop.permute.xlu1 %10637 }
 0x8a0   : > { %13943 = vmatprep.mubr.msk.f32.mxu1 %vm14324_vm1, %v16825_v2 }
 0x8a3   : > { %v9028_v49 = vpop.f32.mrf.mxu1 }
 0x8a5   : > { %v13809_v17 = vpop.f32.mrf.mxu1 }
 0x8ab   : > { %v9180_v45 = vpop.f32.mrf.mxu1 }
 0x8ad   : > { %v13819_v12 = vpop.f32.mrf.mxu1 }
 0x90f   : > { %v8192_v18 = vpop.f32.mrf.mxu0 }
 0x910   : > { %13832 = vmatprep.mubr.msk.f32.mxu0 %vm1093_vm2, %v8192_v18 }
 0x911   : > { %v13754_v56 = vpop.f32.mrf.mxu0  ;;  %13833 = vmatmul.mubr.msk.f32.vlgmr.msra.gmra.mxu0 %vm1093_vm2, %v16228_v5 }
 0x912   : > { %13897 = vmatpush3.xpose.msk.msra.mxu0 %vm1093_vm2, %v10172_v15 }
 0x913   : > { %13906 = vmatprep.subr.mxu0 %v16825_v2 }
 0x917   : > { %v8344_v7 = vpop.f32.mrf.mxu0 }
 0x918   : > { %13835 = vmatprep.mubr.msk.f32.mxu0 %vm1093_vm2, %v8344_v7 }
 0x919   : > { %v13764_v38 = vpop.f32.mrf.mxu0  ;;  %13836 = vmatmul.mubr.msk.f32.gmra.mxu0 %vm1093_vm2, %v8420_v37 }
 0x91b   : > { %v8496_v61 = vpop.f32.mrf.mxu0 }
 0x91c   : > { %13838 = vmatprep.mubr.msk.f32.mxu0 %vm1093_vm2, %v8496_v61 }
 0x91d   : > { %v13774_v57 = vpop.f32.mrf.mxu0  ;;  %13839 = vmatmul.mubr.msk.f32.gmra.mxu0 %vm1093_vm2, %v8572_v44 }
 0x91f   : > { %v8648_v13 = vpop.f32.mrf.mxu0 }
 0x920   : > { %v9332_v63 = vpop.f32.mrf.mxu1  ;;  %13841 = vmatprep.mubr.msk.f32.mxu0 %vm1093_vm2, %v8648_v13 }
 0x921   : > { %v13784_v25 = vpop.f32.mrf.mxu0  ;;  %13842 = vmatmul.mubr.msk.f32.gmra.mxu0 %vm1093_vm2, %v8724_v52 }
 0x922   : > { %v13829_v10 = vpop.f32.mrf.mxu1 }
 0x923   : > { %v8800_v21 = vpop.f32.mrf.mxu0 }
 0x924   : > { %13844 = vmatprep.mubr.msk.f32.mxu0 %vm1093_vm2, %v8800_v21 }
 0x925   : > { %v13794_v22 = vpop.f32.mrf.mxu0  ;;  %13845 = vmatmul.mubr.msk.f32.gmra.mxu0 %vm1093_vm2, %v8876_v39 }
 0x926   : > { %v16293_v59 = vpop.f32.mrf.mxu1 }
 0x927   : > { %v8952_v34 = vpop.f32.mrf.mxu0  ;;  %v10793_v62 = vsel %vm1093_vm2, %v16293_v59, -inf }
 0x928   : > { %13847 = vmatprep.mubr.msk.f32.mxu0 %vm1093_vm2, %v8952_v34  ;;  %10794 = vmax.xlane.f32.xlu1 %v10793_v62  ;;  %v13860_v5 = vpop.f32.mrf.mxu1 }
 0x929   : > { %v13804_v20 = vpop.f32.mrf.mxu0  ;;  %13848 = vmatmul.mubr.msk.f32.gmra.mxu0 %vm1093_vm2, %v9028_v49 }
 0x92a   : > { %v16299_v48 = vpop.f32.mrf.mxu1 }
 0x92b   : > { %v9104_v58 = vpop.f32.mrf.mxu0  ;;  %v10796_v46 = vsel %vm1093_vm2, %v16299_v48, -inf }
 0x92c   : > { %13850 = vmatprep.mubr.msk.f32.mxu0 %vm1093_vm2, %v9104_v58  ;;  %10797 = vmax.xlane.f32.xlu0 %v10796_v46  ;;  %v13865_v24 = vpop.f32.mrf.mxu1 }
 0x92d   : > { %v13814_v55 = vpop.f32.mrf.mxu0  ;;  %13851 = vmatmul.mubr.msk.f32.gmra.mxu0 %vm1093_vm2, %v9180_v45 }
 0x92e   : > { %v16305_v4 = vpop.f32.mrf.mxu1 }
 0x92f   : > { %v9256_v35 = vpop.f32.mrf.mxu0  ;;  %v10799_v26 = vsel %vm1093_vm2, %v16305_v4, -inf }
 0x930   : > { %13853 = vmatprep.mubr.msk.f32.mxu0 %vm1093_vm2, %v9256_v35  ;;  %10800 = vmax.xlane.f32.xlu0 %v10799_v26  ;;  %v13870_v30 = vpop.f32.mrf.mxu1 }
 0x931   : > { %v13824_v33 = vpop.f32.mrf.mxu0  ;;  %13854 = vmatmul.mubr.msk.f32.gmra.mxu0 %vm1093_vm2, %v9332_v63 }
 0x932   : > { %13898 = vmatprep.mubr.msk.f32.mxu0 %vm14324_vm1, %v16825_v2 }
 0x933   : > { %v16311_v37 = vpop.f32.mrf.mxu1 }
 0x934   : > { %v10802_v40 = vsel %vm1093_vm2, %v16311_v37, -inf }
 0x935   : > { %10803 = vmax.xlane.f32.xlu1 %v10802_v40  ;;  %v13875_v43 = vpop.f32.mrf.mxu1  ;;  %13899 = vmatmul.mubr.msk.f32.vlgmr.msra.gmra.mxu0 %vm1093_vm2, %v10170_v29 }
 0x936   : > { %13907 = vmatpush3.xpose.msk.msra.mxu0 %vm1093_vm2, %v10328_v19  ;;  %13908 = vmatprep.mubr.msk.f32.mxu0 %vm14324_vm1, %v16825_v2 }
 0x937   : > { %v16319_v44 = vpop.f32.mrf.mxu1  ;;  %13916 = vmatprep.subr.mxu0 %v16825_v2 }
 0x938   : > { %v10805_v47 = vsel %vm1093_vm2, %v16319_v44, -inf }
 0x939   : > { %10806 = vmax.xlane.f32.xlu0 %v10805_v47  ;;  %v13880_v51 = vpop.f32.mrf.mxu1  ;;  %13909 = vmatmul.mubr.msk.f32.vlgmr.msra.gmra.mxu0 %vm1093_vm2, %v10326_v6  ;;  %v6618_v47 = vadd.f32 %v15792_v16, %v15889_v41 }
 0x93a   : > { %13917 = vmatpush3.xpose.msk.msra.mxu0 %vm1093_vm2, %v10484_v28  ;;  %13918 = vmatprep.mubr.msk.f32.mxu0 %vm14324_vm1, %v16825_v2 }
 0x93b   : > { %v10009_v52 = vpop.f32.mrf.mxu1  ;;  %13926 = vmatprep.subr.mxu0 %v16825_v2 }
 0x93c   : > { %v10808_v53 = vsel %vm1093_vm2, %v10009_v52, -inf }
 0x93d   : > { %10809 = vmax.xlane.f32.xlu1 %v10808_v53  ;;  %v13885_v60 = vpop.f32.mrf.mxu1  ;;  %13919 = vmatmul.mubr.msk.f32.vlgmr.msra.gmra.mxu0 %vm1093_vm2, %v10482_v42 }
 0x93e   : > { %13927 = vmatpush3.xpose.msk.msra.mxu0 %vm1093_vm2, %v10640_v50  ;;  %13928 = vmatprep.mubr.msk.f32.mxu0 %vm14324_vm1, %v16825_v2 }
 0x93f   : > { %v16334_v39 = vpop.f32.mrf.mxu1  ;;  %13936 = vmatprep.subr.mxu0 %v16825_v2 }
 0x940   : > { %v10811_v8 = vsel %vm1093_vm2, %v16334_v39, -inf }
 0x941   : > { %10812 = vmax.xlane.f32.xlu0 %v10811_v8  ;;  %v13890_v49 = vpop.f32.mrf.mxu1  ;;  %13929 = vmatmul.mubr.msk.f32.vlgmr.msra.gmra.mxu0 %vm1093_vm2, %v10638_v1 }
 0x942   : > { %13938 = vmatprep.mubr.msk.f32.mxu0 %vm14324_vm1, %v16825_v2  ;;  %v6628_v49 = vadd.f32 %v15803_v11, %v15893_v0  ;;  %v16919_v0 = vld [vmem:[#allocation28_spill] sm:$0xff] }
 0x943   : > { %v10165_v17 = vpop.f32.mrf.mxu1 }
 0x944   : > { %v10814_v45 = vsel %vm1093_vm2, %v10165_v17, -inf }
 0x945   : > { %10815 = vmax.xlane.f32.xlu1 %v10814_v45  ;;  %v13895_v12 = vpop.f32.mrf.mxu1 }
 0x947   : > { %v10321_v18 = vpop.f32.mrf.mxu1 }
 0x948   : > { %v10820_v15 = vsel %vm1093_vm2, %v10321_v18, -inf }
 0x949   : > { %10821 = vmax.xlane.f32.xlu1 %v10820_v15  ;;  %v13905_v56 = vpop.f32.mrf.mxu1 }
 0x94f   : > { %v10477_v7 = vpop.f32.mrf.mxu1 }
 0x950   : > { %v10826_v38 = vsel %vm1093_vm2, %v10477_v7, -inf }
 0x951   : > { %10827 = vmax.xlane.f32.xlu1 %v10826_v38  ;;  %v13915_v61 = vpop.f32.mrf.mxu1 }
 0x957   : > { %v16347_v29 = vpop.f32.mrf.mxu1 }
 0x958   : > { %v10832_v57 = vsel %vm1093_vm2, %v16347_v29, -inf }
 0x959   : > { %10833 = vmax.xlane.f32.xlu1 %v10832_v57  ;;  %v13925_v13 = vpop.f32.mrf.mxu1 }
 0x95a   : > { %v16920_v13 = vld [vmem:[#allocation3_spill] sm:$0xff] }
 0x95f   : > { %v16351_v63 = vpop.f32.mrf.mxu1 }
 0x960   : > { %v10838_v25 = vsel %vm1093_vm2, %v16351_v63, -inf }
 0x961   : > { %10839 = vmax.xlane.f32.xlu1 %v10838_v25  ;;  %v13935_v10 = vpop.f32.mrf.mxu1 }
 0x9b1   : > { %v10795_v19 = vpop.xlane.xlu1 %10794 }
 0x9b2   : > { %v10841_v21 = vsub.f32 %v16293_v59, %v10795_v19  ;;  %v16921_v19 = vld [vmem:[#allocation32_spill] sm:$0xff] }
 0x9b4   : > { %v10857_v22 = vmul.f32 1.442695, %v10841_v21  ;;  %v16922_v21 = vld [vmem:[#allocation5_spill] sm:$0xff] }
 0x9b5   : > { %v10798_v34 = vpop.xlane.xlu0 %10797 }
 0x9b6   : > { %14251 = vpow2.f32 %v10857_v22  ;;  %v10842_v62 = vsub.f32 %v16299_v48, %v10798_v34 }
 0x9b8   : > { %v10859_v6 = vmul.f32 1.442695, %v10842_v62 }
 0x9ba   : > { %14253 = vpow2.f32 %v10859_v6 }
 0x9be   : > { %v10804_v5 = vpop.xlane.xlu1 %10803 }
 0x9bf   : > { %v10844_v20 = vsub.f32 %v16311_v37, %v10804_v5  ;;  %v6623_v37 = vadd.f32 %v15786_v36, %v15887_v31  ;;  %v6633_v31 = vadd.f32 %v15797_v54, %v15891_v23  ;;  %v16918_v23 = vld [vmem:[#allocation7_spill] sm:$0xff]  ;;  %v16923_v5 = vld [vmem:[#allocation34_spill] sm:$0xff] }
 0x9c0   : > { %v6638_v38 = vadd.f32 %v16918_v23, %v15897_v32  ;;  %v6648_v32 = vadd.f32 %v16922_v21, %v16921_v19  ;;  %v16933_v23 = vld [vmem:[#allocation47_spill] sm:$0xff] }
 0x9c1   : > { %v10863_v58 = vmul.f32 1.442695, %v10844_v20  ;;  %v16924_v20 = vld [vmem:[#allocation11_spill] sm:$0xff] }
 0x9c3   : > { %14255 = vpow2.f32 %v10863_v58  ;;  %v16358_v46 = vpop.eup %14251  ;;  %v6663_v58 = vadd.f32 %v16924_v20, %v16923_v5 }
 0x9c4   : > { %v10889_v24 = vsel %vm1093_vm2, %v16358_v46, 0.0 }
 0x9c5   : > { %10890 = vadd.xlane.f32.xlu0 %v10889_v24 }
 0x9c6   : > { %v10810_v55 = vpop.xlane.xlu1 %10809 }
 0x9c7   : > { %v10846_v59 = vsub.f32 %v10009_v52, %v10810_v55  ;;  %v16362_v28 = vpop.eup %14253 }
 0x9c8   : > { %v10892_v48 = vsel %vm1093_vm2, %v16362_v28, 0.0 }
 0x9c9   : > { %v10867_v35 = vmul.f32 1.442695, %v10846_v59  ;;  %10893 = vadd.xlane.f32.xlu1 %v10892_v48  ;;  %v16925_v48 = vld [vmem:[#allocation43_spill] sm:$0xff] }
 0x9cb   : > { %14257 = vpow2.f32 %v10867_v35 }
 0x9ce   : > { %v10816_v26 = vpop.xlane.xlu1 %10815 }
 0x9cf   : > { %v10848_v30 = vsub.f32 %v10165_v17, %v10816_v26  ;;  %v16926_v26 = vld [vmem:[#allocation12_spill] sm:$0xff] }
 0x9d0   : > { %v16366_v33 = vpop.eup %14255 }
 0x9d1   : > { %v10871_v40 = vmul.f32 1.442695, %v10848_v30  ;;  %v13834_v42 = vpop.f32.mrf.mxu0  ;;  %v10898_v43 = vsel %vm1093_vm2, %v16366_v33, 0.0  ;;  %v6658_v30 = vadd.f32 %v16926_v26, %v16925_v48 }
 0x9d2   : > { %v16374_v51 = vadd.f32 %v13834_v42, %v6623_v37  ;;  %10899 = vadd.xlane.f32.xlu1 %v10898_v43  ;;  %v10822_v50 = vpop.xlane.xlu1 %10821  ;;  %v16928_v42 = vld [vmem:[#allocation31_spill] sm:$0xff] }
 0x9d3   : > { %14259 = vpow2.f32 %v10871_v40  ;;  %v10850_v52 = vsub.f32 %v10321_v18, %v10822_v50  ;;  %v9450_v53 = vpop.f32.mrf.mxu0  ;;  %v6643_v18 = vadd.f32 %v15808_v3, %v15895_v27  ;;  %v16927_v40 = vld [vmem:[#allocation44_spill] sm:$0xff] }
 0x9d4   : > { %v16376_v60 = vadd.f32 %v9450_v53, %v6618_v47  ;;  %v6673_v43 = vadd.f32 %v16928_v42, %v16927_v40  ;;  %v16930_v53 = vld [vmem:[#allocation35_spill] sm:$0xff] }
 0x9d5   : > { %v10875_v8 = vmul.f32 1.442695, %v10850_v52  ;;  %v16929_v52 = vld [vmem:[#allocation45_spill] sm:$0xff] }
 0x9d7   : > { %14261 = vpow2.f32 %v10875_v8  ;;  %v6668_v8 = vadd.f32 %v16930_v53, %v16929_v52 }
 0x9d8   : > { %v16378_v36 = vpop.eup %14257 }
 0x9d9   : > { %v10904_v1 = vsel %vm1093_vm2, %v16378_v36, 0.0  ;;  %v13837_v16 = vpop.f32.mrf.mxu0 }
 0x9da   : > { %10905 = vadd.xlane.f32.xlu1 %v10904_v1  ;;  %v10828_v41 = vpop.xlane.xlu1 %10827  ;;  %v16386_v17 = vadd.f32 %v13837_v16, %v6633_v31  ;;  %v10801_v16 = vpop.xlane.xlu0 %10800 }
 0x9db   : > { %v10852_v45 = vsub.f32 %v10477_v7, %v10828_v41  ;;  %v9460_v12 = vpop.f32.mrf.mxu0  ;;  %v6653_v7 = vadd.f32 %v16920_v13, %v16919_v0  ;;  %v10843_v0 = vsub.f32 %v16305_v4, %v10801_v16 }
 0x9dc   : > { %v16390_v56 = vadd.f32 %v9460_v12, %v6628_v49  ;;  %v16931_v49 = vld [vmem:[#allocation46_spill] sm:$0xff] }
 0x9dd   : > { %v10879_v15 = vmul.f32 1.442695, %v10852_v45  ;;  %v13840_v54 = vpop.f32.mrf.mxu0  ;;  %v16932_v45 = vld [vmem:[#allocation33_spill] sm:$0xff]  ;;  %v10861_v20 = vmul.f32 1.442695, %v10843_v0 }
 0x9de   : > { %v16394_v61 = vadd.f32 %v13840_v54, %v6643_v18  ;;  %v6683_v12 = vadd.f32 %v16932_v45, %v16931_v49 }
 0x9df   : > { %14263 = vpow2.f32 %v10879_v15  ;;  %v9470_v11 = vpop.f32.mrf.mxu0 }
 0x9e0   : > { %v16396_v57 = vpop.eup %14259  ;;  %v16400_v25 = vadd.f32 %v9470_v11, %v6638_v38  ;;  %v16934_v38 = vld [vmem:[#allocation29_spill] sm:$0xff] }
 0x9e1   : > { %v10910_v3 = vsel %vm1093_vm2, %v16396_v57, 0.0  ;;  %v13843_v27 = vpop.f32.mrf.mxu0  ;;  %v6678_v11 = vadd.f32 %v16934_v38, %v16933_v23 }
 0x9e2   : > { %10911 = vadd.xlane.f32.xlu1 %v10910_v3  ;;  %v10834_v10 = vpop.xlane.xlu1 %10833  ;;  %v16406_v22 = vadd.f32 %v13843_v27, %v6653_v7  ;;  %v10807_v7 = vpop.xlane.xlu0 %10806  ;;  %v16935_v27 = vld [vmem:[#allocation48_spill] sm:$0xff] }
 0x9e3   : > { %v10854_v34 = vsub.f32 %v16347_v29, %v10834_v10  ;;  %v9480_v6 = vpop.f32.mrf.mxu0  ;;  %v16936_v10 = vld [vmem:[#allocation30_spill] sm:$0xff] }
 0x9e4   : > { %v16409_v62 = vpop.eup %14261  ;;  %v16413_v55 = vadd.f32 %v9480_v6, %v6648_v32  ;;  %v6693_v19 = vadd.f32 %v16936_v10, %v16935_v27  ;;  %v16938_v6 = vld [vmem:[#allocation36_spill] sm:$0xff]  ;;  %v16942_v27 = vld [vmem:[#allocation38_spill] sm:$0xff]  ;;  %v16943_v10 = vld [vmem:[#allocation23_spill] sm:$0xff] }
 0x9e5   : > { %v10883_v24 = vmul.f32 1.442695, %v10854_v34  ;;  %v10916_v59 = vsel %vm1093_vm2, %v16409_v62, 0.0  ;;  %v13846_v35 = vpop.f32.mrf.mxu0  ;;  %v16937_v34 = vld [vmem:[#allocation49_spill] sm:$0xff] }
 0x9e6   : > { %10917 = vadd.xlane.f32.xlu1 %v10916_v59  ;;  %v16419_v37 = vadd.f32 %v13846_v35, %v6663_v58  ;;  %v6688_v5 = vadd.f32 %v16938_v6, %v16937_v34  ;;  %v10845_v58 = vsub.f32 %v16319_v44, %v10807_v7  ;;  %v10813_v4 = vpop.xlane.xlu0 %10812  ;;  %v16946_v34 = vld [vmem:[#allocation40_spill] sm:$0xff]  ;;  %v16947_v6 = vld [vmem:[#allocation21_spill] sm:$0xff] }
 0x9e7   : > { %14265 = vpow2.f32 %v10883_v24  ;;  %v9490_v29 = vpop.f32.mrf.mxu0  ;;  %v10847_v40 = vsub.f32 %v16334_v39, %v10813_v4 }
 0x9e8   : > { %v16423_v47 = vadd.f32 %v9490_v29, %v6658_v30  ;;  %14267 = vpow2.f32 %v10861_v20  ;;  %v10865_v29 = vmul.f32 1.442695, %v10845_v58  ;;  %v16949_v58 = vld [vmem:[#allocation26_spill] sm:$0xff] }
 0x9e9   : > { %v13849_v50 = vpop.f32.mrf.mxu0 }
 0x9ea   : > { %v16427_v31 = vadd.f32 %v13849_v50, %v6673_v43  ;;  %14269 = vpow2.f32 %v10865_v29  ;;  %v10869_v50 = vmul.f32 1.442695, %v10847_v40  ;;  %v10840_v20 = vpop.xlane.xlu1 %10839  ;;  %v16951_v29 = vld [vmem:[#allocation27_spill] sm:$0xff] }
 0x9eb   : > { %v9500_v41 = vpop.f32.mrf.mxu0  ;;  %v10856_v4 = vsub.f32 %v16351_v63, %v10840_v20 }
 0x9ec   : > { %v16429_v1 = vpop.eup %14263  ;;  %v16433_v18 = vadd.f32 %v9500_v41, %v6668_v8  ;;  %14271 = vpow2.f32 %v10869_v50 }
 0x9ed   : > { %v10922_v15 = vsel %vm1093_vm2, %v16429_v1, 0.0  ;;  %v13852_v54 = vpop.f32.mrf.mxu0 }
 0x9ee   : > { %10923 = vadd.xlane.f32.xlu1 %v10922_v15  ;;  %v16440_v13 = vadd.f32 %v13852_v54, %v6683_v12  ;;  %v16939_v54 = vld [vmem:[#allocation20_spill] sm:$0xff] }
 0x9ef   : > { %v9510_v3 = vpop.f32.mrf.mxu0 }
 0x9f0   : > { %v16444_v21 = vadd.f32 %v9510_v3, %v6678_v11  ;;  %v16940_v11 = vld [vmem:[#allocation37_spill] sm:$0xff]  ;;  %v16941_v3 = vld [vmem:[#allocation22_spill] sm:$0xff] }
 0x9f1   : > { %v13855_v32 = vpop.f32.mrf.mxu0 }
 0x9f2   : > { %v16449_v24 = vadd.f32 %v13855_v32, %v6693_v19  ;;  %v16944_v19 = vld [vmem:[#allocation39_spill] sm:$0xff]  ;;  %v16945_v32 = vld [vmem:[#allocation24_spill] sm:$0xff] }
 0x9f3   : > { %v9520_v35 = vpop.f32.mrf.mxu0 }
 0x9f4   : > { %v16451_v59 = vpop.eup %14265  ;;  %v16453_v48 = vadd.f32 %v9520_v35, %v6688_v5  ;;  %v16948_v5 = vld [vmem:[#allocation25_spill] sm:$0xff]  ;;  %v16950_v35 = vld [vmem:[#allocation42_spill] sm:$0xff] }
 0x9f5   : > { %v10928_v26 = vsel %vm1093_vm2, %v16451_v59, 0.0  ;;  %v16457_v30 = vpop.f32.mrf.mxu0  ;;  %v16474_v45 = vpop.eup %14267 }
 0x9f6   : > { %10929 = vadd.xlane.f32.xlu1 %v10928_v26  ;;  %v10817_v44 = vsel %vm1093_vm2, %v16457_v30, -inf  ;;  %v10895_v15 = vsel %vm1093_vm2, %v16474_v45, 0.0  ;;  %v10887_v26 = vmul.f32 1.442695, %v10856_v4 }
 0x9f7   : > { %v13900_v42 = vpop.f32.mrf.mxu0  ;;  %10818 = vmax.xlane.f32.xlu0 %v10817_v44  ;;  %v16480_v23 = vpop.eup %14269 }
 0x9f8   : > { %v10901_v38 = vsel %vm1093_vm2, %v16480_v23, 0.0  ;;  %14273 = vpow2.f32 %v10887_v26 }
 0x9f9   : > { %v16462_v43 = vpop.f32.mrf.mxu0  ;;  %v16486_v0 = vpop.eup %14271 }
 0x9fa   : > { %v10823_v52 = vsel %vm1093_vm2, %v16462_v43, -inf  ;;  %v10907_v7 = vsel %vm1093_vm2, %v16486_v0, 0.0 }
 0x9fb   : > { %v13910_v53 = vpop.f32.mrf.mxu0  ;;  %10824 = vmax.xlane.f32.xlu0 %v10823_v52 }
 0x9fd   : > { %v16466_v8 = vpop.f32.mrf.mxu0 }
 0x9fe   : > { %v10829_v39 = vsel %vm1093_vm2, %v16466_v8, -inf }
 0x9ff   : > { %v13920_v16 = vpop.f32.mrf.mxu0  ;;  %10830 = vmax.xlane.f32.xlu0 %v10829_v39 }
 0xa01   : > { %v16470_v41 = vpop.f32.mrf.mxu0 }
 0xa02   : > { %v10835_v49 = vsel %vm1093_vm2, %v16470_v41, -inf }
 0xa03   : > { %v13930_v12 = vpop.f32.mrf.mxu0  ;;  %10836 = vmax.xlane.f32.xlu0 %v10835_v49 }
 0xa05   : > { %v16515_v40 = vpop.eup %14273 }
 0xa06   : > { %v10934_v44 = vsel %vm1093_vm2, %v16515_v40, 0.0 }
 0xa07   : > { %11045 = vrot.lane.b32.xlu1 %v16939_v54, %s14327_s19  ;;  %10896 = vadd.xlane.f32.xlu0 %v10895_v15 }
 0xa0b   : > { %11121 = vrot.lane.b32.xlu1 %v16940_v11, %s14327_s19  ;;  %10902 = vadd.xlane.f32.xlu0 %v10901_v38 }
 0xa0f   : > { %11197 = vrot.lane.b32.xlu1 %v16941_v3, %s14327_s19  ;;  %10908 = vadd.xlane.f32.xlu0 %v10907_v7 }
 0xa13   : > { %11273 = vrot.lane.b32.xlu1 %v16942_v27, %s14327_s19 }
 0xa17   : > { %11349 = vrot.lane.b32.xlu1 %v16943_v10, %s14327_s19 }
 0xa1b   : > { %11425 = vrot.lane.b32.xlu1 %v16944_v19, %s14327_s19 }
 0xa1f   : > { %11501 = vrot.lane.b32.xlu1 %v16945_v32, %s14327_s19 }
 0xa23   : > { %11577 = vrot.lane.b32.xlu1 %v16946_v34, %s14327_s19 }
 0xa25   : > { %10969 = vrot.lane.b32.xlu0 %v16947_v6, %s14327_s19 }
 0xa27   : > { %11653 = vrot.lane.b32.xlu1 %v16948_v5, %s14327_s19 }
 0xa2b   : > { %11805 = vrot.lane.b32.xlu1 %v16949_v58, %s14327_s19 }
 0xa2f   : > { %11881 = vrot.lane.b32.xlu1 %v16950_v35, %s14327_s19 }
 0xa33   : > { %11957 = vrot.lane.b32.xlu1 %v16951_v29, %s14327_s19 }
 0xa37   : > { %12033 = vrot.lane.b32.xlu1 %v15151_v14, %s14327_s19 }
 0xa44   : > { %10935 = vadd.xlane.f32.xlu0 %v10934_v44 }
 0xa4e   : > { %v10891_v16 = vpop.xlane.xlu0 %10890 }
 0xa52   : > { %v10894_v42 = vpop.xlane.xlu1 %10893 }
 0xa53   : > { %14275 = vrcp.f32 %v10894_v42 }
 0xa5b   : > { %v10900_v50 = vpop.xlane.xlu1 %10899 }
 0xa5c   : > { %14277 = vrcp.f32 %v10900_v50 }
 0xa60   : > { %v14276_v12 = vpop.eup %14275 }
 0xa61   : > { %v10954_v54 = vmul.f32 %v14276_v12, %v16362_v28 }
 0xa63   : > { %v10906_v63 = vpop.xlane.xlu1 %10905 }
 0xa64   : > { %14279 = vrcp.f32 %v10906_v63 }
 0xa69   : > { %v14278_v10 = vpop.eup %14277 }
 0xa6a   : > { %v10956_v32 = vmul.f32 %v14278_v10, %v16366_v33 }
 0xa6b   : > { %v10912_v52 = vpop.xlane.xlu1 %10911 }
 0xa6f   : > { %v10918_v53 = vpop.xlane.xlu1 %10917 }
 0xa77   : > { %v10924_v39 = vpop.xlane.xlu1 %10923 }
 0xa7f   : > { %v16519_v49 = vpop.xlane.xlu1 %10929 }
 0xa80   : > { %v10819_v15 = vpop.xlane.xlu0 %10818 }
 0xa81   : > { %v10849_v14 = vsub.f32 %v16457_v30, %v10819_v15 }
 0xa83   : > { %v11046_v38 = vpop.permute.xlu1 %11045  ;;  %v10873_v11 = vmul.f32 1.442695, %v10849_v14 }
 0xa84   : > { %13942 = vmatpush3.msra.mxu1 %v11046_v38  ;;  %v10825_v7 = vpop.xlane.xlu0 %10824 }
 0xa85   : > { %13944 = vmatmul.mubr.msk.f32.vlgmr.msra.gmra.mxu1 %vm1093_vm2, %v10954_v54  ;;  %13951 = vmatprep.subr.mxu1 %v16825_v2  ;;  %14281 = vpow2.f32 %v10873_v11  ;;  %v10851_v3 = vsub.f32 %v16462_v43, %v10825_v7 }
 0xa86   : > { %13953 = vmatprep.mubr.msk.f32.mxu1 %vm14324_vm1, %v16825_v2 }
 0xa87   : > { %v11122_v27 = vpop.permute.xlu1 %11121  ;;  %v10877_v30 = vmul.f32 1.442695, %v10851_v3 }
 0xa88   : > { %v10831_v19 = vpop.xlane.xlu0 %10830 }
 0xa89   : > { %14283 = vpow2.f32 %v10877_v30  ;;  %v10853_v28 = vsub.f32 %v16466_v8, %v10831_v19  ;;  %v14280_v8 = vpop.eup %14279 }
 0xa8a   : > { %14285 = vrcp.f32 %v10912_v52  ;;  %v10958_v35 = vmul.f32 %v14280_v8, %v16378_v36 }
 0xa8b   : > { %v11198_v34 = vpop.permute.xlu1 %11197  ;;  %v10881_v6 = vmul.f32 1.442695, %v10853_v28  ;;  %14287 = vrcp.f32 %v10891_v16 }
 0xa8c   : > { %13952 = vmatpush3.msra.mxu1 %v11198_v34  ;;  %v10837_v5 = vpop.xlane.xlu0 %10836  ;;  %v16952_v34 = vld [vmem:[#allocation41_spill] sm:$0xff] }
 0xa8d   : > { %13954 = vmatmul.mubr.msk.f32.vlgmr.msra.gmra.mxu1 %vm1093_vm2, %v10956_v32  ;;  %13961 = vmatprep.subr.mxu1 %v16825_v2  ;;  %14289 = vpow2.f32 %v10881_v6  ;;  %v10855_v43 = vsub.f32 %v16470_v41, %v10837_v5 }
 0xa8e   : > { %13963 = vmatprep.mubr.msk.f32.mxu1 %vm14324_vm1, %v16825_v2 }
 0xa8f   : > { %v11274_v20 = vpop.permute.xlu1 %11273  ;;  %v10885_v58 = vmul.f32 1.442695, %v10855_v43 }
 0xa90   : > { %v10897_v33 = vpop.xlane.xlu0 %10896 }
 0xa91   : > { %14291 = vpow2.f32 %v10885_v58 }
 0xa92   : > { %v16535_v4 = vpop.eup %14281  ;;  %14293 = vrcp.f32 %v10897_v33 }
 0xa93   : > { %v11350_v26 = vpop.permute.xlu1 %11349  ;;  %14295 = vrcp.f32 %v10918_v53  ;;  %v10913_v29 = vsel %vm1093_vm2, %v16535_v4, 0.0 }
 0xa94   : > { %13962 = vmatpush3.msra.mxu1 %v11350_v26  ;;  %v10903_v41 = vpop.xlane.xlu0 %10902  ;;  %10914 = vadd.xlane.f32.xlu0 %v10913_v29 }
 0xa95   : > { %13964 = vmatmul.mubr.msk.f32.vlgmr.msra.gmra.mxu1 %vm1093_vm2, %v10958_v35  ;;  %14297 = vrcp.f32 %v10903_v41  ;;  %13971 = vmatprep.subr.mxu1 %v16825_v2 }
 0xa96   : > { %13973 = vmatprep.mubr.msk.f32.mxu1 %vm14324_vm1, %v16825_v2  ;;  %v16544_v44 = vpop.eup %14283  ;;  %14299 = vrcp.f32 %v10924_v39 }
 0xa97   : > { %v11426_v36 = vpop.permute.xlu1 %11425  ;;  %v14286_v42 = vpop.eup %14285  ;;  %v10919_v50 = vsel %vm1093_vm2, %v16544_v44, 0.0 }
 0xa98   : > { %v10909_v63 = vpop.xlane.xlu0 %10908  ;;  %10920 = vadd.xlane.f32.xlu0 %v10919_v50  ;;  %v14288_v52 = vpop.eup %14287  ;;  %v10960_v16 = vmul.f32 %v14286_v42, %v16396_v57 }
 0xa99   : > { %14301 = vrcp.f32 %v10909_v63  ;;  %v10953_v14 = vmul.f32 %v14288_v52, %v16358_v46 }
 0xa9a   : > { %v16548_v53 = vpop.eup %14289  ;;  %14303 = vrcp.f32 %v16519_v49 }
 0xa9b   : > { %v11502_v12 = vpop.permute.xlu1 %11501  ;;  %v10925_v15 = vsel %vm1093_vm2, %v16548_v53, 0.0 }
 0xa9c   : > { %13972 = vmatpush3.msra.mxu1 %v11502_v12  ;;  %v10970_v54 = vpop.permute.xlu0 %10969  ;;  %10926 = vadd.xlane.f32.xlu0 %v10925_v15 }
 0xa9d   : > { %13974 = vmatmul.mubr.msk.f32.vlgmr.msra.gmra.mxu1 %vm1093_vm2, %v10960_v16  ;;  %13937 = vmatpush3.msra.mxu0 %v10970_v54 }
 0xa9e   : > { %13981 = vmatprep.subr.mxu1 %v16825_v2  ;;  %v16556_v39 = vpop.eup %14291  ;;  %13939 = vmatmul.mubr.msk.f32.vlgmr.msra.gmra.mxu0 %vm1093_vm2, %v10953_v14 }
 0xa9f   : > { %13946 = vmatprep.subr.mxu0 %v16825_v2  ;;  %v11578_v57 = vpop.permute.xlu1 %11577  ;;  %v14294_v38 = vpop.eup %14293  ;;  %v10931_v46 = vsel %vm1093_vm2, %v16556_v39, 0.0  ;;  %13948 = vmatprep.mubr.msk.f32.mxu0 %vm14324_vm1, %v16825_v2 }
 0xaa0   : > { %13947 = vmatpush3.msra.mxu0 %v11122_v27  ;;  %v14296_v11 = vpop.eup %14295  ;;  %v10955_v7 = vmul.f32 %v14294_v38, %v16474_v45  ;;  %10932 = vadd.xlane.f32.xlu1 %v10931_v46 }
 0xaa1   : > { %13956 = vmatprep.subr.mxu0 %v16825_v2  ;;  %13983 = vmatprep.mubr.msk.f32.mxu1 %vm14324_vm1, %v16825_v2  ;;  %v10962_v27 = vmul.f32 %v14296_v11, %v16409_v62 }
 0xaa2   : > { %v14298_v49 = vpop.eup %14297  ;;  %13949 = vmatmul.mubr.msk.f32.vlgmr.msra.gmra.mxu0 %vm1093_vm2, %v10955_v7 }
 0xaa3   : > { %v11654_v3 = vpop.permute.xlu1 %11653  ;;  %v10957_v10 = vmul.f32 %v14298_v49, %v16480_v23  ;;  %13957 = vmatpush3.msra.mxu0 %v11274_v20  ;;  %v14300_v30 = vpop.eup %14299  ;;  %13958 = vmatprep.mubr.msk.f32.mxu0 %vm14324_vm1, %v16825_v2 }
 0xaa4   : > { %13982 = vmatpush3.msra.mxu1 %v11654_v3  ;;  %13966 = vmatprep.subr.mxu0 %v16825_v2  ;;  %v10964_v62 = vmul.f32 %v14300_v30, %v16429_v1 }
 0xaa5   : > { %13984 = vmatmul.mubr.msk.f32.vlgmr.msra.gmra.mxu1 %vm1093_vm2, %v10962_v27  ;;  %13991 = vmatprep.subr.mxu1 %v16825_v2 }
 0xaa6   : > { %v14302_v45 = vpop.eup %14301  ;;  %13959 = vmatmul.mubr.msk.f32.vlgmr.msra.gmra.mxu0 %vm1093_vm2, %v10957_v10  ;;  %13993 = vmatprep.mubr.msk.f32.mxu1 %vm14324_vm1, %v16825_v2 }
 0xaa7   : > { %v11806_v19 = vpop.permute.xlu1 %11805  ;;  %v10959_v23 = vmul.f32 %v14302_v45, %v16486_v0  ;;  %13967 = vmatpush3.msra.mxu0 %v11426_v36  ;;  %13968 = vmatprep.mubr.msk.f32.mxu0 %vm14324_vm1, %v16825_v2  ;;  %v14304_v1 = vpop.eup %14303 }
 0xaa8   : > { %13992 = vmatpush3.msra.mxu1 %v11806_v19  ;;  %13976 = vmatprep.subr.mxu0 %v16825_v2  ;;  %v10966_v0 = vmul.f32 %v14304_v1, %v16451_v59 }
 0xaa9   : > { %13994 = vmatmul.mubr.msk.f32.vlgmr.msra.gmra.mxu1 %vm1093_vm2, %v10964_v62  ;;  %14001 = vmatprep.subr.mxu1 %v16825_v2 }
 0xaaa   : > { %13969 = vmatmul.mubr.msk.f32.vlgmr.msra.gmra.mxu0 %vm1093_vm2, %v10959_v23  ;;  %14003 = vmatprep.mubr.msk.f32.mxu1 %vm14324_vm1, %v16825_v2 }
 0xaab   : > { %v11882_v28 = vpop.permute.xlu1 %11881  ;;  %13977 = vmatpush3.msra.mxu0 %v11578_v57  ;;  %13978 = vmatprep.mubr.msk.f32.mxu0 %vm14324_vm1, %v16825_v2 }
 0xaac   : > { %13986 = vmatprep.subr.mxu0 %v16825_v2 }
 0xaaf   : > { %v11958_v32 = vpop.permute.xlu1 %11957 }
 0xab0   : > { %14002 = vmatpush3.msra.mxu1 %v11958_v32 }
 0xab1   : > { %14004 = vmatmul.mubr.msk.f32.vlgmr.msra.gmra.mxu1 %vm1093_vm2, %v10966_v0  ;;  %14011 = vmatprep.subr.mxu1 %v16825_v2 }
 0xab2   : > { %12109 = vrot.lane.b32.xlu1 %v16837_v9, %s14327_s19  ;;  %14013 = vmatprep.mubr.msk.f32.mxu1 %vm14324_vm1, %v16825_v2 }
 0xab3   : > { %11729 = vrot.lane.b32.xlu0 %v16952_v34, %s14327_s19  ;;  %v12034_v43 = vpop.permute.xlu1 %12033 }
 0xacd   : > { %v10936_v6 = vpop.xlane.xlu0 %10935 }
 0xace   : > { %14305 = vrcp.f32 %v10936_v6 }
 0xadb   : > { %v14306_v58 = vpop.eup %14305 }
 0xadc   : > { %v10968_v35 = vmul.f32 %v14306_v58, %v16515_v40 }
 0xb1d   : > { %v10915_v5 = vpop.xlane.xlu0 %10914 }
 0xb1e   : > { %14307 = vrcp.f32 %v10915_v5 }
 0xb21   : > { %v10921_v59 = vpop.xlane.xlu0 %10920 }
 0xb22   : > { %14309 = vrcp.f32 %v10921_v59 }
 0xb25   : > { %v10927_v20 = vpop.xlane.xlu0 %10926 }
 0xb26   : > { %14311 = vrcp.f32 %v10927_v20  ;;  %v16642_v20 = vld [vmem:[%s16727_s10] ss:$0 sm:$0xff] }
 0xb29   : > { %v10933_v8 = vpop.xlane.xlu1 %10932  ;;  %v11730_v29 = vpop.permute.xlu0 %11729 }
 0xb2a   : > { %14313 = vrcp.f32 %v10933_v8 }
 0xb2b   : > { %v14308_v33 = vpop.eup %14307 }
 0xb2c   : > { %v10961_v9 = vmul.f32 %v14308_v33, %v16535_v4 }
 0xb2d   : > { %v12110_v26 = vpop.permute.xlu1 %12109 }
 0xb2e   : > { %13979 = vmatmul.mubr.msk.f32.vlgmr.msra.gmra.mxu0 %vm1093_vm2, %v10961_v9  ;;  %14012 = vmatpush3.msra.mxu1 %v12110_v26 }
 0xb2f   : > { %v14310_v41 = vpop.eup %14309  ;;  %13987 = vmatpush3.msra.mxu0 %v11730_v29  ;;  %14014 = vmatmul.mubr.msk.f32.vlgmr.msra.gmra.mxu1 %vm1093_vm2, %v10968_v35 }
 0xb30   : > { %v10963_v36 = vmul.f32 %v14310_v41, %v16544_v44  ;;  %13988 = vmatprep.mubr.msk.f32.mxu0 %vm14324_vm1, %v16825_v2  ;;  %13996 = vmatprep.subr.mxu0 %v16825_v2  ;;  %v1092_v44 = vld [vmem:[%s16726_s9 + $0x18] sm:$0xff] }
 0xb32   : > { %13989 = vmatmul.mubr.msk.f32.vlgmr.msra.gmra.mxu0 %vm1093_vm2, %v10963_v36 }
 0xb33   : > { %v14312_v4 = vpop.eup %14311  ;;  %13997 = vmatpush3.msra.mxu0 %v11882_v28  ;;  %13998 = vmatprep.mubr.msk.f32.mxu0 %vm14324_vm1, %v16825_v2 }
 0xb34   : > { %v10965_v40 = vmul.f32 %v14312_v4, %v16548_v53  ;;  %14006 = vmatprep.subr.mxu0 %v16825_v2 }
 0xb36   : > { %13999 = vmatmul.mubr.msk.f32.vlgmr.msra.gmra.mxu0 %vm1093_vm2, %v10965_v40 }
 0xb37   : > { %v14314_v42 = vpop.eup %14313  ;;  %14007 = vmatpush3.msra.mxu0 %v12034_v43  ;;  %14008 = vmatprep.mubr.msk.f32.mxu0 %vm14324_vm1, %v16825_v2 }
 0xb38   : > { %v10967_v50 = vmul.f32 %v14314_v42, %v16556_v39  ;;  %14016 = vmatprep.subr.mxu0 %v1092_v44 }
 0xb3a   : > { %14009 = vmatmul.mubr.msk.f32.vlgmr.msra.gmra.mxu0 %vm1093_vm2, %v10967_v50 }
 0xb3b   : > { %14017 = vmatpush3.msra.mxu0 %v1092_v44 }
 0xb45   : > { %v11117_v63 = vpop.f32.mrf.mxu1 }
 0xb47   : > { %v13945_v52 = vpop.f32.mrf.mxu1 }
 0xb4d   : > { %v11269_v53 = vpop.f32.mrf.mxu1 }
 0xb4f   : > { %v13955_v16 = vpop.f32.mrf.mxu1 }
 0xb55   : > { %v11421_v12 = vpop.f32.mrf.mxu1 }
 0xb57   : > { %v13965_v15 = vpop.f32.mrf.mxu1 }
 0xb5d   : > { %v11573_v14 = vpop.f32.mrf.mxu1 }
 0xb5e   : > { %v11041_v54 = vpop.f32.mrf.mxu0 }
 0xb5f   : > { %v13975_v57 = vpop.f32.mrf.mxu1  ;;  %14018 = vmatprep.mubr.msk.f32.mxu0 %vm1093_vm2, %v11041_v54 }
 0xb60   : > { %v13940_v38 = vpop.f32.mrf.mxu0  ;;  %14019 = vmatmul.mubr.msk.f32.vlgmr.msra.gmra.mxu0 %vm1093_vm2, %v11117_v63 }
 0xb62   : > { %v11193_v2 = vpop.f32.mrf.mxu0 }
 0xb63   : > { %14021 = vmatprep.mubr.msk.f32.mxu0 %vm1093_vm2, %v11193_v2 }
 0xb64   : > { %v13950_v39 = vpop.f32.mrf.mxu0  ;;  %14022 = vmatmul.mubr.msk.f32.gmra.mxu0 %vm1093_vm2, %v11269_v53 }
 0xb65   : > { %v11725_v46 = vpop.f32.mrf.mxu1 }
 0xb66   : > { %v11345_v11 = vpop.f32.mrf.mxu0 }
 0xb67   : > { %v13985_v7 = vpop.f32.mrf.mxu1  ;;  %14024 = vmatprep.mubr.msk.f32.mxu0 %vm1093_vm2, %v11345_v11 }
 0xb68   : > { %v13960_v49 = vpop.f32.mrf.mxu0  ;;  %14025 = vmatmul.mubr.msk.f32.gmra.mxu0 %vm1093_vm2, %v11421_v12 }
 0xb69   : > { %v11877_v3 = vpop.f32.mrf.mxu1 }
 0xb6a   : > { %v11497_v27 = vpop.f32.mrf.mxu0 }
 0xb6b   : > { %v13995_v10 = vpop.f32.mrf.mxu1  ;;  %14027 = vmatprep.mubr.msk.f32.mxu0 %vm1093_vm2, %v11497_v27 }
 0xb6c   : > { %v13970_v30 = vpop.f32.mrf.mxu0  ;;  %14028 = vmatmul.mubr.msk.f32.gmra.mxu0 %vm1093_vm2, %v11573_v14 }
 0xb71   : > { %v12029_v45 = vpop.f32.mrf.mxu1 }
 0xb73   : > { %v14005_v19 = vpop.f32.mrf.mxu1 }
 0xbee   : > { %v11649_v62 = vpop.f32.mrf.mxu0 }
 0xbef   : > { %v12181_v23 = vpop.f32.mrf.mxu1  ;;  %14030 = vmatprep.mubr.msk.f32.mxu0 %vm1093_vm2, %v11649_v62 }
 0xbf0   : > { %v13980_v28 = vpop.f32.mrf.mxu0  ;;  %14031 = vmatmul.mubr.msk.f32.gmra.mxu0 %vm1093_vm2, %v11725_v46 }
 0xbf1   : > { %v14015_v1 = vpop.f32.mrf.mxu1 }
 0xbf2   : > { %v11801_v0 = vpop.f32.mrf.mxu0 }
 0xbf3   : > { %14033 = vmatprep.mubr.msk.f32.mxu0 %vm1093_vm2, %v11801_v0 }
 0xbf4   : > { %v13990_v32 = vpop.f32.mrf.mxu0  ;;  %14034 = vmatmul.mubr.msk.f32.gmra.mxu0 %vm1093_vm2, %v11877_v3 }
 0xbf6   : > { %v11953_v34 = vpop.f32.mrf.mxu0 }
 0xbf7   : > { %14036 = vmatprep.mubr.msk.f32.mxu0 %vm1093_vm2, %v11953_v34 }
 0xbf8   : > { %v14000_v6 = vpop.f32.mrf.mxu0  ;;  %14037 = vmatmul.mubr.msk.f32.gmra.mxu0 %vm1093_vm2, %v12029_v45 }
 0xbfa   : > { %v12105_v5 = vpop.f32.mrf.mxu0 }
 0xbfb   : > { %14039 = vmatprep.mubr.msk.f32.mxu0 %vm1093_vm2, %v12105_v5 }
 0xbfc   : > { %v14010_v59 = vpop.f32.mrf.mxu0  ;;  %14040 = vmatmul.mubr.msk.f32.gmra.mxu0 %vm1093_vm2, %v12181_v23 }
 0xc20   : > { %v14020_v43 = vpop.f32.mrf.mxu0 }
 0xc21   : > { %v12379_v8 = vadd.f32 %v14020_v43, %v16374_v51 }
 0xc22   : > { %v12299_v58 = vpop.f32.mrf.mxu0 }
 0xc23   : > { %v12402_v33 = vadd.f32 %v16642_v20, %v12379_v8  ;;  %v12378_v9 = vadd.f32 %v12299_v58, %v16376_v60 }
 0xc24   : > { %v14023_v35 = vpop.f32.mrf.mxu0 }
 0xc25   : > { %12418 = vst.msk [vmem:[%s16649_s29 + $0x8] sm:$0xff] %vm491_vm0, %v12402_v33  ;;  %v12401_v51 = vadd.f32 %v16642_v20, %v12378_v9  ;;  %v12381_v26 = vadd.f32 %v14023_v35, %v16386_v17 }
 0xc26   : > { %v12309_v29 = vpop.f32.mrf.mxu0 }
 0xc27   : > { %12417 = vst.msk [vmem:[%s16649_s29] sm:$0xff] %vm491_vm0, %v12401_v51  ;;  %v12404_v41 = vadd.f32 %v16642_v20, %v12381_v26  ;;  %v12380_v36 = vadd.f32 %v12309_v29, %v16390_v56 }
 0xc28   : > { %v14026_v4 = vpop.f32.mrf.mxu0 }
 0xc29   : > { %12420 = vst.msk [vmem:[%s16649_s29 + $0x18] sm:$0xff] %vm491_vm0, %v12404_v41  ;;  %v12403_v60 = vadd.f32 %v16642_v20, %v12380_v36  ;;  %v12383_v40 = vadd.f32 %v14026_v4, %v16394_v61 }
 0xc2a   : > { %v12319_v44 = vpop.f32.mrf.mxu0 }
 0xc2b   : > { %12419 = vst.msk [vmem:[%s16649_s29 + $0x10] sm:$0xff] %vm491_vm0, %v12403_v60  ;;  %v12406_v17 = vadd.f32 %v16642_v20, %v12383_v40  ;;  %v12382_v42 = vadd.f32 %v12319_v44, %v16400_v25 }
 0xc2c   : > { %v14029_v50 = vpop.f32.mrf.mxu0 }
 0xc2d   : > { %12422 = vst.msk [vmem:[%s16649_s29 + $0x28] sm:$0xff] %vm491_vm0, %v12406_v17  ;;  %v12405_v56 = vadd.f32 %v16642_v20, %v12382_v42  ;;  %v12385_v63 = vadd.f32 %v14029_v50, %v16406_v22 }
 0xc2e   : > { %v12329_v52 = vpop.f32.mrf.mxu0 }
 0xc2f   : > { %12421 = vst.msk [vmem:[%s16649_s29 + $0x20] sm:$0xff] %vm491_vm0, %v12405_v56  ;;  %v12408_v61 = vadd.f32 %v16642_v20, %v12385_v63  ;;  %v12384_v53 = vadd.f32 %v12329_v52, %v16413_v55 }
 0xc31   : > { %12424 = vst.msk [vmem:[%s16649_s29 + $0x38] sm:$0xff] %vm491_vm0, %v12408_v61  ;;  %v12407_v25 = vadd.f32 %v16642_v20, %v12384_v53 }
 0xc33   : > { %12423 = vst.msk [vmem:[%s16649_s29 + $0x30] sm:$0xff] %vm491_vm0, %v12407_v25 }
 0xcb0   : > { %v14032_v16 = vpop.f32.mrf.mxu0 }
 0xcb1   : > { %v12387_v12 = vadd.f32 %v14032_v16, %v16419_v37 }
 0xcb2   : > { %v12339_v15 = vpop.f32.mrf.mxu0 }
 0xcb3   : > { %v12410_v22 = vadd.f32 %v16642_v20, %v12387_v12  ;;  %v12386_v14 = vadd.f32 %v12339_v15, %v16423_v47 }
 0xcb4   : > { %v14035_v54 = vpop.f32.mrf.mxu0 }
 0xcb5   : > { %12426 = vst.msk [vmem:[%s16649_s29 + $0x48] sm:$0xff] %vm491_vm0, %v12410_v22  ;;  %v12409_v55 = vadd.f32 %v16642_v20, %v12386_v14  ;;  %v12389_v57 = vadd.f32 %v14035_v54, %v16427_v31 }
 0xcb6   : > { %v12349_v38 = vpop.f32.mrf.mxu0 }
 0xcb7   : > { %12425 = vst.msk [vmem:[%s16649_s29 + $0x40] sm:$0xff] %vm491_vm0, %v12409_v55  ;;  %v12412_v37 = vadd.f32 %v16642_v20, %v12389_v57  ;;  %v12388_v2 = vadd.f32 %v12349_v38, %v16433_v18 }
 0xcb8   : > { %v14038_v39 = vpop.f32.mrf.mxu0 }
 0xcb9   : > { %12428 = vst.msk [vmem:[%s16649_s29 + $0x58] sm:$0xff] %vm491_vm0, %v12412_v37  ;;  %v12411_v47 = vadd.f32 %v16642_v20, %v12388_v2  ;;  %v12391_v46 = vadd.f32 %v14038_v39, %v16440_v13 }
 0xcba   : > { %v12359_v11 = vpop.f32.mrf.mxu0 }
 0xcbb   : > { %12427 = vst.msk [vmem:[%s16649_s29 + $0x50] sm:$0xff] %vm491_vm0, %v12411_v47  ;;  %v12414_v31 = vadd.f32 %v16642_v20, %v12391_v46  ;;  %v12390_v7 = vadd.f32 %v12359_v11, %v16444_v21 }
 0xcbc   : > { %v14041_v49 = vpop.f32.mrf.mxu0 }
 0xcbd   : > { %12430 = vst.msk [vmem:[%s16649_s29 + $0x68] sm:$0xff] %vm491_vm0, %v12414_v31  ;;  %v12413_v18 = vadd.f32 %v16642_v20, %v12390_v7  ;;  %v12393_v3 = vadd.f32 %v14041_v49, %v16449_v24 }
 0xcbe   : > { %v12369_v27 = vpop.f32.mrf.mxu0 }
 0xcbf   : > { %12429 = vst.msk [vmem:[%s16649_s29 + $0x60] sm:$0xff] %vm491_vm0, %v12413_v18  ;;  %v12416_v10 = vadd.f32 %v16642_v20, %v12393_v3  ;;  %v12392_v13 = vadd.f32 %v12369_v27, %v16453_v48 }
 0xcc1   : > { %12432 = vst.msk [vmem:[%s16649_s29 + $0x78] sm:$0xff] %vm491_vm0, %v12416_v10  ;;  %v12415_v30 = vadd.f32 %v16642_v20, %v12392_v13 }
 0xcc3   : > { %12431 = vst.msk [vmem:[%s16649_s29 + $0x70] sm:$0xff] %vm491_vm0, %v12415_v30 }
 0xcc4 PF: > { %s21_s17 = sadd.s32 1, %s14321_s17  }
 0xcc5   : > { %p18_p4 = scmp.ge.s32.totalorder %s21_s17, 4  }
 0xcc7   :  { %20 = sbr.rel (!%p18_p4) target bundleno = 1 (0x1), region = 100 }

</bundles_post_ra>
